<compile_context>
chip_gen: v6e
topology: v6e:2x2x1
jax: 0.10.0
libtpu: 0.0.40
codegen_flags: <defaults>
</compile_context>

<pallas_src>
import functools

import jax
import jax.numpy as jnp
from jax.experimental import pallas as pl
from jax.experimental.pallas import tpu as pltpu


def _padding(downsample, kernel_size):
    """Same formula as the PyTorch module (floor((k - d + 1) / 2), clamped)."""
    return max(0, (kernel_size - downsample + 1) // 2)


# ---------------------------------------------------------------------------
# Kernel 1: fused stride-1 Conv1d + folded BatchNorm affine + optional ReLU
# ---------------------------------------------------------------------------
def _conv1d_s1_kernel(x_ref, w_ref, scale_ref, shift_ref, o_ref,
                      *, n_taps, l_out, apply_relu):
    # x_ref: (L_pad, Cin); w_ref: (K, Cin, Cout); scale/shift: (1, Cout)
    # o_ref: (L_out, Cout)
    cout = o_ref.shape[-1]
    acc = jnp.zeros((l_out, cout), jnp.float32)
    for k in range(n_taps):  # static tap loop -> K dense MXU matmuls
        acc = acc + jnp.dot(x_ref[k:k + l_out, :], w_ref[k],
                            preferred_element_type=jnp.float32)
    y = acc * scale_ref[...] + shift_ref[...]
    if apply_relu:
        y = jnp.maximum(y, 0.0)
    o_ref[...] = y.astype(o_ref.dtype)


def conv1d_bn_relu(x, w_t, scale, shift, *, padding, apply_relu=True):
    """x: (B, L, Cin); w_t: (K, Cin, Cout); scale/shift: (1, Cout) -> (B, L_out, Cout)."""
    B, L, Cin = x.shape
    K, _, Cout = w_t.shape
    L_pad = L + 2 * padding
    L_out = L_pad - K + 1
    x_pad = jnp.pad(x, ((0, 0), (padding, padding), (0, 0)))
    kern = functools.partial(_conv1d_s1_kernel, n_taps=K, l_out=L_out,
                             apply_relu=apply_relu)
    return pl.pallas_call(
        kern,
        out_shape=jax.ShapeDtypeStruct((B, L_out, Cout), jnp.float32),
        grid=(B,),
        in_specs=[
            pl.BlockSpec((None, L_pad, Cin), lambda b: (b, 0, 0)),
            pl.BlockSpec((K, Cin, Cout), lambda b: (0, 0, 0)),
            pl.BlockSpec((1, Cout), lambda b: (0, 0)),
            pl.BlockSpec((1, Cout), lambda b: (0, 0)),
        ],
        out_specs=pl.BlockSpec((None, L_out, Cout), lambda b: (b, 0, 0)),
        compiler_params=pltpu.CompilerParams(dimension_semantics=("parallel",)),
    )(x_pad, w_t, scale, shift)


# ---------------------------------------------------------------------------
# Kernel 2: fused Conv1d(stride, +bias) + SE layer + skip(1x1 conv) add
#           + optional final folded BatchNorm + ReLU
# ---------------------------------------------------------------------------
def _res_block_tail_kernel(yt_ref, w2_ref, b2_ref, wse1_ref, wse2_ref,
                           skip_ref, wskip_ref, bskip_ref, oscale_ref, oshift_ref,
                           o_ref, *, n_taps, final_relu):
    # yt_ref: (K, L_out, C)   tap-gathered conv2 input (stride already applied)
    # w2_ref: (K, C, Cout)    b2_ref: (1, Cout)
    # wse1: (Cout, Cr)        wse2: (Cr, Cout)
    # skip_ref: (L_out, Cs)   wskip: (Cs, Cout)  bskip: (1, Cout)
    # oscale/oshift: (1, Cout)  o_ref: (L_out, Cout)
    l_out, cout = o_ref.shape
    acc = jnp.zeros((l_out, cout), jnp.float32)
    for k in range(n_taps):
        acc = acc + jnp.dot(yt_ref[k], w2_ref[k],
                            preferred_element_type=jnp.float32)
    acc = acc + b2_ref[...]

    # Squeeze-and-excitation: global average pool -> FC -> ReLU -> FC -> sigmoid.
    pooled = jnp.mean(acc, axis=0, keepdims=True)                       # (1, Cout)
    hid = jnp.dot(pooled, wse1_ref[...], preferred_element_type=jnp.float32)
    hid = jnp.maximum(hid, 0.0)                                         # (1, Cr)
    # Contraction depth Cr is tiny -> VPU broadcast multiply-adds, not the MXU.
    c_red = wse2_ref.shape[0]
    gate = jnp.zeros((1, cout), jnp.float32)
    for r in range(c_red):
        gate = gate + hid[:, r:r + 1] * wse2_ref[r:r + 1, :]
    gate = 1.0 / (1.0 + jnp.exp(-gate))                                 # sigmoid
    acc = acc * gate

    # Skip connection: 1x1 conv (identity weight / zero bias when unchanged).
    skip = jnp.dot(skip_ref[...], wskip_ref[...],
                   preferred_element_type=jnp.float32)
    acc = acc + skip + bskip_ref[...]

    # Optional folded final BatchNorm + ReLU (only on the last residual block).
    y = acc * oscale_ref[...] + oshift_ref[...]
    if final_relu:
        y = jnp.maximum(y, 0.0)
    o_ref[...] = y.astype(o_ref.dtype)


def res_block_tail(y, w2_t, b2, w_se1, w_se2, skip_raw, w_skip, b_skip,
                   out_scale, out_shift, *, stride, padding, final_relu):
    """Fused tail of a residual block. All operands channels-last."""
    B, L, C = y.shape
    K, _, Cout = w2_t.shape
    Cs = skip_raw.shape[-1]
    L_pad = L + 2 * padding
    L_out = (L_pad - K) // stride + 1
    y_pad = jnp.pad(y, ((0, 0), (padding, padding), (0, 0)))
    # Per-tap strided gather done by XLA: the kernel then only does dense,
    # stride-free matmuls (no strided VMEM loads inside the kernel).
    span = (L_out - 1) * stride + 1
    y_taps = jnp.stack(
        [y_pad[:, k:k + span:stride, :] for k in range(K)], axis=1)     # (B, K, L_out, C)
    kern = functools.partial(_res_block_tail_kernel, n_taps=K,
                             final_relu=final_relu)
    return pl.pallas_call(
        kern,
        out_shape=jax.ShapeDtypeStruct((B, L_out, Cout), jnp.float32),
        grid=(B,),
        in_specs=[
            pl.BlockSpec((None, K, L_out, C), lambda b: (b, 0, 0, 0)),
            pl.BlockSpec((K, C, Cout), lambda b: (0, 0, 0)),
            pl.BlockSpec((1, Cout), lambda b: (0, 0)),
            pl.BlockSpec(w_se1.shape, lambda b: (0, 0)),
            pl.BlockSpec(w_se2.shape, lambda b: (0, 0)),
            pl.BlockSpec((None, L_out, Cs), lambda b: (b, 0, 0)),
            pl.BlockSpec(w_skip.shape, lambda b: (0, 0)),
            pl.BlockSpec((1, Cout), lambda b: (0, 0)),
            pl.BlockSpec((1, Cout), lambda b: (0, 0)),
            pl.BlockSpec((1, Cout), lambda b: (0, 0)),
        ],
        out_specs=pl.BlockSpec((None, L_out, Cout), lambda b: (b, 0, 0)),
        compiler_params=pltpu.CompilerParams(dimension_semantics=("parallel",)),
    )(y_taps, w2_t, b2, w_se1, w_se2, skip_raw, w_skip, b_skip, out_scale, out_shift)


# ---------------------------------------------------------------------------
# Glue (left to XLA on purpose, per the fusion feedback)
# ---------------------------------------------------------------------------
def maxpool1d_cl(x, s):
    """MaxPool1d(kernel=s, stride=s, ceil_mode=True) on channels-last (B, L, C)."""
    B, L, C = x.shape
    L_out = -(-L // s)
    pad = L_out * s - L
    if pad:
        x = jnp.pad(x, ((0, 0), (0, pad), (0, 0)), constant_values=-jnp.inf)
    return x.reshape(B, L_out, s, C).max(axis=2)


def _bn_fold(d, eps=1e-5):
    scale = d["gamma"] / jnp.sqrt(d["var"] + eps)
    shift = d["beta"] - d["mean"] * scale
    return scale, shift


# ---------------------------------------------------------------------------
# ResNet1d forward (Pallas path, channels-last)
# ---------------------------------------------------------------------------
def resnet1d_forward_pallas(x_cl, p):
    def w_cl(w):   # torch (Cout, Cin, K) -> (K, Cin, Cout)
        return jnp.transpose(w, (2, 1, 0))

    # Stem: conv1 + bn1 + relu.
    # TODO(synk): a strided stem conv (downsampling[0] > 1) would reuse the
    #             tap-gather path of res_block_tail; not needed for this config.
    assert p["stem_stride"] == 1
    s, sh = _bn_fold(p["bn1"])
    h = conv1d_bn_relu(x_cl, w_cl(p["conv1_w"]), s.reshape(1, -1), sh.reshape(1, -1),
                       padding=p["pad_stem"], apply_relu=True)

    nb = len(p["blocks"])
    for i, blk in enumerate(p["blocks"]):
        x_in = h
        ds = blk["downsample"]
        # Skip path uses the pre-activation input.
        skip_raw = maxpool1d_cl(x_in, ds) if ds > 1 else x_in
        if "skip_w" in blk:
            w_skip = blk["skip_w"][:, :, 0].T                 # (Cin_prev, Cout)
            b_skip = blk["skip_b"].reshape(1, -1)
        else:
            c = x_in.shape[-1]
            w_skip = jnp.eye(c, dtype=jnp.float32)
            b_skip = jnp.zeros((1, c), jnp.float32)

        z = x_in
        if "bn_pre" in blk:   # pre-activation BN + ReLU (dropout1 = identity)
            sp, shp = _bn_fold(blk["bn_pre"])
            z = jnp.maximum(z * sp.reshape(1, 1, -1) + shp.reshape(1, 1, -1), 0.0)

        # conv1 + bn2 + relu  (dropout2 = identity)
        sm, shm = _bn_fold(blk["bn_mid"])
        z = conv1d_bn_relu(z, w_cl(blk["conv1_w"]), sm.reshape(1, -1),
                           shm.reshape(1, -1), padding=blk["pad1"], apply_relu=True)

        # conv2 + SE + skip add (+ network-level bn2 + relu folded into last block)
        is_last = i == nb - 1
        cout = blk["conv2_w"].shape[0]
        if is_last:
            fs, fsh = _bn_fold(p["bn_out"])
        else:
            fs = jnp.ones((cout,), jnp.float32)
            fsh = jnp.zeros((cout,), jnp.float32)
        h = res_block_tail(z, w_cl(blk["conv2_w"]), blk["conv2_b"].reshape(1, -1),
                           blk["se_w1"].T, blk["se_w2"].T,
                           skip_raw, w_skip, b_skip,
                           fs.reshape(1, -1), fsh.reshape(1, -1),
                           stride=ds, padding=blk["pad2"], final_relu=is_last)
    return h   # final dropout = identity (eval mode)


# ---------------------------------------------------------------------------
# Pure-JAX reference (mirrors the PyTorch module, channels-first)
# ---------------------------------------------------------------------------
def resnet1d_ref(x, p):
    eps = 1e-5

    def bn(t, d):
        return ((t - d["mean"][None, :, None])
                * (d["gamma"][None, :, None] / jnp.sqrt(d["var"][None, :, None] + eps))
                + d["beta"][None, :, None])

    def conv(t, w, b, stride, pad):
        out = jax.lax.conv_general_dilated(
            t, w, window_strides=(stride,), padding=[(pad, pad)],
            dimension_numbers=("NCH", "OIH", "NCH"))
        if b is not None:
            out = out + b[None, :, None]
        return out

    def relu(t):
        return jnp.maximum(t, 0.0)

    def maxpool(t, s):
        Bb, C, L = t.shape
        Lo = -(-L // s)
        padn = Lo * s - L
        if padn:
            t = jnp.pad(t, ((0, 0), (0, 0), (0, padn)), constant_values=-jnp.inf)
        return t.reshape(Bb, C, Lo, s).max(axis=3)

    h = relu(bn(conv(x, p["conv1_w"], None, p["stem_stride"], p["pad_stem"]), p["bn1"]))
    for blk in p["blocks"]:
        x_in = h
        skip = maxpool(x_in, blk["downsample"]) if blk["downsample"] > 1 else x_in
        if "skip_w" in blk:
            skip = conv(skip, blk["skip_w"], blk["skip_b"], 1, 0)
        z = x_in
        if "bn_pre" in blk:
            z = relu(bn(z, blk["bn_pre"]))
        z = conv(z, blk["conv1_w"], None, 1, blk["pad1"])
        z = relu(bn(z, blk["bn_mid"]))
        z = conv(z, blk["conv2_w"], blk["conv2_b"], blk["downsample"], blk["pad2"])
        y = z.mean(axis=2)                                   # SE
        y = relu(y @ blk["se_w1"].T)
        y = jax.nn.sigmoid(y @ blk["se_w2"].T)
        z = z * y[:, :, None]
        h = z + skip
    return relu(bn(h, p["bn_out"]))


# ---------------------------------------------------------------------------
# Deterministic parameter construction (PyTorch layouts)
# ---------------------------------------------------------------------------
def init_params(key, n_in, filter_size, downsampling, kernel_size, se_reduction):
    keys = iter(jax.random.split(key, 64))

    def nrm(shape, s=0.1):
        return s * jax.random.normal(next(keys), shape, jnp.float32)

    def pos(shape):
        return jax.random.uniform(next(keys), shape, jnp.float32, 0.5, 1.5)

    def bn_params(c):
        return {"gamma": pos((c,)), "beta": nrm((c,)),
                "mean": nrm((c,)), "var": pos((c,))}

    p = {}
    c_out = filter_size[0]
    p["conv1_w"] = nrm((c_out, n_in, kernel_size))
    p["bn1"] = bn_params(c_out)
    p["pad_stem"] = _padding(1, kernel_size)
    p["stem_stride"] = downsampling[0]

    blocks = []
    c_prev = c_out
    for i, (fs, ds) in enumerate(zip(filter_size[1:], downsampling[1:])):
        blk = {"downsample": ds,
               "pad1": _padding(1, kernel_size),
               "pad2": _padding(ds, kernel_size)}
        if i != 0:                              # first block has no pre BN/ReLU
            blk["bn_pre"] = bn_params(c_prev)
        blk["conv1_w"] = nrm((fs, c_prev, kernel_size))
        blk["bn_mid"] = bn_params(fs)
        blk["conv2_w"] = nrm((fs, fs, kernel_size))
        blk["conv2_b"] = nrm((fs,))
        cr = fs // se_reduction
        blk["se_w1"] = nrm((cr, fs))            # torch Linear layout (out, in)
        blk["se_w2"] = nrm((fs, cr))
        if fs != c_prev:
            blk["skip_w"] = nrm((fs, c_prev, 1))
            blk["skip_b"] = nrm((fs,))
        blocks.append(blk)
        c_prev = fs
    p["blocks"] = blocks
    p["bn_out"] = bn_params(c_prev)
    return p


if __name__ == "__main__":
    B, C_IN, L_IN = 2, 8, 64
    kernel_size = 5
    filter_size = [16, 32, 32]
    downsampling = [1, 2, 1]
    se_reduction = 16

    key = jax.random.PRNGKey(0)
    k_params, k_x = jax.random.split(key)
    params = init_params(k_params, C_IN, filter_size, downsampling,
                         kernel_size, se_reduction)
    x = jax.random.normal(k_x, (B, C_IN, L_IN), jnp.float32)   # torch layout (B, C, L)

    # Pallas path works channels-last.
    fwd = jax.jit(lambda xc: resnet1d_forward_pallas(xc, params))
    out = fwd(jnp.transpose(x, (0, 2, 1)))
    out = jax.block_until_ready(out)

    # Reference check against the plain-JAX mirror of the PyTorch module.
    ref = resnet1d_ref(x, params)
    ref_cl = jnp.transpose(ref, (0, 2, 1))

    assert out.shape == ref_cl.shape, (out.shape, ref_cl.shape)
    assert jnp.all(jnp.isfinite(out))
    assert jnp.allclose(out, ref_cl, atol=1e-3, rtol=1e-3), \
        float(jnp.max(jnp.abs(out - ref_cl)))

    print("KERNEL_OK")
</pallas_src>

<mosaic_0001>
module attributes {stable_mosaic.version = 11 : i64} {
  func.func @_conv1d_s1_kernel(%arg0: i32, %arg1: memref<1x68x8xf32, #tpu.memory_space<vmem>>, %arg2: memref<5x8x16xf32, #tpu.memory_space<vmem>>, %arg3: memref<1x16xf32, #tpu.memory_space<vmem>>, %arg4: memref<1x16xf32, #tpu.memory_space<vmem>>, %arg5: memref<1x64x16xf32, #tpu.memory_space<vmem>>) attributes {dimension_semantics = [#tpu.dimension_semantics<parallel>], iteration_bounds = array<i64: 2>, scalar_prefetch = 0 : i64, scratch_operands = 0 : i64, tpu.core_type = #tpu.core_type<tc>, window_params = [{transform_indices = @transform_0, window_bounds = array<i64: 1, 68, 8>}, {pipeline_mode = #tpu.pipeline_mode<synchronous>, transform_indices = @transform_1, window_bounds = array<i64: 5, 8, 16>}, {pipeline_mode = #tpu.pipeline_mode<synchronous>, transform_indices = @transform_2, window_bounds = array<i64: 1, 16>}, {pipeline_mode = #tpu.pipeline_mode<synchronous>, transform_indices = @transform_3, window_bounds = array<i64: 1, 16>}, {transform_indices = @transform_4, window_bounds = array<i64: 1, 64, 16>}]} {
    %cst = arith.constant 0.000000e+00 : f32
    %0 = vector.broadcast %cst : f32 to vector<64x16xf32>
    %c0 = arith.constant 0 : index
    %c0_0 = arith.constant 0 : index
    %c0_1 = arith.constant 0 : index
    %1 = vector.load %arg1[%c0, %c0_0, %c0_1] : memref<1x68x8xf32, #tpu.memory_space<vmem>>, vector<1x64x8xf32>
    %2 = vector.shape_cast %1 : vector<1x64x8xf32> to vector<64x8xf32>
    %c0_2 = arith.constant 0 : index
    %c0_3 = arith.constant 0 : index
    %c0_4 = arith.constant 0 : index
    %3 = vector.load %arg2[%c0_2, %c0_3, %c0_4] : memref<5x8x16xf32, #tpu.memory_space<vmem>>, vector<1x8x16xf32>
    %4 = vector.shape_cast %3 : vector<1x8x16xf32> to vector<8x16xf32>
    %cst_5 = arith.constant dense<0.000000e+00> : vector<64x16xf32>
    %5 = tpu.matmul %2, %4, %cst_5 {dimension_numbers = #tpu.dot_dimension_numbers<[1], [0], [0], [1], [0, 0, 1, 1], [], []>} : vector<64x8xf32>, vector<8x16xf32>, vector<64x16xf32> -> vector<64x16xf32>
    %6 = arith.addf %0, %5 : vector<64x16xf32>
    %c0_6 = arith.constant 0 : index
    %c1 = arith.constant 1 : index
    %c0_7 = arith.constant 0 : index
    %7 = vector.load %arg1[%c0_6, %c1, %c0_7] : memref<1x68x8xf32, #tpu.memory_space<vmem>>, vector<1x64x8xf32>
    %8 = vector.shape_cast %7 : vector<1x64x8xf32> to vector<64x8xf32>
    %c1_8 = arith.constant 1 : index
    %c0_9 = arith.constant 0 : index
    %c0_10 = arith.constant 0 : index
    %9 = vector.load %arg2[%c1_8, %c0_9, %c0_10] : memref<5x8x16xf32, #tpu.memory_space<vmem>>, vector<1x8x16xf32>
    %10 = vector.shape_cast %9 : vector<1x8x16xf32> to vector<8x16xf32>
    %cst_11 = arith.constant dense<0.000000e+00> : vector<64x16xf32>
    %11 = tpu.matmul %8, %10, %cst_11 {dimension_numbers = #tpu.dot_dimension_numbers<[1], [0], [0], [1], [0, 0, 1, 1], [], []>} : vector<64x8xf32>, vector<8x16xf32>, vector<64x16xf32> -> vector<64x16xf32>
    %12 = arith.addf %6, %11 : vector<64x16xf32>
    %c0_12 = arith.constant 0 : index
    %c2 = arith.constant 2 : index
    %c0_13 = arith.constant 0 : index
    %13 = vector.load %arg1[%c0_12, %c2, %c0_13] : memref<1x68x8xf32, #tpu.memory_space<vmem>>, vector<1x64x8xf32>
    %14 = vector.shape_cast %13 : vector<1x64x8xf32> to vector<64x8xf32>
    %c2_14 = arith.constant 2 : index
    %c0_15 = arith.constant 0 : index
    %c0_16 = arith.constant 0 : index
    %15 = vector.load %arg2[%c2_14, %c0_15, %c0_16] : memref<5x8x16xf32, #tpu.memory_space<vmem>>, vector<1x8x16xf32>
    %16 = vector.shape_cast %15 : vector<1x8x16xf32> to vector<8x16xf32>
    %cst_17 = arith.constant dense<0.000000e+00> : vector<64x16xf32>
    %17 = tpu.matmul %14, %16, %cst_17 {dimension_numbers = #tpu.dot_dimension_numbers<[1], [0], [0], [1], [0, 0, 1, 1], [], []>} : vector<64x8xf32>, vector<8x16xf32>, vector<64x16xf32> -> vector<64x16xf32>
    %18 = arith.addf %12, %17 : vector<64x16xf32>
    %c0_18 = arith.constant 0 : index
    %c3 = arith.constant 3 : index
    %c0_19 = arith.constant 0 : index
    %19 = vector.load %arg1[%c0_18, %c3, %c0_19] : memref<1x68x8xf32, #tpu.memory_space<vmem>>, vector<1x64x8xf32>
    %20 = vector.shape_cast %19 : vector<1x64x8xf32> to vector<64x8xf32>
    %c3_20 = arith.constant 3 : index
    %c0_21 = arith.constant 0 : index
    %c0_22 = arith.constant 0 : index
    %21 = vector.load %arg2[%c3_20, %c0_21, %c0_22] : memref<5x8x16xf32, #tpu.memory_space<vmem>>, vector<1x8x16xf32>
    %22 = vector.shape_cast %21 : vector<1x8x16xf32> to vector<8x16xf32>
    %cst_23 = arith.constant dense<0.000000e+00> : vector<64x16xf32>
    %23 = tpu.matmul %20, %22, %cst_23 {dimension_numbers = #tpu.dot_dimension_numbers<[1], [0], [0], [1], [0, 0, 1, 1], [], []>} : vector<64x8xf32>, vector<8x16xf32>, vector<64x16xf32> -> vector<64x16xf32>
    %24 = arith.addf %18, %23 : vector<64x16xf32>
    %c0_24 = arith.constant 0 : index
    %c4 = arith.constant 4 : index
    %c0_25 = arith.constant 0 : index
    %25 = vector.load %arg1[%c0_24, %c4, %c0_25] : memref<1x68x8xf32, #tpu.memory_space<vmem>>, vector<1x64x8xf32>
    %26 = vector.shape_cast %25 : vector<1x64x8xf32> to vector<64x8xf32>
    %c4_26 = arith.constant 4 : index
    %c0_27 = arith.constant 0 : index
    %c0_28 = arith.constant 0 : index
    %27 = vector.load %arg2[%c4_26, %c0_27, %c0_28] : memref<5x8x16xf32, #tpu.memory_space<vmem>>, vector<1x8x16xf32>
    %28 = vector.shape_cast %27 : vector<1x8x16xf32> to vector<8x16xf32>
    %cst_29 = arith.constant dense<0.000000e+00> : vector<64x16xf32>
    %29 = tpu.matmul %26, %28, %cst_29 {dimension_numbers = #tpu.dot_dimension_numbers<[1], [0], [0], [1], [0, 0, 1, 1], [], []>} : vector<64x8xf32>, vector<8x16xf32>, vector<64x16xf32> -> vector<64x16xf32>
    %30 = arith.addf %24, %29 : vector<64x16xf32>
    %c0_30 = arith.constant 0 : index
    %c0_31 = arith.constant 0 : index
    %31 = vector.load %arg3[%c0_30, %c0_31] : memref<1x16xf32, #tpu.memory_space<vmem>>, vector<1x16xf32>
    %32 = vector.broadcast %31 : vector<1x16xf32> to vector<64x16xf32>
    %33 = arith.mulf %30, %32 : vector<64x16xf32>
    %c0_32 = arith.constant 0 : index
    %c0_33 = arith.constant 0 : index
    %34 = vector.load %arg4[%c0_32, %c0_33] : memref<1x16xf32, #tpu.memory_space<vmem>>, vector<1x16xf32>
    %35 = vector.broadcast %34 : vector<1x16xf32> to vector<64x16xf32>
    %36 = arith.addf %33, %35 : vector<64x16xf32>
    %cst_34 = arith.constant 0.000000e+00 : f32
    %37 = vector.broadcast %cst_34 : f32 to vector<64x16xf32>
    %38 = arith.maximumf %36, %37 : vector<64x16xf32>
    %c0_35 = arith.constant 0 : index
    %c0_36 = arith.constant 0 : index
    %c0_37 = arith.constant 0 : index
    %39 = vector.load %arg5[%c0_35, %c0_36, %c0_37] : memref<1x64x16xf32, #tpu.memory_space<vmem>>, vector<1x64x16xf32>
    %40 = vector.shape_cast %39 : vector<1x64x16xf32> to vector<64x16xf32>
    %41 = vector.shape_cast %38 : vector<64x16xf32> to vector<1x64x16xf32>
    tpu.vector_store %arg5[%c0_35, %c0_36, %c0_37], %41 {strides = array<i32>} : memref<1x64x16xf32, #tpu.memory_space<vmem>>, vector<1x64x16xf32>,
    return
  }
  func.func @transform_0(%arg0: i32) -> (i32, i32, i32) {
    %c0_i32 = arith.constant 0 : i32
    %c0_i32_0 = arith.constant 0 : i32
    %c0_i32_1 = arith.constant 0 : i32
    return %arg0, %c0_i32, %c0_i32_0 : i32, i32, i32
  }
  func.func @transform_1(%arg0: i32) -> (i32, i32, i32) {
    %c0_i32 = arith.constant 0 : i32
    %c0_i32_0 = arith.constant 0 : i32
    %c0_i32_1 = arith.constant 0 : i32
    %c0_i32_2 = arith.constant 0 : i32
    return %c0_i32, %c0_i32_0, %c0_i32_1 : i32, i32, i32
  }
  func.func @transform_2(%arg0: i32) -> (i32, i32) {
    %c0_i32 = arith.constant 0 : i32
    %c0_i32_0 = arith.constant 0 : i32
    %c0_i32_1 = arith.constant 0 : i32
    return %c0_i32, %c0_i32_0 : i32, i32
  }
  func.func @transform_3(%arg0: i32) -> (i32, i32) {
    %c0_i32 = arith.constant 0 : i32
    %c0_i32_0 = arith.constant 0 : i32
    %c0_i32_1 = arith.constant 0 : i32
    return %c0_i32, %c0_i32_0 : i32, i32
  }
  func.func @transform_4(%arg0: i32) -> (i32, i32, i32) {
    %c0_i32 = arith.constant 0 : i32
    %c0_i32_0 = arith.constant 0 : i32
    %c0_i32_1 = arith.constant 0 : i32
    return %arg0, %c0_i32, %c0_i32_0 : i32, i32, i32
  }
}

module attributes {stable_mosaic.version = 11 : i64} {
  func.func @_conv1d_s1_kernel(%arg0: i32, %arg1: memref<1x68x16xf32, #tpu.memory_space<vmem>>, %arg2: memref<5x16x32xf32, #tpu.memory_space<vmem>>, %arg3: memref<1x32xf32, #tpu.memory_space<vmem>>, %arg4: memref<1x32xf32, #tpu.memory_space<vmem>>, %arg5: memref<1x64x32xf32, #tpu.memory_space<vmem>>) attributes {dimension_semantics = [#tpu.dimension_semantics<parallel>], iteration_bounds = array<i64: 2>, scalar_prefetch = 0 : i64, scratch_operands = 0 : i64, tpu.core_type = #tpu.core_type<tc>, window_params = [{transform_indices = @transform_0, window_bounds = array<i64: 1, 68, 16>}, {pipeline_mode = #tpu.pipeline_mode<synchronous>, transform_indices = @transform_1, window_bounds = array<i64: 5, 16, 32>}, {pipeline_mode = #tpu.pipeline_mode<synchronous>, transform_indices = @transform_2, window_bounds = array<i64: 1, 32>}, {pipeline_mode = #tpu.pipeline_mode<synchronous>, transform_indices = @transform_3, window_bounds = array<i64: 1, 32>}, {transform_indices = @transform_4, window_bounds = array<i64: 1, 64, 32>}]} {
    %cst = arith.constant 0.000000e+00 : f32
    %0 = vector.broadcast %cst : f32 to vector<64x32xf32>
    %c0 = arith.constant 0 : index
    %c0_0 = arith.constant 0 : index
    %c0_1 = arith.constant 0 : index
    %1 = vector.load %arg1[%c0, %c0_0, %c0_1] : memref<1x68x16xf32, #tpu.memory_space<vmem>>, vector<1x64x16xf32>
    %2 = vector.shape_cast %1 : vector<1x64x16xf32> to vector<64x16xf32>
    %c0_2 = arith.constant 0 : index
    %c0_3 = arith.constant 0 : index
    %c0_4 = arith.constant 0 : index
    %3 = vector.load %arg2[%c0_2, %c0_3, %c0_4] : memref<5x16x32xf32, #tpu.memory_space<vmem>>, vector<1x16x32xf32>
    %4 = vector.shape_cast %3 : vector<1x16x32xf32> to vector<16x32xf32>
    %cst_5 = arith.constant dense<0.000000e+00> : vector<64x32xf32>
    %5 = tpu.matmul %2, %4, %cst_5 {dimension_numbers = #tpu.dot_dimension_numbers<[1], [0], [0], [1], [0, 0, 1, 1], [], []>} : vector<64x16xf32>, vector<16x32xf32>, vector<64x32xf32> -> vector<64x32xf32>
    %6 = arith.addf %0, %5 : vector<64x32xf32>
    %c0_6 = arith.constant 0 : index
    %c1 = arith.constant 1 : index
    %c0_7 = arith.constant 0 : index
    %7 = vector.load %arg1[%c0_6, %c1, %c0_7] : memref<1x68x16xf32, #tpu.memory_space<vmem>>, vector<1x64x16xf32>
    %8 = vector.shape_cast %7 : vector<1x64x16xf32> to vector<64x16xf32>
    %c1_8 = arith.constant 1 : index
    %c0_9 = arith.constant 0 : index
    %c0_10 = arith.constant 0 : index
    %9 = vector.load %arg2[%c1_8, %c0_9, %c0_10] : memref<5x16x32xf32, #tpu.memory_space<vmem>>, vector<1x16x32xf32>
    %10 = vector.shape_cast %9 : vector<1x16x32xf32> to vector<16x32xf32>
    %cst_11 = arith.constant dense<0.000000e+00> : vector<64x32xf32>
    %11 = tpu.matmul %8, %10, %cst_11 {dimension_numbers = #tpu.dot_dimension_numbers<[1], [0], [0], [1], [0, 0, 1, 1], [], []>} : vector<64x16xf32>, vector<16x32xf32>, vector<64x32xf32> -> vector<64x32xf32>
    %12 = arith.addf %6, %11 : vector<64x32xf32>
    %c0_12 = arith.constant 0 : index
    %c2 = arith.constant 2 : index
    %c0_13 = arith.constant 0 : index
    %13 = vector.load %arg1[%c0_12, %c2, %c0_13] : memref<1x68x16xf32, #tpu.memory_space<vmem>>, vector<1x64x16xf32>
    %14 = vector.shape_cast %13 : vector<1x64x16xf32> to vector<64x16xf32>
    %c2_14 = arith.constant 2 : index
    %c0_15 = arith.constant 0 : index
    %c0_16 = arith.constant 0 : index
    %15 = vector.load %arg2[%c2_14, %c0_15, %c0_16] : memref<5x16x32xf32, #tpu.memory_space<vmem>>, vector<1x16x32xf32>
    %16 = vector.shape_cast %15 : vector<1x16x32xf32> to vector<16x32xf32>
    %cst_17 = arith.constant dense<0.000000e+00> : vector<64x32xf32>
    %17 = tpu.matmul %14, %16, %cst_17 {dimension_numbers = #tpu.dot_dimension_numbers<[1], [0], [0], [1], [0, 0, 1, 1], [], []>} : vector<64x16xf32>, vector<16x32xf32>, vector<64x32xf32> -> vector<64x32xf32>
    %18 = arith.addf %12, %17 : vector<64x32xf32>
    %c0_18 = arith.constant 0 : index
    %c3 = arith.constant 3 : index
    %c0_19 = arith.constant 0 : index
    %19 = vector.load %arg1[%c0_18, %c3, %c0_19] : memref<1x68x16xf32, #tpu.memory_space<vmem>>, vector<1x64x16xf32>
    %20 = vector.shape_cast %19 : vector<1x64x16xf32> to vector<64x16xf32>
    %c3_20 = arith.constant 3 : index
    %c0_21 = arith.constant 0 : index
    %c0_22 = arith.constant 0 : index
    %21 = vector.load %arg2[%c3_20, %c0_21, %c0_22] : memref<5x16x32xf32, #tpu.memory_space<vmem>>, vector<1x16x32xf32>
    %22 = vector.shape_cast %21 : vector<1x16x32xf32> to vector<16x32xf32>
    %cst_23 = arith.constant dense<0.000000e+00> : vector<64x32xf32>
    %23 = tpu.matmul %20, %22, %cst_23 {dimension_numbers = #tpu.dot_dimension_numbers<[1], [0], [0], [1], [0, 0, 1, 1], [], []>} : vector<64x16xf32>, vector<16x32xf32>, vector<64x32xf32> -> vector<64x32xf32>
    %24 = arith.addf %18, %23 : vector<64x32xf32>
    %c0_24 = arith.constant 0 : index
    %c4 = arith.constant 4 : index
    %c0_25 = arith.constant 0 : index
    %25 = vector.load %arg1[%c0_24, %c4, %c0_25] : memref<1x68x16xf32, #tpu.memory_space<vmem>>, vector<1x64x16xf32>
    %26 = vector.shape_cast %25 : vector<1x64x16xf32> to vector<64x16xf32>
    %c4_26 = arith.constant 4 : index
    %c0_27 = arith.constant 0 : index
    %c0_28 = arith.constant 0 : index
    %27 = vector.load %arg2[%c4_26, %c0_27, %c0_28] : memref<5x16x32xf32, #tpu.memory_space<vmem>>, vector<1x16x32xf32>
    %28 = vector.shape_cast %27 : vector<1x16x32xf32> to vector<16x32xf32>
    %cst_29 = arith.constant dense<0.000000e+00> : vector<64x32xf32>
    %29 = tpu.matmul %26, %28, %cst_29 {dimension_numbers = #tpu.dot_dimension_numbers<[1], [0], [0], [1], [0, 0, 1, 1], [], []>} : vector<64x16xf32>, vector<16x32xf32>, vector<64x32xf32> -> vector<64x32xf32>
    %30 = arith.addf %24, %29 : vector<64x32xf32>
    %c0_30 = arith.constant 0 : index
    %c0_31 = arith.constant 0 : index
    %31 = vector.load %arg3[%c0_30, %c0_31] : memref<1x32xf32, #tpu.memory_space<vmem>>, vector<1x32xf32>
    %32 = vector.broadcast %31 : vector<1x32xf32> to vector<64x32xf32>
    %33 = arith.mulf %30, %32 : vector<64x32xf32>
    %c0_32 = arith.constant 0 : index
    %c0_33 = arith.constant 0 : index
    %34 = vector.load %arg4[%c0_32, %c0_33] : memref<1x32xf32, #tpu.memory_space<vmem>>, vector<1x32xf32>
    %35 = vector.broadcast %34 : vector<1x32xf32> to vector<64x32xf32>
    %36 = arith.addf %33, %35 : vector<64x32xf32>
    %cst_34 = arith.constant 0.000000e+00 : f32
    %37 = vector.broadcast %cst_34 : f32 to vector<64x32xf32>
    %38 = arith.maximumf %36, %37 : vector<64x32xf32>
    %c0_35 = arith.constant 0 : index
    %c0_36 = arith.constant 0 : index
    %c0_37 = arith.constant 0 : index
    %39 = vector.load %arg5[%c0_35, %c0_36, %c0_37] : memref<1x64x32xf32, #tpu.memory_space<vmem>>, vector<1x64x32xf32>
    %40 = vector.shape_cast %39 : vector<1x64x32xf32> to vector<64x32xf32>
    %41 = vector.shape_cast %38 : vector<64x32xf32> to vector<1x64x32xf32>
    tpu.vector_store %arg5[%c0_35, %c0_36, %c0_37], %41 {strides = array<i32>} : memref<1x64x32xf32, #tpu.memory_space<vmem>>, vector<1x64x32xf32>,
    return
  }
  func.func @transform_0(%arg0: i32) -> (i32, i32, i32) {
    %c0_i32 = arith.constant 0 : i32
    %c0_i32_0 = arith.constant 0 : i32
    %c0_i32_1 = arith.constant 0 : i32
    return %arg0, %c0_i32, %c0_i32_0 : i32, i32, i32
  }
  func.func @transform_1(%arg0: i32) -> (i32, i32, i32) {
    %c0_i32 = arith.constant 0 : i32
    %c0_i32_0 = arith.constant 0 : i32
    %c0_i32_1 = arith.constant 0 : i32
    %c0_i32_2 = arith.constant 0 : i32
    return %c0_i32, %c0_i32_0, %c0_i32_1 : i32, i32, i32
  }
  func.func @transform_2(%arg0: i32) -> (i32, i32) {
    %c0_i32 = arith.constant 0 : i32
    %c0_i32_0 = arith.constant 0 : i32
    %c0_i32_1 = arith.constant 0 : i32
    return %c0_i32, %c0_i32_0 : i32, i32
  }
  func.func @transform_3(%arg0: i32) -> (i32, i32) {
    %c0_i32 = arith.constant 0 : i32
    %c0_i32_0 = arith.constant 0 : i32
    %c0_i32_1 = arith.constant 0 : i32
    return %c0_i32, %c0_i32_0 : i32, i32
  }
  func.func @transform_4(%arg0: i32) -> (i32, i32, i32) {
    %c0_i32 = arith.constant 0 : i32
    %c0_i32_0 = arith.constant 0 : i32
    %c0_i32_1 = arith.constant 0 : i32
    return %arg0, %c0_i32, %c0_i32_0 : i32, i32, i32
  }
}

module attributes {stable_mosaic.version = 11 : i64} {
  func.func @_res_block_tail_kernel(%arg0: i32, %arg1: memref<1x5x32x32xf32, #tpu.memory_space<vmem>>, %arg2: memref<5x32x32xf32, #tpu.memory_space<vmem>>, %arg3: memref<1x32xf32, #tpu.memory_space<vmem>>, %arg4: memref<32x2xf32, #tpu.memory_space<vmem>>, %arg5: memref<2x32xf32, #tpu.memory_space<vmem>>, %arg6: memref<1x32x16xf32, #tpu.memory_space<vmem>>, %arg7: memref<16x32xf32, #tpu.memory_space<vmem>>, %arg8: memref<1x32xf32, #tpu.memory_space<vmem>>, %arg9: memref<1x32xf32, #tpu.memory_space<vmem>>, %arg10: memref<1x32xf32, #tpu.memory_space<vmem>>, %arg11: memref<1x32x32xf32, #tpu.memory_space<vmem>>) attributes {dimension_semantics = [#tpu.dimension_semantics<parallel>], iteration_bounds = array<i64: 2>, scalar_prefetch = 0 : i64, scratch_operands = 0 : i64, tpu.core_type = #tpu.core_type<tc>, window_params = [{transform_indices = @transform_0, window_bounds = array<i64: 1, 5, 32, 32>}, {pipeline_mode = #tpu.pipeline_mode<synchronous>, transform_indices = @transform_1, window_bounds = array<i64: 5, 32, 32>}, {pipeline_mode = #tpu.pipeline_mode<synchronous>, transform_indices = @transform_2, window_bounds = array<i64: 1, 32>}, {pipeline_mode = #tpu.pipeline_mode<synchronous>, transform_indices = @transform_3, window_bounds = array<i64: 32, 2>}, {pipeline_mode = #tpu.pipeline_mode<synchronous>, transform_indices = @transform_4, window_bounds = array<i64: 2, 32>}, {transform_indices = @transform_5, window_bounds = array<i64: 1, 32, 16>}, {pipeline_mode = #tpu.pipeline_mode<synchronous>, transform_indices = @transform_6, window_bounds = array<i64: 16, 32>}, {pipeline_mode = #tpu.pipeline_mode<synchronous>, transform_indices = @transform_7, window_bounds = array<i64: 1, 32>}, {pipeline_mode = #tpu.pipeline_mode<synchronous>, transform_indices = @transform_8, window_bounds = array<i64: 1, 32>}, {pipeline_mode = #tpu.pipeline_mode<synchronous>, transform_indices = @transform_9, window_bounds = array<i64: 1, 32>}, {transform_indices = @transform_10, window_bounds = array<i64: 1, 32, 32>}]} {
    %cst = arith.constant 0.000000e+00 : f32
    %0 = vector.broadcast %cst : f32 to vector<32x32xf32>
    %c0 = arith.constant 0 : index
    %c0_0 = arith.constant 0 : index
    %c0_1 = arith.constant 0 : index
    %c0_2 = arith.constant 0 : index
    %1 = vector.load %arg1[%c0, %c0_0, %c0_1, %c0_2] : memref<1x5x32x32xf32, #tpu.memory_space<vmem>>, vector<1x1x32x32xf32>
    %2 = vector.shape_cast %1 : vector<1x1x32x32xf32> to vector<32x32xf32>
    %c0_3 = arith.constant 0 : index
    %c0_4 = arith.constant 0 : index
    %c0_5 = arith.constant 0 : index
    %3 = vector.load %arg2[%c0_3, %c0_4, %c0_5] : memref<5x32x32xf32, #tpu.memory_space<vmem>>, vector<1x32x32xf32>
    %4 = vector.shape_cast %3 : vector<1x32x32xf32> to vector<32x32xf32>
    %cst_6 = arith.constant dense<0.000000e+00> : vector<32x32xf32>
    %5 = tpu.matmul %2, %4, %cst_6 {dimension_numbers = #tpu.dot_dimension_numbers<[1], [0], [0], [1], [0, 0, 1, 1], [], []>} : vector<32x32xf32>, vector<32x32xf32>, vector<32x32xf32> -> vector<32x32xf32>
    %6 = arith.addf %0, %5 : vector<32x32xf32>
    %c0_7 = arith.constant 0 : index
    %c1 = arith.constant 1 : index
    %c0_8 = arith.constant 0 : index
    %c0_9 = arith.constant 0 : index
    %7 = vector.load %arg1[%c0_7, %c1, %c0_8, %c0_9] : memref<1x5x32x32xf32, #tpu.memory_space<vmem>>, vector<1x1x32x32xf32>
    %8 = vector.shape_cast %7 : vector<1x1x32x32xf32> to vector<32x32xf32>
    %c1_10 = arith.constant 1 : index
    %c0_11 = arith.constant 0 : index
    %c0_12 = arith.constant 0 : index
    %9 = vector.load %arg2[%c1_10, %c0_11, %c0_12] : memref<5x32x32xf32, #tpu.memory_space<vmem>>, vector<1x32x32xf32>
    %10 = vector.shape_cast %9 : vector<1x32x32xf32> to vector<32x32xf32>
    %cst_13 = arith.constant dense<0.000000e+00> : vector<32x32xf32>
    %11 = tpu.matmul %8, %10, %cst_13 {dimension_numbers = #tpu.dot_dimension_numbers<[1], [0], [0], [1], [0, 0, 1, 1], [], []>} : vector<32x32xf32>, vector<32x32xf32>, vector<32x32xf32> -> vector<32x32xf32>
    %12 = arith.addf %6, %11 : vector<32x32xf32>
    %c0_14 = arith.constant 0 : index
    %c2 = arith.constant 2 : index
    %c0_15 = arith.constant 0 : index
    %c0_16 = arith.constant 0 : index
    %13 = vector.load %arg1[%c0_14, %c2, %c0_15, %c0_16] : memref<1x5x32x32xf32, #tpu.memory_space<vmem>>, vector<1x1x32x32xf32>
    %14 = vector.shape_cast %13 : vector<1x1x32x32xf32> to vector<32x32xf32>
    %c2_17 = arith.constant 2 : index
    %c0_18 = arith.constant 0 : index
    %c0_19 = arith.constant 0 : index
    %15 = vector.load %arg2[%c2_17, %c0_18, %c0_19] : memref<5x32x32xf32, #tpu.memory_space<vmem>>, vector<1x32x32xf32>
    %16 = vector.shape_cast %15 : vector<1x32x32xf32> to vector<32x32xf32>
    %cst_20 = arith.constant dense<0.000000e+00> : vector<32x32xf32>
    %17 = tpu.matmul %14, %16, %cst_20 {dimension_numbers = #tpu.dot_dimension_numbers<[1], [0], [0], [1], [0, 0, 1, 1], [], []>} : vector<32x32xf32>, vector<32x32xf32>, vector<32x32xf32> -> vector<32x32xf32>
    %18 = arith.addf %12, %17 : vector<32x32xf32>
    %c0_21 = arith.constant 0 : index
    %c3 = arith.constant 3 : index
    %c0_22 = arith.constant 0 : index
    %c0_23 = arith.constant 0 : index
    %19 = vector.load %arg1[%c0_21, %c3, %c0_22, %c0_23] : memref<1x5x32x32xf32, #tpu.memory_space<vmem>>, vector<1x1x32x32xf32>
    %20 = vector.shape_cast %19 : vector<1x1x32x32xf32> to vector<32x32xf32>
    %c3_24 = arith.constant 3 : index
    %c0_25 = arith.constant 0 : index
    %c0_26 = arith.constant 0 : index
    %21 = vector.load %arg2[%c3_24, %c0_25, %c0_26] : memref<5x32x32xf32, #tpu.memory_space<vmem>>, vector<1x32x32xf32>
    %22 = vector.shape_cast %21 : vector<1x32x32xf32> to vector<32x32xf32>
    %cst_27 = arith.constant dense<0.000000e+00> : vector<32x32xf32>
    %23 = tpu.matmul %20, %22, %cst_27 {dimension_numbers = #tpu.dot_dimension_numbers<[1], [0], [0], [1], [0, 0, 1, 1], [], []>} : vector<32x32xf32>, vector<32x32xf32>, vector<32x32xf32> -> vector<32x32xf32>
    %24 = arith.addf %18, %23 : vector<32x32xf32>
    %c0_28 = arith.constant 0 : index
    %c4 = arith.constant 4 : index
    %c0_29 = arith.constant 0 : index
    %c0_30 = arith.constant 0 : index
    %25 = vector.load %arg1[%c0_28, %c4, %c0_29, %c0_30] : memref<1x5x32x32xf32, #tpu.memory_space<vmem>>, vector<1x1x32x32xf32>
    %26 = vector.shape_cast %25 : vector<1x1x32x32xf32> to vector<32x32xf32>
    %c4_31 = arith.constant 4 : index
    %c0_32 = arith.constant 0 : index
    %c0_33 = arith.constant 0 : index
    %27 = vector.load %arg2[%c4_31, %c0_32, %c0_33] : memref<5x32x32xf32, #tpu.memory_space<vmem>>, vector<1x32x32xf32>
    %28 = vector.shape_cast %27 : vector<1x32x32xf32> to vector<32x32xf32>
    %cst_34 = arith.constant dense<0.000000e+00> : vector<32x32xf32>
    %29 = tpu.matmul %26, %28, %cst_34 {dimension_numbers = #tpu.dot_dimension_numbers<[1], [0], [0], [1], [0, 0, 1, 1], [], []>} : vector<32x32xf32>, vector<32x32xf32>, vector<32x32xf32> -> vector<32x32xf32>
    %30 = arith.addf %24, %29 : vector<32x32xf32>
    %c0_35 = arith.constant 0 : index
    %c0_36 = arith.constant 0 : index
    %31 = vector.load %arg3[%c0_35, %c0_36] : memref<1x32xf32, #tpu.memory_space<vmem>>, vector<1x32xf32>
    %32 = vector.broadcast %31 : vector<1x32xf32> to vector<32x32xf32>
    %33 = arith.addf %30, %32 : vector<32x32xf32>
    %cst_37 = arith.constant dense<0.000000e+00> : vector<32xf32>
    %34 = vector.multi_reduction <add>, %33, %cst_37 [0] : vector<32x32xf32> to vector<32xf32>
    %35 = vector.shape_cast %34 : vector<32xf32> to vector<1x32xf32>
    %cst_38 = arith.constant 3.200000e+01 : f32
    %36 = vector.broadcast %cst_38 : f32 to vector<1x32xf32>
    %37 = arith.divf %35, %36 : vector<1x32xf32>
    %c0_39 = arith.constant 0 : index
    %c0_40 = arith.constant 0 : index
    %38 = vector.load %arg4[%c0_39, %c0_40] : memref<32x2xf32, #tpu.memory_space<vmem>>, vector<32x2xf32>
    %cst_41 = arith.constant dense<0.000000e+00> : vector<1x2xf32>
    %39 = tpu.matmul %37, %38, %cst_41 {dimension_numbers = #tpu.dot_dimension_numbers<[1], [0], [0], [1], [0, 0, 1, 1], [], []>} : vector<1x32xf32>, vector<32x2xf32>, vector<1x2xf32> -> vector<1x2xf32>
    %cst_42 = arith.constant 0.000000e+00 : f32
    %40 = vector.broadcast %cst_42 : f32 to vector<1x2xf32>
    %41 = arith.maximumf %39, %40 : vector<1x2xf32>
    %cst_43 = arith.constant 0.000000e+00 : f32
    %42 = vector.broadcast %cst_43 : f32 to vector<1x32xf32>
    %43 = vector.extract_strided_slice %41 {offsets = [0, 0], sizes = [1, 1], strides = [1, 1]} : vector<1x2xf32> to vector<1x1xf32>
    %c0_44 = arith.constant 0 : index
    %c0_45 = arith.constant 0 : index
    %44 = vector.load %arg5[%c0_44, %c0_45] : memref<2x32xf32, #tpu.memory_space<vmem>>, vector<1x32xf32>
    %45 = vector.broadcast %43 : vector<1x1xf32> to vector<1x32xf32>
    %46 = arith.mulf %45, %44 : vector<1x32xf32>
    %47 = arith.addf %42, %46 : vector<1x32xf32>
    %48 = vector.extract_strided_slice %41 {offsets = [0, 1], sizes = [1, 1], strides = [1, 1]} : vector<1x2xf32> to vector<1x1xf32>
    %c1_46 = arith.constant 1 : index
    %c0_47 = arith.constant 0 : index
    %49 = vector.load %arg5[%c1_46, %c0_47] : memref<2x32xf32, #tpu.memory_space<vmem>>, vector<1x32xf32>
    %50 = vector.broadcast %48 : vector<1x1xf32> to vector<1x32xf32>
    %51 = arith.mulf %50, %49 : vector<1x32xf32>
    %52 = arith.addf %47, %51 : vector<1x32xf32>
    %cst_48 = arith.constant 0.000000e+00 : f32
    %53 = vector.broadcast %cst_48 : f32 to vector<1x32xf32>
    %54 = arith.subf %53, %52 : vector<1x32xf32>
    %55 = math.exp %54 : vector<1x32xf32>
    %cst_49 = arith.constant 1.000000e+00 : f32
    %56 = vector.broadcast %cst_49 : f32 to vector<1x32xf32>
    %57 = arith.addf %56, %55 : vector<1x32xf32>
    %cst_50 = arith.constant 1.000000e+00 : f32
    %58 = vector.broadcast %cst_50 : f32 to vector<1x32xf32>
    %59 = arith.divf %58, %57 : vector<1x32xf32>
    %60 = vector.broadcast %59 : vector<1x32xf32> to vector<32x32xf32>
    %61 = arith.mulf %33, %60 : vector<32x32xf32>
    %c0_51 = arith.constant 0 : index
    %c0_52 = arith.constant 0 : index
    %c0_53 = arith.constant 0 : index
    %62 = vector.load %arg6[%c0_51, %c0_52, %c0_53] : memref<1x32x16xf32, #tpu.memory_space<vmem>>, vector<1x32x16xf32>
    %63 = vector.shape_cast %62 : vector<1x32x16xf32> to vector<32x16xf32>
    %c0_54 = arith.constant 0 : index
    %c0_55 = arith.constant 0 : index
    %64 = vector.load %arg7[%c0_54, %c0_55] : memref<16x32xf32, #tpu.memory_space<vmem>>, vector<16x32xf32>
    %cst_56 = arith.constant dense<0.000000e+00> : vector<32x32xf32>
    %65 = tpu.matmul %63, %64, %cst_56 {dimension_numbers = #tpu.dot_dimension_numbers<[1], [0], [0], [1], [0, 0, 1, 1], [], []>} : vector<32x16xf32>, vector<16x32xf32>, vector<32x32xf32> -> vector<32x32xf32>
    %66 = arith.addf %61, %65 : vector<32x32xf32>
    %c0_57 = arith.constant 0 : index
    %c0_58 = arith.constant 0 : index
    %67 = vector.load %arg8[%c0_57, %c0_58] : memref<1x32xf32, #tpu.memory_space<vmem>>, vector<1x32xf32>
    %68 = vector.broadcast %67 : vector<1x32xf32> to vector<32x32xf32>
    %69 = arith.addf %66, %68 : vector<32x32xf32>
    %c0_59 = arith.constant 0 : index
    %c0_60 = arith.constant 0 : index
    %70 = vector.load %arg9[%c0_59, %c0_60] : memref<1x32xf32, #tpu.memory_space<vmem>>, vector<1x32xf32>
    %71 = vector.broadcast %70 : vector<1x32xf32> to vector<32x32xf32>
    %72 = arith.mulf %69, %71 : vector<32x32xf32>
    %c0_61 = arith.constant 0 : index
    %c0_62 = arith.constant 0 : index
    %73 = vector.load %arg10[%c0_61, %c0_62] : memref<1x32xf32, #tpu.memory_space<vmem>>, vector<1x32xf32>
    %74 = vector.broadcast %73 : vector<1x32xf32> to vector<32x32xf32>
    %75 = arith.addf %72, %74 : vector<32x32xf32>
    %c0_63 = arith.constant 0 : index
    %c0_64 = arith.constant 0 : index
    %c0_65 = arith.constant 0 : index
    %76 = vector.load %arg11[%c0_63, %c0_64, %c0_65] : memref<1x32x32xf32, #tpu.memory_space<vmem>>, vector<1x32x32xf32>
    %77 = vector.shape_cast %76 : vector<1x32x32xf32> to vector<32x32xf32>
    %78 = vector.shape_cast %75 : vector<32x32xf32> to vector<1x32x32xf32>
    tpu.vector_store %arg11[%c0_63, %c0_64, %c0_65], %78 {strides = array<i32>} : memref<1x32x32xf32, #tpu.memory_space<vmem>>, vector<1x32x32xf32>,
    return
  }
  func.func @transform_0(%arg0: i32) -> (i32, i32, i32, i32) {
    %c0_i32 = arith.constant 0 : i32
    %c0_i32_0 = arith.constant 0 : i32
    %c0_i32_1 = arith.constant 0 : i32
    %c0_i32_2 = arith.constant 0 : i32
    return %arg0, %c0_i32, %c0_i32_0, %c0_i32_1 : i32, i32, i32, i32
  }
  func.func @transform_1(%arg0: i32) -> (i32, i32, i32) {
    %c0_i32 = arith.constant 0 : i32
    %c0_i32_0 = arith.constant 0 : i32
    %c0_i32_1 = arith.constant 0 : i32
    %c0_i32_2 = arith.constant 0 : i32
    return %c0_i32, %c0_i32_0, %c0_i32_1 : i32, i32, i32
  }
  func.func @transform_2(%arg0: i32) -> (i32, i32) {
    %c0_i32 = arith.constant 0 : i32
    %c0_i32_0 = arith.constant 0 : i32
    %c0_i32_1 = arith.constant 0 : i32
    return %c0_i32, %c0_i32_0 : i32, i32
  }
  func.func @transform_3(%arg0: i32) -> (i32, i32) {
    %c0_i32 = arith.constant 0 : i32
    %c0_i32_0 = arith.constant 0 : i32
    %c0_i32_1 = arith.constant 0 : i32
    return %c0_i32, %c0_i32_0 : i32, i32
  }
  func.func @transform_4(%arg0: i32) -> (i32, i32) {
    %c0_i32 = arith.constant 0 : i32
    %c0_i32_0 = arith.constant 0 : i32
    %c0_i32_1 = arith.constant 0 : i32
    return %c0_i32, %c0_i32_0 : i32, i32
  }
  func.func @transform_5(%arg0: i32) -> (i32, i32, i32) {
    %c0_i32 = arith.constant 0 : i32
    %c0_i32_0 = arith.constant 0 : i32
    %c0_i32_1 = arith.constant 0 : i32
    return %arg0, %c0_i32, %c0_i32_0 : i32, i32, i32
  }
  func.func @transform_6(%arg0: i32) -> (i32, i32) {
    %c0_i32 = arith.constant 0 : i32
    %c0_i32_0 = arith.constant 0 : i32
    %c0_i32_1 = arith.constant 0 : i32
    return %c0_i32, %c0_i32_0 : i32, i32
  }
  func.func @transform_7(%arg0: i32) -> (i32, i32) {
    %c0_i32 = arith.constant 0 : i32
    %c0_i32_0 = arith.constant 0 : i32
    %c0_i32_1 = arith.constant 0 : i32
    return %c0_i32, %c0_i32_0 : i32, i32
  }
  func.func @transform_8(%arg0: i32) -> (i32, i32) {
    %c0_i32 = arith.constant 0 : i32
    %c0_i32_0 = arith.constant 0 : i32
    %c0_i32_1 = arith.constant 0 : i32
    return %c0_i32, %c0_i32_0 : i32, i32
  }
  func.func @transform_9(%arg0: i32) -> (i32, i32) {
    %c0_i32 = arith.constant 0 : i32
    %c0_i32_0 = arith.constant 0 : i32
    %c0_i32_1 = arith.constant 0 : i32
    return %c0_i32, %c0_i32_0 : i32, i32
  }
  func.func @transform_10(%arg0: i32) -> (i32, i32, i32) {
    %c0_i32 = arith.constant 0 : i32
    %c0_i32_0 = arith.constant 0 : i32
    %c0_i32_1 = arith.constant 0 : i32
    return %arg0, %c0_i32, %c0_i32_0 : i32, i32, i32
  }
}

module attributes {stable_mosaic.version = 11 : i64} {
  func.func @_conv1d_s1_kernel(%arg0: i32, %arg1: memref<1x36x32xf32, #tpu.memory_space<vmem>>, %arg2: memref<5x32x32xf32, #tpu.memory_space<vmem>>, %arg3: memref<1x32xf32, #tpu.memory_space<vmem>>, %arg4: memref<1x32xf32, #tpu.memory_space<vmem>>, %arg5: memref<1x32x32xf32, #tpu.memory_space<vmem>>) attributes {dimension_semantics = [#tpu.dimension_semantics<parallel>], iteration_bounds = array<i64: 2>, scalar_prefetch = 0 : i64, scratch_operands = 0 : i64, tpu.core_type = #tpu.core_type<tc>, window_params = [{transform_indices = @transform_0, window_bounds = array<i64: 1, 36, 32>}, {pipeline_mode = #tpu.pipeline_mode<synchronous>, transform_indices = @transform_1, window_bounds = array<i64: 5, 32, 32>}, {pipeline_mode = #tpu.pipeline_mode<synchronous>, transform_indices = @transform_2, window_bounds = array<i64: 1, 32>}, {pipeline_mode = #tpu.pipeline_mode<synchronous>, transform_indices = @transform_3, window_bounds = array<i64: 1, 32>}, {transform_indices = @transform_4, window_bounds = array<i64: 1, 32, 32>}]} {
    %cst = arith.constant 0.000000e+00 : f32
    %0 = vector.broadcast %cst : f32 to vector<32x32xf32>
    %c0 = arith.constant 0 : index
    %c0_0 = arith.constant 0 : index
    %c0_1 = arith.constant 0 : index
    %1 = vector.load %arg1[%c0, %c0_0, %c0_1] : memref<1x36x32xf32, #tpu.memory_space<vmem>>, vector<1x32x32xf32>
    %2 = vector.shape_cast %1 : vector<1x32x32xf32> to vector<32x32xf32>
    %c0_2 = arith.constant 0 : index
    %c0_3 = arith.constant 0 : index
    %c0_4 = arith.constant 0 : index
    %3 = vector.load %arg2[%c0_2, %c0_3, %c0_4] : memref<5x32x32xf32, #tpu.memory_space<vmem>>, vector<1x32x32xf32>
    %4 = vector.shape_cast %3 : vector<1x32x32xf32> to vector<32x32xf32>
    %cst_5 = arith.constant dense<0.000000e+00> : vector<32x32xf32>
    %5 = tpu.matmul %2, %4, %cst_5 {dimension_numbers = #tpu.dot_dimension_numbers<[1], [0], [0], [1], [0, 0, 1, 1], [], []>} : vector<32x32xf32>, vector<32x32xf32>, vector<32x32xf32> -> vector<32x32xf32>
    %6 = arith.addf %0, %5 : vector<32x32xf32>
    %c0_6 = arith.constant 0 : index
    %c1 = arith.constant 1 : index
    %c0_7 = arith.constant 0 : index
    %7 = vector.load %arg1[%c0_6, %c1, %c0_7] : memref<1x36x32xf32, #tpu.memory_space<vmem>>, vector<1x32x32xf32>
    %8 = vector.shape_cast %7 : vector<1x32x32xf32> to vector<32x32xf32>
    %c1_8 = arith.constant 1 : index
    %c0_9 = arith.constant 0 : index
    %c0_10 = arith.constant 0 : index
    %9 = vector.load %arg2[%c1_8, %c0_9, %c0_10] : memref<5x32x32xf32, #tpu.memory_space<vmem>>, vector<1x32x32xf32>
    %10 = vector.shape_cast %9 : vector<1x32x32xf32> to vector<32x32xf32>
    %cst_11 = arith.constant dense<0.000000e+00> : vector<32x32xf32>
    %11 = tpu.matmul %8, %10, %cst_11 {dimension_numbers = #tpu.dot_dimension_numbers<[1], [0], [0], [1], [0, 0, 1, 1], [], []>} : vector<32x32xf32>, vector<32x32xf32>, vector<32x32xf32> -> vector<32x32xf32>
    %12 = arith.addf %6, %11 : vector<32x32xf32>
    %c0_12 = arith.constant 0 : index
    %c2 = arith.constant 2 : index
    %c0_13 = arith.constant 0 : index
    %13 = vector.load %arg1[%c0_12, %c2, %c0_13] : memref<1x36x32xf32, #tpu.memory_space<vmem>>, vector<1x32x32xf32>
    %14 = vector.shape_cast %13 : vector<1x32x32xf32> to vector<32x32xf32>
    %c2_14 = arith.constant 2 : index
    %c0_15 = arith.constant 0 : index
    %c0_16 = arith.constant 0 : index
    %15 = vector.load %arg2[%c2_14, %c0_15, %c0_16] : memref<5x32x32xf32, #tpu.memory_space<vmem>>, vector<1x32x32xf32>
    %16 = vector.shape_cast %15 : vector<1x32x32xf32> to vector<32x32xf32>
    %cst_17 = arith.constant dense<0.000000e+00> : vector<32x32xf32>
    %17 = tpu.matmul %14, %16, %cst_17 {dimension_numbers = #tpu.dot_dimension_numbers<[1], [0], [0], [1], [0, 0, 1, 1], [], []>} : vector<32x32xf32>, vector<32x32xf32>, vector<32x32xf32> -> vector<32x32xf32>
    %18 = arith.addf %12, %17 : vector<32x32xf32>
    %c0_18 = arith.constant 0 : index
    %c3 = arith.constant 3 : index
    %c0_19 = arith.constant 0 : index
    %19 = vector.load %arg1[%c0_18, %c3, %c0_19] : memref<1x36x32xf32, #tpu.memory_space<vmem>>, vector<1x32x32xf32>
    %20 = vector.shape_cast %19 : vector<1x32x32xf32> to vector<32x32xf32>
    %c3_20 = arith.constant 3 : index
    %c0_21 = arith.constant 0 : index
    %c0_22 = arith.constant 0 : index
    %21 = vector.load %arg2[%c3_20, %c0_21, %c0_22] : memref<5x32x32xf32, #tpu.memory_space<vmem>>, vector<1x32x32xf32>
    %22 = vector.shape_cast %21 : vector<1x32x32xf32> to vector<32x32xf32>
    %cst_23 = arith.constant dense<0.000000e+00> : vector<32x32xf32>
    %23 = tpu.matmul %20, %22, %cst_23 {dimension_numbers = #tpu.dot_dimension_numbers<[1], [0], [0], [1], [0, 0, 1, 1], [], []>} : vector<32x32xf32>, vector<32x32xf32>, vector<32x32xf32> -> vector<32x32xf32>
    %24 = arith.addf %18, %23 : vector<32x32xf32>
    %c0_24 = arith.constant 0 : index
    %c4 = arith.constant 4 : index
    %c0_25 = arith.constant 0 : index
    %25 = vector.load %arg1[%c0_24, %c4, %c0_25] : memref<1x36x32xf32, #tpu.memory_space<vmem>>, vector<1x32x32xf32>
    %26 = vector.shape_cast %25 : vector<1x32x32xf32> to vector<32x32xf32>
    %c4_26 = arith.constant 4 : index
    %c0_27 = arith.constant 0 : index
    %c0_28 = arith.constant 0 : index
    %27 = vector.load %arg2[%c4_26, %c0_27, %c0_28] : memref<5x32x32xf32, #tpu.memory_space<vmem>>, vector<1x32x32xf32>
    %28 = vector.shape_cast %27 : vector<1x32x32xf32> to vector<32x32xf32>
    %cst_29 = arith.constant dense<0.000000e+00> : vector<32x32xf32>
    %29 = tpu.matmul %26, %28, %cst_29 {dimension_numbers = #tpu.dot_dimension_numbers<[1], [0], [0], [1], [0, 0, 1, 1], [], []>} : vector<32x32xf32>, vector<32x32xf32>, vector<32x32xf32> -> vector<32x32xf32>
    %30 = arith.addf %24, %29 : vector<32x32xf32>
    %c0_30 = arith.constant 0 : index
    %c0_31 = arith.constant 0 : index
    %31 = vector.load %arg3[%c0_30, %c0_31] : memref<1x32xf32, #tpu.memory_space<vmem>>, vector<1x32xf32>
    %32 = vector.broadcast %31 : vector<1x32xf32> to vector<32x32xf32>
    %33 = arith.mulf %30, %32 : vector<32x32xf32>
    %c0_32 = arith.constant 0 : index
    %c0_33 = arith.constant 0 : index
    %34 = vector.load %arg4[%c0_32, %c0_33] : memref<1x32xf32, #tpu.memory_space<vmem>>, vector<1x32xf32>
    %35 = vector.broadcast %34 : vector<1x32xf32> to vector<32x32xf32>
    %36 = arith.addf %33, %35 : vector<32x32xf32>
    %cst_34 = arith.constant 0.000000e+00 : f32
    %37 = vector.broadcast %cst_34 : f32 to vector<32x32xf32>
    %38 = arith.maximumf %36, %37 : vector<32x32xf32>
    %c0_35 = arith.constant 0 : index
    %c0_36 = arith.constant 0 : index
    %c0_37 = arith.constant 0 : index
    %39 = vector.load %arg5[%c0_35, %c0_36, %c0_37] : memref<1x32x32xf32, #tpu.memory_space<vmem>>, vector<1x32x32xf32>
    %40 = vector.shape_cast %39 : vector<1x32x32xf32> to vector<32x32xf32>
    %41 = vector.shape_cast %38 : vector<32x32xf32> to vector<1x32x32xf32>
    tpu.vector_store %arg5[%c0_35, %c0_36, %c0_37], %41 {strides = array<i32>} : memref<1x32x32xf32, #tpu.memory_space<vmem>>, vector<1x32x32xf32>,
    return
  }
  func.func @transform_0(%arg0: i32) -> (i32, i32, i32) {
    %c0_i32 = arith.constant 0 : i32
    %c0_i32_0 = arith.constant 0 : i32
    %c0_i32_1 = arith.constant 0 : i32
    return %arg0, %c0_i32, %c0_i32_0 : i32, i32, i32
  }
  func.func @transform_1(%arg0: i32) -> (i32, i32, i32) {
    %c0_i32 = arith.constant 0 : i32
    %c0_i32_0 = arith.constant 0 : i32
    %c0_i32_1 = arith.constant 0 : i32
    %c0_i32_2 = arith.constant 0 : i32
    return %c0_i32, %c0_i32_0, %c0_i32_1 : i32, i32, i32
  }
  func.func @transform_2(%arg0: i32) -> (i32, i32) {
    %c0_i32 = arith.constant 0 : i32
    %c0_i32_0 = arith.constant 0 : i32
    %c0_i32_1 = arith.constant 0 : i32
    return %c0_i32, %c0_i32_0 : i32, i32
  }
  func.func @transform_3(%arg0: i32) -> (i32, i32) {
    %c0_i32 = arith.constant 0 : i32
    %c0_i32_0 = arith.constant 0 : i32
    %c0_i32_1 = arith.constant 0 : i32
    return %c0_i32, %c0_i32_0 : i32, i32
  }
  func.func @transform_4(%arg0: i32) -> (i32, i32, i32) {
    %c0_i32 = arith.constant 0 : i32
    %c0_i32_0 = arith.constant 0 : i32
    %c0_i32_1 = arith.constant 0 : i32
    return %arg0, %c0_i32, %c0_i32_0 : i32, i32, i32
  }
}

module attributes {stable_mosaic.version = 11 : i64} {
  func.func @_res_block_tail_kernel(%arg0: i32, %arg1: memref<1x5x32x32xf32, #tpu.memory_space<vmem>>, %arg2: memref<5x32x32xf32, #tpu.memory_space<vmem>>, %arg3: memref<1x32xf32, #tpu.memory_space<vmem>>, %arg4: memref<32x2xf32, #tpu.memory_space<vmem>>, %arg5: memref<2x32xf32, #tpu.memory_space<vmem>>, %arg6: memref<1x32x32xf32, #tpu.memory_space<vmem>>, %arg7: memref<32x32xf32, #tpu.memory_space<vmem>>, %arg8: memref<1x32xf32, #tpu.memory_space<vmem>>, %arg9: memref<1x32xf32, #tpu.memory_space<vmem>>, %arg10: memref<1x32xf32, #tpu.memory_space<vmem>>, %arg11: memref<1x32x32xf32, #tpu.memory_space<vmem>>) attributes {dimension_semantics = [#tpu.dimension_semantics<parallel>], iteration_bounds = array<i64: 2>, scalar_prefetch = 0 : i64, scratch_operands = 0 : i64, tpu.core_type = #tpu.core_type<tc>, window_params = [{transform_indices = @transform_0, window_bounds = array<i64: 1, 5, 32, 32>}, {pipeline_mode = #tpu.pipeline_mode<synchronous>, transform_indices = @transform_1, window_bounds = array<i64: 5, 32, 32>}, {pipeline_mode = #tpu.pipeline_mode<synchronous>, transform_indices = @transform_2, window_bounds = array<i64: 1, 32>}, {pipeline_mode = #tpu.pipeline_mode<synchronous>, transform_indices = @transform_3, window_bounds = array<i64: 32, 2>}, {pipeline_mode = #tpu.pipeline_mode<synchronous>, transform_indices = @transform_4, window_bounds = array<i64: 2, 32>}, {transform_indices = @transform_5, window_bounds = array<i64: 1, 32, 32>}, {pipeline_mode = #tpu.pipeline_mode<synchronous>, transform_indices = @transform_6, window_bounds = array<i64: 32, 32>}, {pipeline_mode = #tpu.pipeline_mode<synchronous>, transform_indices = @transform_7, window_bounds = array<i64: 1, 32>}, {pipeline_mode = #tpu.pipeline_mode<synchronous>, transform_indices = @transform_8, window_bounds = array<i64: 1, 32>}, {pipeline_mode = #tpu.pipeline_mode<synchronous>, transform_indices = @transform_9, window_bounds = array<i64: 1, 32>}, {transform_indices = @transform_10, window_bounds = array<i64: 1, 32, 32>}]} {
    %cst = arith.constant 0.000000e+00 : f32
    %0 = vector.broadcast %cst : f32 to vector<32x32xf32>
    %c0 = arith.constant 0 : index
    %c0_0 = arith.constant 0 : index
    %c0_1 = arith.constant 0 : index
    %c0_2 = arith.constant 0 : index
    %1 = vector.load %arg1[%c0, %c0_0, %c0_1, %c0_2] : memref<1x5x32x32xf32, #tpu.memory_space<vmem>>, vector<1x1x32x32xf32>
    %2 = vector.shape_cast %1 : vector<1x1x32x32xf32> to vector<32x32xf32>
    %c0_3 = arith.constant 0 : index
    %c0_4 = arith.constant 0 : index
    %c0_5 = arith.constant 0 : index
    %3 = vector.load %arg2[%c0_3, %c0_4, %c0_5] : memref<5x32x32xf32, #tpu.memory_space<vmem>>, vector<1x32x32xf32>
    %4 = vector.shape_cast %3 : vector<1x32x32xf32> to vector<32x32xf32>
    %cst_6 = arith.constant dense<0.000000e+00> : vector<32x32xf32>
    %5 = tpu.matmul %2, %4, %cst_6 {dimension_numbers = #tpu.dot_dimension_numbers<[1], [0], [0], [1], [0, 0, 1, 1], [], []>} : vector<32x32xf32>, vector<32x32xf32>, vector<32x32xf32> -> vector<32x32xf32>
    %6 = arith.addf %0, %5 : vector<32x32xf32>
    %c0_7 = arith.constant 0 : index
    %c1 = arith.constant 1 : index
    %c0_8 = arith.constant 0 : index
    %c0_9 = arith.constant 0 : index
    %7 = vector.load %arg1[%c0_7, %c1, %c0_8, %c0_9] : memref<1x5x32x32xf32, #tpu.memory_space<vmem>>, vector<1x1x32x32xf32>
    %8 = vector.shape_cast %7 : vector<1x1x32x32xf32> to vector<32x32xf32>
    %c1_10 = arith.constant 1 : index
    %c0_11 = arith.constant 0 : index
    %c0_12 = arith.constant 0 : index
    %9 = vector.load %arg2[%c1_10, %c0_11, %c0_12] : memref<5x32x32xf32, #tpu.memory_space<vmem>>, vector<1x32x32xf32>
    %10 = vector.shape_cast %9 : vector<1x32x32xf32> to vector<32x32xf32>
    %cst_13 = arith.constant dense<0.000000e+00> : vector<32x32xf32>
    %11 = tpu.matmul %8, %10, %cst_13 {dimension_numbers = #tpu.dot_dimension_numbers<[1], [0], [0], [1], [0, 0, 1, 1], [], []>} : vector<32x32xf32>, vector<32x32xf32>, vector<32x32xf32> -> vector<32x32xf32>
    %12 = arith.addf %6, %11 : vector<32x32xf32>
    %c0_14 = arith.constant 0 : index
    %c2 = arith.constant 2 : index
    %c0_15 = arith.constant 0 : index
    %c0_16 = arith.constant 0 : index
    %13 = vector.load %arg1[%c0_14, %c2, %c0_15, %c0_16] : memref<1x5x32x32xf32, #tpu.memory_space<vmem>>, vector<1x1x32x32xf32>
    %14 = vector.shape_cast %13 : vector<1x1x32x32xf32> to vector<32x32xf32>
    %c2_17 = arith.constant 2 : index
    %c0_18 = arith.constant 0 : index
    %c0_19 = arith.constant 0 : index
    %15 = vector.load %arg2[%c2_17, %c0_18, %c0_19] : memref<5x32x32xf32, #tpu.memory_space<vmem>>, vector<1x32x32xf32>
    %16 = vector.shape_cast %15 : vector<1x32x32xf32> to vector<32x32xf32>
    %cst_20 = arith.constant dense<0.000000e+00> : vector<32x32xf32>
    %17 = tpu.matmul %14, %16, %cst_20 {dimension_numbers = #tpu.dot_dimension_numbers<[1], [0], [0], [1], [0, 0, 1, 1], [], []>} : vector<32x32xf32>, vector<32x32xf32>, vector<32x32xf32> -> vector<32x32xf32>
    %18 = arith.addf %12, %17 : vector<32x32xf32>
    %c0_21 = arith.constant 0 : index
    %c3 = arith.constant 3 : index
    %c0_22 = arith.constant 0 : index
    %c0_23 = arith.constant 0 : index
    %19 = vector.load %arg1[%c0_21, %c3, %c0_22, %c0_23] : memref<1x5x32x32xf32, #tpu.memory_space<vmem>>, vector<1x1x32x32xf32>
    %20 = vector.shape_cast %19 : vector<1x1x32x32xf32> to vector<32x32xf32>
    %c3_24 = arith.constant 3 : index
    %c0_25 = arith.constant 0 : index
    %c0_26 = arith.constant 0 : index
    %21 = vector.load %arg2[%c3_24, %c0_25, %c0_26] : memref<5x32x32xf32, #tpu.memory_space<vmem>>, vector<1x32x32xf32>
    %22 = vector.shape_cast %21 : vector<1x32x32xf32> to vector<32x32xf32>
    %cst_27 = arith.constant dense<0.000000e+00> : vector<32x32xf32>
    %23 = tpu.matmul %20, %22, %cst_27 {dimension_numbers = #tpu.dot_dimension_numbers<[1], [0], [0], [1], [0, 0, 1, 1], [], []>} : vector<32x32xf32>, vector<32x32xf32>, vector<32x32xf32> -> vector<32x32xf32>
    %24 = arith.addf %18, %23 : vector<32x32xf32>
    %c0_28 = arith.constant 0 : index
    %c4 = arith.constant 4 : index
    %c0_29 = arith.constant 0 : index
    %c0_30 = arith.constant 0 : index
    %25 = vector.load %arg1[%c0_28, %c4, %c0_29, %c0_30] : memref<1x5x32x32xf32, #tpu.memory_space<vmem>>, vector<1x1x32x32xf32>
    %26 = vector.shape_cast %25 : vector<1x1x32x32xf32> to vector<32x32xf32>
    %c4_31 = arith.constant 4 : index
    %c0_32 = arith.constant 0 : index
    %c0_33 = arith.constant 0 : index
    %27 = vector.load %arg2[%c4_31, %c0_32, %c0_33] : memref<5x32x32xf32, #tpu.memory_space<vmem>>, vector<1x32x32xf32>
    %28 = vector.shape_cast %27 : vector<1x32x32xf32> to vector<32x32xf32>
    %cst_34 = arith.constant dense<0.000000e+00> : vector<32x32xf32>
    %29 = tpu.matmul %26, %28, %cst_34 {dimension_numbers = #tpu.dot_dimension_numbers<[1], [0], [0], [1], [0, 0, 1, 1], [], []>} : vector<32x32xf32>, vector<32x32xf32>, vector<32x32xf32> -> vector<32x32xf32>
    %30 = arith.addf %24, %29 : vector<32x32xf32>
    %c0_35 = arith.constant 0 : index
    %c0_36 = arith.constant 0 : index
    %31 = vector.load %arg3[%c0_35, %c0_36] : memref<1x32xf32, #tpu.memory_space<vmem>>, vector<1x32xf32>
    %32 = vector.broadcast %31 : vector<1x32xf32> to vector<32x32xf32>
    %33 = arith.addf %30, %32 : vector<32x32xf32>
    %cst_37 = arith.constant dense<0.000000e+00> : vector<32xf32>
    %34 = vector.multi_reduction <add>, %33, %cst_37 [0] : vector<32x32xf32> to vector<32xf32>
    %35 = vector.shape_cast %34 : vector<32xf32> to vector<1x32xf32>
    %cst_38 = arith.constant 3.200000e+01 : f32
    %36 = vector.broadcast %cst_38 : f32 to vector<1x32xf32>
    %37 = arith.divf %35, %36 : vector<1x32xf32>
    %c0_39 = arith.constant 0 : index
    %c0_40 = arith.constant 0 : index
    %38 = vector.load %arg4[%c0_39, %c0_40] : memref<32x2xf32, #tpu.memory_space<vmem>>, vector<32x2xf32>
    %cst_41 = arith.constant dense<0.000000e+00> : vector<1x2xf32>
    %39 = tpu.matmul %37, %38, %cst_41 {dimension_numbers = #tpu.dot_dimension_numbers<[1], [0], [0], [1], [0, 0, 1, 1], [], []>} : vector<1x32xf32>, vector<32x2xf32>, vector<1x2xf32> -> vector<1x2xf32>
    %cst_42 = arith.constant 0.000000e+00 : f32
    %40 = vector.broadcast %cst_42 : f32 to vector<1x2xf32>
    %41 = arith.maximumf %39, %40 : vector<1x2xf32>
    %cst_43 = arith.constant 0.000000e+00 : f32
    %42 = vector.broadcast %cst_43 : f32 to vector<1x32xf32>
    %43 = vector.extract_strided_slice %41 {offsets = [0, 0], sizes = [1, 1], strides = [1, 1]} : vector<1x2xf32> to vector<1x1xf32>
    %c0_44 = arith.constant 0 : index
    %c0_45 = arith.constant 0 : index
    %44 = vector.load %arg5[%c0_44, %c0_45] : memref<2x32xf32, #tpu.memory_space<vmem>>, vector<1x32xf32>
    %45 = vector.broadcast %43 : vector<1x1xf32> to vector<1x32xf32>
    %46 = arith.mulf %45, %44 : vector<1x32xf32>
    %47 = arith.addf %42, %46 : vector<1x32xf32>
    %48 = vector.extract_strided_slice %41 {offsets = [0, 1], sizes = [1, 1], strides = [1, 1]} : vector<1x2xf32> to vector<1x1xf32>
    %c1_46 = arith.constant 1 : index
    %c0_47 = arith.constant 0 : index
    %49 = vector.load %arg5[%c1_46, %c0_47] : memref<2x32xf32, #tpu.memory_space<vmem>>, vector<1x32xf32>
    %50 = vector.broadcast %48 : vector<1x1xf32> to vector<1x32xf32>
    %51 = arith.mulf %50, %49 : vector<1x32xf32>
    %52 = arith.addf %47, %51 : vector<1x32xf32>
    %cst_48 = arith.constant 0.000000e+00 : f32
    %53 = vector.broadcast %cst_48 : f32 to vector<1x32xf32>
    %54 = arith.subf %53, %52 : vector<1x32xf32>
    %55 = math.exp %54 : vector<1x32xf32>
    %cst_49 = arith.constant 1.000000e+00 : f32
    %56 = vector.broadcast %cst_49 : f32 to vector<1x32xf32>
    %57 = arith.addf %56, %55 : vector<1x32xf32>
    %cst_50 = arith.constant 1.000000e+00 : f32
    %58 = vector.broadcast %cst_50 : f32 to vector<1x32xf32>
    %59 = arith.divf %58, %57 : vector<1x32xf32>
    %60 = vector.broadcast %59 : vector<1x32xf32> to vector<32x32xf32>
    %61 = arith.mulf %33, %60 : vector<32x32xf32>
    %c0_51 = arith.constant 0 : index
    %c0_52 = arith.constant 0 : index
    %c0_53 = arith.constant 0 : index
    %62 = vector.load %arg6[%c0_51, %c0_52, %c0_53] : memref<1x32x32xf32, #tpu.memory_space<vmem>>, vector<1x32x32xf32>
    %63 = vector.shape_cast %62 : vector<1x32x32xf32> to vector<32x32xf32>
    %c0_54 = arith.constant 0 : index
    %c0_55 = arith.constant 0 : index
    %64 = vector.load %arg7[%c0_54, %c0_55] : memref<32x32xf32, #tpu.memory_space<vmem>>, vector<32x32xf32>
    %cst_56 = arith.constant dense<0.000000e+00> : vector<32x32xf32>
    %65 = tpu.matmul %63, %64, %cst_56 {dimension_numbers = #tpu.dot_dimension_numbers<[1], [0], [0], [1], [0, 0, 1, 1], [], []>} : vector<32x32xf32>, vector<32x32xf32>, vector<32x32xf32> -> vector<32x32xf32>
    %66 = arith.addf %61, %65 : vector<32x32xf32>
    %c0_57 = arith.constant 0 : index
    %c0_58 = arith.constant 0 : index
    %67 = vector.load %arg8[%c0_57, %c0_58] : memref<1x32xf32, #tpu.memory_space<vmem>>, vector<1x32xf32>
    %68 = vector.broadcast %67 : vector<1x32xf32> to vector<32x32xf32>
    %69 = arith.addf %66, %68 : vector<32x32xf32>
    %c0_59 = arith.constant 0 : index
    %c0_60 = arith.constant 0 : index
    %70 = vector.load %arg9[%c0_59, %c0_60] : memref<1x32xf32, #tpu.memory_space<vmem>>, vector<1x32xf32>
    %71 = vector.broadcast %70 : vector<1x32xf32> to vector<32x32xf32>
    %72 = arith.mulf %69, %71 : vector<32x32xf32>
    %c0_61 = arith.constant 0 : index
    %c0_62 = arith.constant 0 : index
    %73 = vector.load %arg10[%c0_61, %c0_62] : memref<1x32xf32, #tpu.memory_space<vmem>>, vector<1x32xf32>
    %74 = vector.broadcast %73 : vector<1x32xf32> to vector<32x32xf32>
    %75 = arith.addf %72, %74 : vector<32x32xf32>
    %cst_63 = arith.constant 0.000000e+00 : f32
    %76 = vector.broadcast %cst_63 : f32 to vector<32x32xf32>
    %77 = arith.maximumf %75, %76 : vector<32x32xf32>
    %c0_64 = arith.constant 0 : index
    %c0_65 = arith.constant 0 : index
    %c0_66 = arith.constant 0 : index
    %78 = vector.load %arg11[%c0_64, %c0_65, %c0_66] : memref<1x32x32xf32, #tpu.memory_space<vmem>>, vector<1x32x32xf32>
    %79 = vector.shape_cast %78 : vector<1x32x32xf32> to vector<32x32xf32>
    %80 = vector.shape_cast %77 : vector<32x32xf32> to vector<1x32x32xf32>
    tpu.vector_store %arg11[%c0_64, %c0_65, %c0_66], %80 {strides = array<i32>} : memref<1x32x32xf32, #tpu.memory_space<vmem>>, vector<1x32x32xf32>,
    return
  }
  func.func @transform_0(%arg0: i32) -> (i32, i32, i32, i32) {
    %c0_i32 = arith.constant 0 : i32
    %c0_i32_0 = arith.constant 0 : i32
    %c0_i32_1 = arith.constant 0 : i32
    %c0_i32_2 = arith.constant 0 : i32
    return %arg0, %c0_i32, %c0_i32_0, %c0_i32_1 : i32, i32, i32, i32
  }
  func.func @transform_1(%arg0: i32) -> (i32, i32, i32) {
    %c0_i32 = arith.constant 0 : i32
    %c0_i32_0 = arith.constant 0 : i32
    %c0_i32_1 = arith.constant 0 : i32
    %c0_i32_2 = arith.constant 0 : i32
    return %c0_i32, %c0_i32_0, %c0_i32_1 : i32, i32, i32
  }
  func.func @transform_2(%arg0: i32) -> (i32, i32) {
    %c0_i32 = arith.constant 0 : i32
    %c0_i32_0 = arith.constant 0 : i32
    %c0_i32_1 = arith.constant 0 : i32
    return %c0_i32, %c0_i32_0 : i32, i32
  }
  func.func @transform_3(%arg0: i32) -> (i32, i32) {
    %c0_i32 = arith.constant 0 : i32
    %c0_i32_0 = arith.constant 0 : i32
    %c0_i32_1 = arith.constant 0 : i32
    return %c0_i32, %c0_i32_0 : i32, i32
  }
  func.func @transform_4(%arg0: i32) -> (i32, i32) {
    %c0_i32 = arith.constant 0 : i32
    %c0_i32_0 = arith.constant 0 : i32
    %c0_i32_1 = arith.constant 0 : i32
    return %c0_i32, %c0_i32_0 : i32, i32
  }
  func.func @transform_5(%arg0: i32) -> (i32, i32, i32) {
    %c0_i32 = arith.constant 0 : i32
    %c0_i32_0 = arith.constant 0 : i32
    %c0_i32_1 = arith.constant 0 : i32
    return %arg0, %c0_i32, %c0_i32_0 : i32, i32, i32
  }
  func.func @transform_6(%arg0: i32) -> (i32, i32) {
    %c0_i32 = arith.constant 0 : i32
    %c0_i32_0 = arith.constant 0 : i32
    %c0_i32_1 = arith.constant 0 : i32
    return %c0_i32, %c0_i32_0 : i32, i32
  }
  func.func @transform_7(%arg0: i32) -> (i32, i32) {
    %c0_i32 = arith.constant 0 : i32
    %c0_i32_0 = arith.constant 0 : i32
    %c0_i32_1 = arith.constant 0 : i32
    return %c0_i32, %c0_i32_0 : i32, i32
  }
  func.func @transform_8(%arg0: i32) -> (i32, i32) {
    %c0_i32 = arith.constant 0 : i32
    %c0_i32_0 = arith.constant 0 : i32
    %c0_i32_1 = arith.constant 0 : i32
    return %c0_i32, %c0_i32_0 : i32, i32
  }
  func.func @transform_9(%arg0: i32) -> (i32, i32) {
    %c0_i32 = arith.constant 0 : i32
    %c0_i32_0 = arith.constant 0 : i32
    %c0_i32_1 = arith.constant 0 : i32
    return %c0_i32, %c0_i32_0 : i32, i32
  }
  func.func @transform_10(%arg0: i32) -> (i32, i32, i32) {
    %c0_i32 = arith.constant 0 : i32
    %c0_i32_0 = arith.constant 0 : i32
    %c0_i32_1 = arith.constant 0 : i32
    return %arg0, %c0_i32, %c0_i32_0 : i32, i32, i32
  }
}

</mosaic_0001>

<bundles_post_ra>
// kernel: _lambda_.5
= control target key start
LH: loop header
LB: loop body
LE: loop exit
PB: predicated region body
PF: predicated region fallthrough
CT: control target
= control target key end

     0   :  { %s1235_s15 = smov 0   ;;  %s1397_s0 = inlined_call_operand.vmem [shape: f32[2,68,8], index: 0, kind: input, shape index: {}]   ;;  %s1398_s1 = inlined_call_operand.vmem [shape: f32[5,8,16], index: 1, kind: input, shape index: {}]   ;;  %s1399_s2 = inlined_call_operand.vmem [shape: f32[1,16], index: 2, kind: input, shape index: {}]   ;;  %s1400_s3 = inlined_call_operand.vmem [shape: f32[1,16], index: 3, kind: input, shape index: {}]   ;;  %s1401_s4 = inlined_call_operand.vmem [shape: f32[2,64,16], index: 4, kind: output, shape index: {}]  }
   0x1 LB: > { %s1019_s16 = sadd.s32 4294967295, %s1208_s15   ;;  %p1023_p0 = scmp.ge.s32.totalorder %s1208_s15, 1  ;;  %s1208_s15 = sphi %s1235_s15, %s14_s15  }
   0x2   : > { %p162_p1 = scmp.lt.s32.totalorder %s1208_s15, 3 }
   0x4   : > { %p163_p2 = pnand %p1023_p0, %p162_p1 }
   0x5   : > { %p188_p3 = scmp.lt.s32.totalorder (!%p163_p2), %s1019_s16, 1 }
   0x6   : > { %166 = sbr.rel (%p163_p2) target bundleno = 260 (0x104), region = 36 }
   0xb   : > { %v1027_v0 = vld [vmem:[%s1398_s1 + $0x8] sm:$0xff]  ;;  %v206_v1 = vld [vmem:[%s1398_s1] sm:$0xff]  ;;  %v1044_v2 = vld [vmem:[%s1398_s1 + $0x10] sm:$0xff]  ;;  %s1403_s16 = smov (!%p188_p3, %s1019_s16), 1  ;;  %vm217_vm0 = vcmask 64512   ;;  %vm955_vm1 = vcmask 130048  }
   0xc   : > { %1191 = vmatprep.subr.mxu1 %v1027_v0  ;;  %1121 = vmatprep.subr.mxu0 %v1027_v0  ;;  %s1193_s23 = smul.u32 72, %s1403_s16  ;;  %v1053_v9 = vld [vmem:[%s1398_s1 + $0x18] sm:$0xff]  ;;  %v1062_v10 = vld [vmem:[%s1398_s1 + $0x20] sm:$0xff]  ;;  %s1075_s9 = sshll.u32 %s1403_s16, 6 }
   0xd   : > { %1192 = vmatpush3.msra.mxu1 %v1027_v0  ;;  %1122 = vmatpush3.msra.mxu0 %v1027_v0  ;;  %s1363_s12 = scalar_lea.vmem %s1401_s4, %s1075_s9 }
   0xe   : > { %1135 = vmatprep.subr.mxu1 %v206_v1  ;;  %1149 = vmatprep.subr.mxu0 %v1044_v2  ;;  %s1258_s26 = scalar_lea.vmem %s1397_s0, %s1193_s23 }
   0xf   : > { %v207_v3 = vld [vmem:[%s1258_s26 + $0x1] sm:$0xff]  ;;  %v208_v5 = vld [vmem:[%s1258_s26 + $0x9] sm:$0xff]  ;;  %v209_v7 = vld [vmem:[%s1258_s26 + $0x11] sm:$0xff] }
  0x10   : > { %v211_v4 = vld [vmem:[%s1258_s26 + $0x21] sm:$0xff]  ;;  %1123 = vmatprep.mubr.msk.f32.mxu0 %vm217_vm0, %v207_v3  ;;  %v212_v6 = vld [vmem:[%s1258_s26 + $0x29] sm:$0xff]  ;;  %v213_v8 = vld [vmem:[%s1258_s26 + $0x31] sm:$0xff] }
  0x11   : > { %1129 = vmatprep.mubr.msk.f32.mxu1 %vm217_vm0, %v211_v4  ;;  %1124 = vmatmul.mubr.msk.f32.vlgmr.msra.gmra.mxu0 %vm217_vm0, %v208_v5  ;;  %v210_v11 = vld [vmem:[%s1258_s26 + $0x19] sm:$0xff]  ;;  %v476_v14 = vld [vmem:[%s1258_s26 + $0x2] sm:$0xff]  ;;  %v477_v16 = vld [vmem:[%s1258_s26 + $0xa] sm:$0xff] }
  0x12   : > { %1130 = vmatmul.mubr.msk.f32.vlgmr.msra.gmra.mxu1 %vm217_vm0, %v212_v6  ;;  %1150 = vmatpush3.msra.mxu0 %v1044_v2  ;;  %v214_v12 = vld [vmem:[%s1258_s26 + $0x39] sm:$0xff]  ;;  %v199_v15 = vld [vmem:[%s1258_s26 + $0x8] sm:$0xff]  ;;  %v200_v17 = vld [vmem:[%s1258_s26 + $0x10] sm:$0xff] }
  0x13   : > { %1136 = vmatpush3.msra.mxu1 %v206_v1  ;;  %1126 = vmatprep.mubr.msk.f32.mxu0 %vm217_vm0, %v209_v7  ;;  %v198_v13 = vld [vmem:[%s1258_s26] sm:$0xff]  ;;  %v478_v18 = vld [vmem:[%s1258_s26 + $0x12] sm:$0xff]  ;;  %v203_v23 = vld [vmem:[%s1258_s26 + $0x28] sm:$0xff] }
  0x14   : > { %1132 = vmatprep.mubr.msk.f32.mxu1 %vm217_vm0, %v213_v8  ;;  %1163 = vmatprep.subr.mxu1 %v1053_v9  ;;  %v201_v19 = vld [vmem:[%s1258_s26 + $0x18] sm:$0xff]  ;;  %v202_v21 = vld [vmem:[%s1258_s26 + $0x20] sm:$0xff]  ;;  %v481_v24 = vld [vmem:[%s1258_s26 + $0x2a] sm:$0xff] }
  0x15   : > { %1177 = vmatprep.subr.mxu0 %v1062_v10  ;;  %1127 = vmatmul.mubr.msk.f32.gmra.mxu0 %vm217_vm0, %v210_v11  ;;  %v479_v20 = vld [vmem:[%s1258_s26 + $0x1a] sm:$0xff]  ;;  %v480_v22 = vld [vmem:[%s1258_s26 + $0x22] sm:$0xff]  ;;  %v204_v25 = vld [vmem:[%s1258_s26 + $0x30] sm:$0xff] }
  0x16   : > { %1133 = vmatmul.mubr.msk.f32.gmra.mxu1 %vm217_vm0, %v214_v12  ;;  %1151 = vmatprep.mubr.msk.f32.mxu0 %vm217_vm0, %v476_v14  ;;  %v482_v26 = vld [vmem:[%s1258_s26 + $0x32] sm:$0xff]  ;;  %v483_v28 = vld [vmem:[%s1258_s26 + $0x3a] sm:$0xff]  ;;  %v623_v29 = vld [vmem:[%s1258_s26 + $0x3] sm:$0xff] }
  0x17   : > { %1137 = vmatprep.mubr.msk.f32.mxu1 %vm217_vm0, %v198_v13  ;;  %v205_v27 = vld [vmem:[%s1258_s26 + $0x38] sm:$0xff]  ;;  %v770_v30 = vld [vmem:[%s1258_s26 + $0x4] sm:$0xff]  ;;  %v771_v32 = vld [vmem:[%s1258_s26 + $0xc] sm:$0xff] }
  0x18   : > { %v624_v31 = vld [vmem:[%s1258_s26 + $0xb] sm:$0xff]  ;;  %v625_v33 = vld [vmem:[%s1258_s26 + $0x13] sm:$0xff]  ;;  %v626_v35 = vld [vmem:[%s1258_s26 + $0x1b] sm:$0xff] }
  0x19   : > { %1152 = vmatmul.mubr.msk.f32.vlgmr.msra.gmra.mxu0 %vm217_vm0, %v477_v16  ;;  %v772_v34 = vld [vmem:[%s1258_s26 + $0x14] sm:$0xff]  ;;  %v773_v36 = vld [vmem:[%s1258_s26 + $0x1c] sm:$0xff]  ;;  %v774_v38 = vld [vmem:[%s1258_s26 + $0x24] sm:$0xff] }
  0x1a   : > { %1138 = vmatmul.mubr.msk.f32.vlgmr.msra.gmra.mxu1 %vm217_vm0, %v199_v15  ;;  %1178 = vmatpush3.msra.mxu0 %v1062_v10  ;;  %v627_v37 = vld [vmem:[%s1258_s26 + $0x23] sm:$0xff]  ;;  %v628_v39 = vld [vmem:[%s1258_s26 + $0x2b] sm:$0xff]  ;;  %v629_v41 = vld [vmem:[%s1258_s26 + $0x33] sm:$0xff] }
  0x1b   : > { %1164 = vmatpush3.msra.mxu1 %v1053_v9  ;;  %1140 = vmatprep.mubr.msk.f32.mxu1 %vm217_vm0, %v200_v17  ;;  %v775_v40 = vld [vmem:[%s1258_s26 + $0x2c] sm:$0xff]  ;;  %v776_v42 = vld [vmem:[%s1258_s26 + $0x34] sm:$0xff]  ;;  %v777_v44 = vld [vmem:[%s1258_s26 + $0x3c] sm:$0xff] }
  0x1c   : > { %1154 = vmatprep.mubr.msk.f32.mxu0 %vm217_vm0, %v478_v18  ;;  %v630_v43 = vld [vmem:[%s1258_s26 + $0x3b] sm:$0xff] }
  0x1d   : > { %1155 = vmatmul.mubr.msk.f32.gmra.mxu0 %vm217_vm0, %v479_v20  ;;  %v1349_v14 = vld [vmem:[%s1399_s2] ss:$0 sm:$0xff] }
  0x1e   : > { %1141 = vmatmul.mubr.msk.f32.gmra.mxu1 %vm217_vm0, %v201_v19  ;;  %1157 = vmatprep.mubr.msk.f32.mxu0 %vm217_vm0, %v480_v22  ;;  %v1354_v22 = vld [vmem:[%s1400_s3] ss:$0 sm:$0xff] }
  0x1f   : > { %1143 = vmatprep.mubr.msk.f32.mxu1 %vm217_vm0, %v202_v21 }
  0x21   : > { %1158 = vmatmul.mubr.msk.f32.gmra.mxu0 %vm217_vm0, %v481_v24 }
  0x22   : > { %1144 = vmatmul.mubr.msk.f32.gmra.mxu1 %vm217_vm0, %v203_v23  ;;  %1160 = vmatprep.mubr.msk.f32.mxu0 %vm217_vm0, %v482_v26 }
  0x23   : > { %1146 = vmatprep.mubr.msk.f32.mxu1 %vm217_vm0, %v204_v25 }
  0x25   : > { %1161 = vmatmul.mubr.msk.f32.gmra.mxu0 %vm217_vm0, %v483_v28 }
  0x26   : > { %1147 = vmatmul.mubr.msk.f32.gmra.mxu1 %vm217_vm0, %v205_v27  ;;  %1179 = vmatprep.mubr.msk.f32.mxu0 %vm217_vm0, %v770_v30 }
  0x27   : > { %1165 = vmatprep.mubr.msk.f32.mxu1 %vm217_vm0, %v623_v29 }
  0x29   : > { %1180 = vmatmul.mubr.msk.f32.vlgmr.msra.gmra.mxu0 %vm217_vm0, %v771_v32 }
  0x2a   : > { %1166 = vmatmul.mubr.msk.f32.vlgmr.msra.gmra.mxu1 %vm217_vm0, %v624_v31  ;;  %1182 = vmatprep.mubr.msk.f32.mxu0 %vm217_vm0, %v772_v34 }
  0x2b   : > { %1168 = vmatprep.mubr.msk.f32.mxu1 %vm217_vm0, %v625_v33 }
  0x2d   : > { %1183 = vmatmul.mubr.msk.f32.gmra.mxu0 %vm217_vm0, %v773_v36 }
  0x2e   : > { %1169 = vmatmul.mubr.msk.f32.gmra.mxu1 %vm217_vm0, %v626_v35  ;;  %1185 = vmatprep.mubr.msk.f32.mxu0 %vm217_vm0, %v774_v38 }
  0x2f   : > { %1171 = vmatprep.mubr.msk.f32.mxu1 %vm217_vm0, %v627_v37 }
  0x31   : > { %1186 = vmatmul.mubr.msk.f32.gmra.mxu0 %vm217_vm0, %v775_v40 }
  0x32   : > { %1172 = vmatmul.mubr.msk.f32.gmra.mxu1 %vm217_vm0, %v628_v39  ;;  %1188 = vmatprep.mubr.msk.f32.mxu0 %vm217_vm0, %v776_v42 }
  0x33   : > { %1174 = vmatprep.mubr.msk.f32.mxu1 %vm217_vm0, %v629_v41 }
  0x35   : > { %1189 = vmatmul.mubr.msk.f32.gmra.mxu0 %vm217_vm0, %v777_v44 }
  0x36   : > { %1175 = vmatmul.mubr.msk.f32.gmra.mxu1 %vm217_vm0, %v630_v43 }
  0xd1   : > { %v1125_v45 = vpop.f32.mrf.mxu0 }
  0xd2   : > { %v1131_v46 = vpop.f32.mrf.mxu1 }
  0xd3   : > { %v308_v47 = vpop.f32.mrf.mxu0 }
  0xd4   : > { %v328_v48 = vpop.f32.mrf.mxu1 }
  0xd5   : > { %v1128_v49 = vpop.f32.mrf.mxu0 }
  0xd6   : > { %v1134_v50 = vpop.f32.mrf.mxu1 }
  0xd7   : > { %v318_v51 = vpop.f32.mrf.mxu0 }
  0xd8   : > { %v338_v52 = vpop.f32.mrf.mxu1 }
  0xd9   : > { %v1153_v54 = vpop.f32.mrf.mxu0 }
  0xda   : > { %v1139_v53 = vpop.f32.mrf.mxu1 }
  0xdb   : > { %v576_v56 = vpop.f32.mrf.mxu0  ;;  %v443_v1 = vadd.f32 %v1139_v53, %v1125_v45 }
  0xdc   : > { %v437_v55 = vpop.f32.mrf.mxu1 }
  0xdd   : > { %v1156_v58 = vpop.f32.mrf.mxu0  ;;  %v438_v4 = vadd.f32 %v437_v55, %v308_v47  ;;  %v616_v7 = vadd.f32 %v1153_v54, %v443_v1 }
  0xde   : > { %v1142_v57 = vpop.f32.mrf.mxu1 }
  0xdf   : > { %v586_v60 = vpop.f32.mrf.mxu0  ;;  %v453_v8 = vadd.f32 %v1142_v57, %v1128_v49  ;;  %v615_v11 = vadd.f32 %v576_v56, %v438_v4 }
  0xe0   : > { %v447_v59 = vpop.f32.mrf.mxu1 }
  0xe1   : > { %v1159_v62 = vpop.f32.mrf.mxu0  ;;  %v448_v12 = vadd.f32 %v447_v59, %v318_v51  ;;  %v618_v17 = vadd.f32 %v1156_v58, %v453_v8 }
  0xe2   : > { %v1145_v61 = vpop.f32.mrf.mxu1 }
  0xe3   : > { %v596_v0 = vpop.f32.mrf.mxu0  ;;  %v463_v20 = vadd.f32 %v1145_v61, %v1131_v46  ;;  %v617_v25 = vadd.f32 %v586_v60, %v448_v12 }
  0xe4   : > { %v457_v63 = vpop.f32.mrf.mxu1 }
  0xe5   : > { %v1162_v3 = vpop.f32.mrf.mxu0  ;;  %v458_v21 = vadd.f32 %v457_v63, %v328_v48  ;;  %v620_v36 = vadd.f32 %v1159_v62, %v463_v20 }
  0xe6   : > { %v1148_v2 = vpop.f32.mrf.mxu1 }
  0xe7   : > { %v606_v6 = vpop.f32.mrf.mxu0  ;;  %v473_v29 = vadd.f32 %v1148_v2, %v1134_v50  ;;  %v619_v37 = vadd.f32 %v596_v0, %v458_v21 }
  0xe8   : > { %v467_v5 = vpop.f32.mrf.mxu1 }
  0xe9   : > { %v1181_v10 = vpop.f32.mrf.mxu0  ;;  %v468_v38 = vadd.f32 %v467_v5, %v338_v52  ;;  %v622_v45 = vadd.f32 %v1162_v3, %v473_v29 }
  0xea   : > { %v1167_v9 = vpop.f32.mrf.mxu1 }
  0xeb   : > { %v763_v13 = vadd.f32 %v1167_v9, %v616_v7  ;;  %v870_v16 = vpop.f32.mrf.mxu0  ;;  %v621_v53 = vadd.f32 %v606_v6, %v468_v38 }
  0xec   : > { %v723_v15 = vpop.f32.mrf.mxu1 }
  0xed   : > { %v910_v18 = vadd.f32 %v1181_v10, %v763_v13  ;;  %v762_v19 = vadd.f32 %v723_v15, %v615_v11  ;;  %v1184_v24 = vpop.f32.mrf.mxu0 }
  0xee   : > { %v1170_v23 = vpop.f32.mrf.mxu1 }
  0xef   : > { %v925_v26 = vmul.f32 %v1349_v14, %v910_v18  ;;  %v909_v27 = vadd.f32 %v870_v16, %v762_v19  ;;  %v765_v28 = vadd.f32 %v1170_v23, %v618_v17  ;;  %v880_v31 = vpop.f32.mrf.mxu0 }
  0xf0   : > { %v733_v30 = vpop.f32.mrf.mxu1 }
  0xf1   : > { %v940_v32 = vadd.f32 %v1354_v22, %v925_v26  ;;  %v924_v33 = vmul.f32 %v1349_v14, %v909_v27  ;;  %v912_v34 = vadd.f32 %v1184_v24, %v765_v28  ;;  %v764_v35 = vadd.f32 %v733_v30, %v617_v25  ;;  %v1187_v40 = vpop.f32.mrf.mxu0 }
  0xf2   : > { %v1173_v39 = vpop.f32.mrf.mxu1 }
  0xf3   : > { %v948_v41 = vmax.f32 %v940_v32, 0.0  ;;  %v939_v42 = vadd.f32 %v1354_v22, %v924_v33  ;;  %v927_v43 = vmul.f32 %v1349_v14, %v912_v34  ;;  %v911_v44 = vadd.f32 %v880_v31, %v764_v35  ;;  %v890_v48 = vpop.f32.mrf.mxu0 }
  0xf4   : > { %v767_v46 = vadd.f32 %v1173_v39, %v620_v36  ;;  %v743_v47 = vpop.f32.mrf.mxu1 }
  0xf5   : > { %957 = vst.msk [vmem:[%s1363_s12 + $0x8] sm:$0xff] %vm955_vm1, %v948_v41  ;;  %v947_v49 = vmax.f32 %v939_v42, 0.0  ;;  %v942_v50 = vadd.f32 %v1354_v22, %v927_v43  ;;  %v926_v51 = vmul.f32 %v1349_v14, %v911_v44  ;;  %v766_v52 = vadd.f32 %v743_v47, %v619_v37  ;;  %v1190_v56 = vpop.f32.mrf.mxu0 }
  0xf6   : > { %v914_v54 = vadd.f32 %v1187_v40, %v767_v46  ;;  %v1176_v55 = vpop.f32.mrf.mxu1 }
  0xf7   : > { %956 = vst.msk [vmem:[%s1363_s12] sm:$0xff] %vm955_vm1, %v947_v49  ;;  %v950_v57 = vmax.f32 %v942_v50, 0.0  ;;  %v941_v58 = vadd.f32 %v1354_v22, %v926_v51  ;;  %v913_v59 = vadd.f32 %v890_v48, %v766_v52  ;;  %v769_v60 = vadd.f32 %v1176_v55, %v622_v45  ;;  %v900_v4 = vpop.f32.mrf.mxu0 }
  0xf8   : > { %v929_v61 = vmul.f32 %v1349_v14, %v914_v54  ;;  %v753_v62 = vpop.f32.mrf.mxu1 }
  0xf9   : > { %959 = vst.msk [vmem:[%s1363_s12 + $0x18] sm:$0xff] %vm955_vm1, %v950_v57  ;;  %v949_v63 = vmax.f32 %v941_v58, 0.0  ;;  %v928_v0 = vmul.f32 %v1349_v14, %v913_v59  ;;  %v916_v1 = vadd.f32 %v1190_v56, %v769_v60  ;;  %v768_v2 = vadd.f32 %v753_v62, %v621_v53 }
  0xfa   : > { %v944_v3 = vadd.f32 %v1354_v22, %v929_v61 }
  0xfb   : > { %958 = vst.msk [vmem:[%s1363_s12 + $0x10] sm:$0xff] %vm955_vm1, %v949_v63  ;;  %v943_v5 = vadd.f32 %v1354_v22, %v928_v0  ;;  %v931_v6 = vmul.f32 %v1349_v14, %v916_v1  ;;  %v915_v7 = vadd.f32 %v900_v4, %v768_v2 }
  0xfc   : > { %v952_v8 = vmax.f32 %v944_v3, 0.0 }
  0xfd   : > { %v951_v9 = vmax.f32 %v943_v5, 0.0  ;;  %v946_v10 = vadd.f32 %v1354_v22, %v931_v6  ;;  %v930_v11 = vmul.f32 %v1349_v14, %v915_v7 }
  0xfe   : > { %961 = vst.msk [vmem:[%s1363_s12 + $0x28] sm:$0xff] %vm955_vm1, %v952_v8 }
  0xff   : > { %960 = vst.msk [vmem:[%s1363_s12 + $0x20] sm:$0xff] %vm955_vm1, %v951_v9  ;;  %v954_v12 = vmax.f32 %v946_v10, 0.0  ;;  %v945_v13 = vadd.f32 %v1354_v22, %v930_v11 }
 0x101   : > { %963 = vst.msk [vmem:[%s1363_s12 + $0x38] sm:$0xff] %vm955_vm1, %v954_v12  ;;  %v953_v15 = vmax.f32 %v945_v13, 0.0 }
 0x103   : > { %962 = vst.msk [vmem:[%s1363_s12 + $0x30] sm:$0xff] %vm955_vm1, %v953_v15 }
 0x104 PF: > { %s14_s15 = sadd.s32 1, %s1208_s15  }
 0x105   : > { %p11_p4 = scmp.ge.s32.totalorder %s14_s15, 4  }
 0x107   :  { %13 = sbr.rel (!%p11_p4) target bundleno = 1 (0x1), region = 70 }

// kernel: _lambda_.6
= control target key start
LH: loop header
LB: loop body
LE: loop exit
PB: predicated region body
PF: predicated region fallthrough
CT: control target
= control target key end

     0   :  { %s1261_s15 = smov 0   ;;  %s1438_s0 = inlined_call_operand.vmem [shape: f32[2,68,16], index: 0, kind: input, shape index: {}]   ;;  %s1439_s1 = inlined_call_operand.vmem [shape: f32[5,16,32], index: 1, kind: input, shape index: {}]   ;;  %s1440_s2 = inlined_call_operand.vmem [shape: f32[1,32], index: 2, kind: input, shape index: {}]   ;;  %s1441_s3 = inlined_call_operand.vmem [shape: f32[1,32], index: 3, kind: input, shape index: {}]   ;;  %s1442_s4 = inlined_call_operand.vmem [shape: f32[2,64,32], index: 4, kind: output, shape index: {}]  }
   0x1 LB: > { %s1024_s16 = sadd.s32 4294967295, %s1234_s15   ;;  %p1028_p0 = scmp.ge.s32.totalorder %s1234_s15, 1  ;;  %s1234_s15 = sphi %s1261_s15, %s14_s15  }
   0x2   : > { %p162_p1 = scmp.lt.s32.totalorder %s1234_s15, 3 }
   0x4   : > { %p163_p2 = pnand %p1028_p0, %p162_p1 }
   0x5   : > { %p188_p3 = scmp.lt.s32.totalorder (!%p163_p2), %s1024_s16, 1 }
   0x6   : > { %166 = sbr.rel (%p163_p2) target bundleno = 260 (0x104), region = 36 }
   0xb   : > { %v1033_v0 = vld [vmem:[%s1439_s1 + $0x18] sm:$0xff]  ;;  %v1032_v1 = vld [vmem:[%s1439_s1 + $0x10] sm:$0xff]  ;;  %s1444_s16 = smov (!%p188_p3, %s1024_s16), 1  ;;  %v207_v2 = vld [vmem:[%s1439_s1 + $0x8] sm:$0xff]  ;;  %vm219_vm0 = vcmask 130048   ;;  %vm960_vm1 = vcmask 261120  }
   0xc   : > { %1215 = vmatprep.subr.mxu1 %v1033_v0  ;;  %1135 = vmatprep.subr.mxu0 %v1033_v0  ;;  %v1051_v3 = vld [vmem:[%s1439_s1 + $0x28] sm:$0xff]  ;;  %s1219_s25 = smul.u32 72, %s1444_s16  ;;  %v206_v10 = vld [vmem:[%s1439_s1] sm:$0xff]  ;;  %v1061_v16 = vld [vmem:[%s1439_s1 + $0x38] sm:$0xff]  ;;  %s1084_s21 = sshll.u32 %s1444_s16, 6 }
   0xd   : > { %1217 = vmatpush3.msra.mxu1 %v1033_v0  ;;  %1136 = vmatpush3.msra.mxu0 %v1033_v0  ;;  %v1050_v11 = vld [vmem:[%s1439_s1 + $0x20] sm:$0xff]  ;;  %v1071_v17 = vld [vmem:[%s1439_s1 + $0x48] sm:$0xff]  ;;  %v1060_v22 = vld [vmem:[%s1439_s1 + $0x30] sm:$0xff]  ;;  %s1404_s16 = scalar_lea.vmem %s1442_s4, %s1084_s21 }
   0xe   : > { %1216 = vmatprep.subr.mxu1 %v1032_v1  ;;  %1137 = vmatprep.subr.mxu0 %v1032_v1  ;;  %s1287_s28 = scalar_lea.vmem %s1438_s0, %s1219_s25  ;;  %v1070_v23 = vld [vmem:[%s1439_s1 + $0x40] sm:$0xff] }
   0xf   : > { %1218 = vmatpush3.msra.mxu1 %v1032_v1  ;;  %1138 = vmatpush3.msra.mxu0 %v1032_v1  ;;  %v208_v4 = vld [vmem:[%s1287_s28 + $0x1] sm:$0xff]  ;;  %v209_v6 = vld [vmem:[%s1287_s28 + $0x9] sm:$0xff]  ;;  %v210_v8 = vld [vmem:[%s1287_s28 + $0x11] sm:$0xff] }
  0x10   : > { %1151 = vmatprep.subr.mxu1 %v207_v2  ;;  %1167 = vmatprep.subr.mxu0 %v1051_v3  ;;  %v212_v5 = vld [vmem:[%s1287_s28 + $0x21] sm:$0xff]  ;;  %v213_v7 = vld [vmem:[%s1287_s28 + $0x29] sm:$0xff]  ;;  %v214_v9 = vld [vmem:[%s1287_s28 + $0x31] sm:$0xff] }
  0x11   : > { %1139 = vmatprep.mubr.msk.f32.mxu0 %vm219_vm0, %v208_v4  ;;  %1145 = vmatprep.mubr.msk.f32.mxu1 %vm219_vm0, %v212_v5  ;;  %v211_v12 = vld [vmem:[%s1287_s28 + $0x19] sm:$0xff]  ;;  %v478_v15 = vld [vmem:[%s1287_s28 + $0x2] sm:$0xff]  ;;  %v479_v19 = vld [vmem:[%s1287_s28 + $0xa] sm:$0xff] }
  0x12   : > { %1140 = vmatmul.mubr.msk.f32.vlgmr.msra.gmra.mxu0 %vm219_vm0, %v209_v6  ;;  %1146 = vmatmul.mubr.msk.f32.vlgmr.msra.gmra.mxu1 %vm219_vm0, %v213_v7  ;;  %v215_v13 = vld [vmem:[%s1287_s28 + $0x39] sm:$0xff]  ;;  %v199_v18 = vld [vmem:[%s1287_s28 + $0x8] sm:$0xff]  ;;  %v200_v20 = vld [vmem:[%s1287_s28 + $0x10] sm:$0xff] }
  0x13   : > { %1152 = vmatpush3.msra.mxu1 %v207_v2  ;;  %1168 = vmatpush3.msra.mxu0 %v1051_v3  ;;  %v198_v14 = vld [vmem:[%s1287_s28] sm:$0xff]  ;;  %v480_v21 = vld [vmem:[%s1287_s28 + $0x12] sm:$0xff]  ;;  %v203_v28 = vld [vmem:[%s1287_s28 + $0x28] sm:$0xff] }
  0x14   : > { %1142 = vmatprep.mubr.msk.f32.mxu0 %vm219_vm0, %v210_v8  ;;  %1148 = vmatprep.mubr.msk.f32.mxu1 %vm219_vm0, %v214_v9  ;;  %v201_v24 = vld [vmem:[%s1287_s28 + $0x18] sm:$0xff]  ;;  %v202_v26 = vld [vmem:[%s1287_s28 + $0x20] sm:$0xff]  ;;  %v483_v29 = vld [vmem:[%s1287_s28 + $0x2a] sm:$0xff] }
  0x15   : > { %1153 = vmatprep.subr.mxu1 %v206_v10  ;;  %1169 = vmatprep.subr.mxu0 %v1050_v11  ;;  %v481_v25 = vld [vmem:[%s1287_s28 + $0x1a] sm:$0xff]  ;;  %v482_v27 = vld [vmem:[%s1287_s28 + $0x22] sm:$0xff]  ;;  %v204_v30 = vld [vmem:[%s1287_s28 + $0x30] sm:$0xff] }
  0x16   : > { %1143 = vmatmul.mubr.msk.f32.gmra.mxu0 %vm219_vm0, %v211_v12  ;;  %1149 = vmatmul.mubr.msk.f32.gmra.mxu1 %vm219_vm0, %v215_v13  ;;  %v484_v31 = vld [vmem:[%s1287_s28 + $0x32] sm:$0xff]  ;;  %v485_v33 = vld [vmem:[%s1287_s28 + $0x3a] sm:$0xff]  ;;  %v626_v34 = vld [vmem:[%s1287_s28 + $0x3] sm:$0xff] }
  0x17   : > { %1154 = vmatpush3.msra.mxu1 %v206_v10  ;;  %1170 = vmatpush3.msra.mxu0 %v1050_v11  ;;  %v205_v32 = vld [vmem:[%s1287_s28 + $0x38] sm:$0xff]  ;;  %v774_v35 = vld [vmem:[%s1287_s28 + $0x4] sm:$0xff]  ;;  %v775_v37 = vld [vmem:[%s1287_s28 + $0xc] sm:$0xff] }
  0x18   : > { %1155 = vmatprep.mubr.msk.f32.mxu1 %vm219_vm0, %v198_v14  ;;  %1171 = vmatprep.mubr.msk.f32.mxu0 %vm219_vm0, %v478_v15  ;;  %v627_v36 = vld [vmem:[%s1287_s28 + $0xb] sm:$0xff]  ;;  %v628_v38 = vld [vmem:[%s1287_s28 + $0x13] sm:$0xff]  ;;  %v629_v40 = vld [vmem:[%s1287_s28 + $0x1b] sm:$0xff] }
  0x19   : > { %1183 = vmatprep.subr.mxu1 %v1061_v16  ;;  %1199 = vmatprep.subr.mxu0 %v1071_v17  ;;  %v776_v39 = vld [vmem:[%s1287_s28 + $0x14] sm:$0xff]  ;;  %v777_v41 = vld [vmem:[%s1287_s28 + $0x1c] sm:$0xff]  ;;  %v778_v43 = vld [vmem:[%s1287_s28 + $0x24] sm:$0xff] }
  0x1a   : > { %1156 = vmatmul.mubr.msk.f32.vlgmr.msra.gmra.mxu1 %vm219_vm0, %v199_v18  ;;  %1172 = vmatmul.mubr.msk.f32.vlgmr.msra.gmra.mxu0 %vm219_vm0, %v479_v19  ;;  %v630_v42 = vld [vmem:[%s1287_s28 + $0x23] sm:$0xff]  ;;  %v631_v44 = vld [vmem:[%s1287_s28 + $0x2b] sm:$0xff]  ;;  %v632_v46 = vld [vmem:[%s1287_s28 + $0x33] sm:$0xff] }
  0x1b   : > { %1184 = vmatpush3.msra.mxu1 %v1061_v16  ;;  %1200 = vmatpush3.msra.mxu0 %v1071_v17  ;;  %v779_v45 = vld [vmem:[%s1287_s28 + $0x2c] sm:$0xff]  ;;  %v780_v47 = vld [vmem:[%s1287_s28 + $0x34] sm:$0xff]  ;;  %v781_v49 = vld [vmem:[%s1287_s28 + $0x3c] sm:$0xff] }
  0x1c   : > { %1158 = vmatprep.mubr.msk.f32.mxu1 %vm219_vm0, %v200_v20  ;;  %1174 = vmatprep.mubr.msk.f32.mxu0 %vm219_vm0, %v480_v21  ;;  %v633_v48 = vld [vmem:[%s1287_s28 + $0x3b] sm:$0xff] }
  0x1d   : > { %1185 = vmatprep.subr.mxu1 %v1060_v22  ;;  %1201 = vmatprep.subr.mxu0 %v1070_v23  ;;  %v1390_v19 = vld [vmem:[%s1440_s2] ss:$0 sm:$0xff] }
  0x1e   : > { %1159 = vmatmul.mubr.msk.f32.gmra.mxu1 %vm219_vm0, %v201_v24  ;;  %1175 = vmatmul.mubr.msk.f32.gmra.mxu0 %vm219_vm0, %v481_v25 }
  0x1f   : > { %1161 = vmatprep.mubr.msk.f32.mxu1 %vm219_vm0, %v202_v26  ;;  %1177 = vmatprep.mubr.msk.f32.mxu0 %vm219_vm0, %v482_v27  ;;  %v1395_v27 = vld [vmem:[%s1441_s3] ss:$0 sm:$0xff] }
  0x20   : > { %1186 = vmatpush3.msra.mxu1 %v1060_v22  ;;  %1202 = vmatpush3.msra.mxu0 %v1070_v23 }
  0x22   : > { %1162 = vmatmul.mubr.msk.f32.gmra.mxu1 %vm219_vm0, %v203_v28  ;;  %1178 = vmatmul.mubr.msk.f32.gmra.mxu0 %vm219_vm0, %v483_v29 }
  0x23   : > { %1164 = vmatprep.mubr.msk.f32.mxu1 %vm219_vm0, %v204_v30  ;;  %1180 = vmatprep.mubr.msk.f32.mxu0 %vm219_vm0, %v484_v31 }
  0x26   : > { %1165 = vmatmul.mubr.msk.f32.gmra.mxu1 %vm219_vm0, %v205_v32  ;;  %1181 = vmatmul.mubr.msk.f32.gmra.mxu0 %vm219_vm0, %v485_v33 }
  0x27   : > { %1187 = vmatprep.mubr.msk.f32.mxu1 %vm219_vm0, %v626_v34  ;;  %1203 = vmatprep.mubr.msk.f32.mxu0 %vm219_vm0, %v774_v35 }
  0x2a   : > { %1188 = vmatmul.mubr.msk.f32.vlgmr.msra.gmra.mxu1 %vm219_vm0, %v627_v36  ;;  %1204 = vmatmul.mubr.msk.f32.vlgmr.msra.gmra.mxu0 %vm219_vm0, %v775_v37 }
  0x2b   : > { %1190 = vmatprep.mubr.msk.f32.mxu1 %vm219_vm0, %v628_v38  ;;  %1206 = vmatprep.mubr.msk.f32.mxu0 %vm219_vm0, %v776_v39 }
  0x2e   : > { %1191 = vmatmul.mubr.msk.f32.gmra.mxu1 %vm219_vm0, %v629_v40  ;;  %1207 = vmatmul.mubr.msk.f32.gmra.mxu0 %vm219_vm0, %v777_v41 }
  0x2f   : > { %1193 = vmatprep.mubr.msk.f32.mxu1 %vm219_vm0, %v630_v42  ;;  %1209 = vmatprep.mubr.msk.f32.mxu0 %vm219_vm0, %v778_v43 }
  0x32   : > { %1194 = vmatmul.mubr.msk.f32.gmra.mxu1 %vm219_vm0, %v631_v44  ;;  %1210 = vmatmul.mubr.msk.f32.gmra.mxu0 %vm219_vm0, %v779_v45 }
  0x33   : > { %1196 = vmatprep.mubr.msk.f32.mxu1 %vm219_vm0, %v632_v46  ;;  %1212 = vmatprep.mubr.msk.f32.mxu0 %vm219_vm0, %v780_v47 }
  0x36   : > { %1197 = vmatmul.mubr.msk.f32.gmra.mxu1 %vm219_vm0, %v633_v48  ;;  %1213 = vmatmul.mubr.msk.f32.gmra.mxu0 %vm219_vm0, %v781_v49 }
  0xd2   : > { %v1141_v50 = vpop.f32.mrf.mxu0  ;;  %v1147_v51 = vpop.f32.mrf.mxu1 }
  0xd4   : > { %v310_v52 = vpop.f32.mrf.mxu0  ;;  %v330_v53 = vpop.f32.mrf.mxu1 }
  0xd6   : > { %v1144_v54 = vpop.f32.mrf.mxu0  ;;  %v1150_v55 = vpop.f32.mrf.mxu1 }
  0xd8   : > { %v320_v56 = vpop.f32.mrf.mxu0  ;;  %v340_v57 = vpop.f32.mrf.mxu1 }
  0xda   : > { %v1157_v58 = vpop.f32.mrf.mxu1  ;;  %v1173_v59 = vpop.f32.mrf.mxu0 }
  0xdb   : > { %v445_v6 = vadd.f32 %v1157_v58, %v1141_v50 }
  0xdc   : > { %v439_v60 = vpop.f32.mrf.mxu1  ;;  %v579_v61 = vpop.f32.mrf.mxu0 }
  0xdd   : > { %v440_v9 = vadd.f32 %v439_v60, %v310_v52  ;;  %v619_v12 = vadd.f32 %v1173_v59, %v445_v6 }
  0xde   : > { %v1160_v62 = vpop.f32.mrf.mxu1  ;;  %v1176_v63 = vpop.f32.mrf.mxu0 }
  0xdf   : > { %v455_v13 = vadd.f32 %v1160_v62, %v1144_v54  ;;  %v618_v16 = vadd.f32 %v579_v61, %v440_v9 }
  0xe0   : > { %v449_v0 = vpop.f32.mrf.mxu1  ;;  %v589_v1 = vpop.f32.mrf.mxu0 }
  0xe1   : > { %v450_v17 = vadd.f32 %v449_v0, %v320_v56  ;;  %v621_v22 = vadd.f32 %v1176_v63, %v455_v13 }
  0xe2   : > { %v1163_v2 = vpop.f32.mrf.mxu1  ;;  %v1179_v3 = vpop.f32.mrf.mxu0 }
  0xe3   : > { %v465_v25 = vadd.f32 %v1163_v2, %v1147_v51  ;;  %v620_v30 = vadd.f32 %v589_v1, %v450_v17 }
  0xe4   : > { %v459_v4 = vpop.f32.mrf.mxu1  ;;  %v599_v5 = vpop.f32.mrf.mxu0 }
  0xe5   : > { %v460_v26 = vadd.f32 %v459_v4, %v330_v53  ;;  %v623_v41 = vadd.f32 %v1179_v3, %v465_v25 }
  0xe6   : > { %v1166_v7 = vpop.f32.mrf.mxu1  ;;  %v1182_v8 = vpop.f32.mrf.mxu0 }
  0xe7   : > { %v475_v34 = vadd.f32 %v1166_v7, %v1150_v55  ;;  %v622_v42 = vadd.f32 %v599_v5, %v460_v26 }
  0xe8   : > { %v469_v10 = vpop.f32.mrf.mxu1  ;;  %v609_v11 = vpop.f32.mrf.mxu0 }
  0xe9   : > { %v470_v43 = vadd.f32 %v469_v10, %v340_v57  ;;  %v625_v50 = vadd.f32 %v1182_v8, %v475_v34 }
  0xea   : > { %v1189_v14 = vpop.f32.mrf.mxu1  ;;  %v1205_v15 = vpop.f32.mrf.mxu0 }
  0xeb   : > { %v767_v18 = vadd.f32 %v1189_v14, %v619_v12  ;;  %v624_v58 = vadd.f32 %v609_v11, %v470_v43 }
  0xec   : > { %v727_v20 = vpop.f32.mrf.mxu1  ;;  %v875_v21 = vpop.f32.mrf.mxu0 }
  0xed   : > { %v915_v23 = vadd.f32 %v1205_v15, %v767_v18  ;;  %v766_v24 = vadd.f32 %v727_v20, %v618_v16 }
  0xee   : > { %v1192_v28 = vpop.f32.mrf.mxu1  ;;  %v1208_v29 = vpop.f32.mrf.mxu0 }
  0xef   : > { %v930_v31 = vmul.f32 %v1390_v19, %v915_v23  ;;  %v914_v32 = vadd.f32 %v875_v21, %v766_v24  ;;  %v769_v33 = vadd.f32 %v1192_v28, %v621_v22 }
  0xf0   : > { %v737_v35 = vpop.f32.mrf.mxu1  ;;  %v885_v36 = vpop.f32.mrf.mxu0 }
  0xf1   : > { %v945_v37 = vadd.f32 %v1395_v27, %v930_v31  ;;  %v929_v38 = vmul.f32 %v1390_v19, %v914_v32  ;;  %v917_v39 = vadd.f32 %v1208_v29, %v769_v33  ;;  %v768_v40 = vadd.f32 %v737_v35, %v620_v30 }
  0xf2   : > { %v1195_v44 = vpop.f32.mrf.mxu1  ;;  %v1211_v45 = vpop.f32.mrf.mxu0 }
  0xf3   : > { %v953_v46 = vmax.f32 %v945_v37, 0.0  ;;  %v944_v47 = vadd.f32 %v1395_v27, %v929_v38  ;;  %v932_v48 = vmul.f32 %v1390_v19, %v917_v39  ;;  %v916_v49 = vadd.f32 %v885_v36, %v768_v40 }
  0xf4   : > { %v771_v51 = vadd.f32 %v1195_v44, %v623_v41  ;;  %v747_v52 = vpop.f32.mrf.mxu1  ;;  %v895_v53 = vpop.f32.mrf.mxu0 }
  0xf5   : > { %962 = vst.msk [vmem:[%s1404_s16 + $0x8] sm:$0xff] %vm960_vm1, %v953_v46  ;;  %v952_v54 = vmax.f32 %v944_v47, 0.0  ;;  %v947_v55 = vadd.f32 %v1395_v27, %v932_v48  ;;  %v931_v56 = vmul.f32 %v1390_v19, %v916_v49  ;;  %v770_v57 = vadd.f32 %v747_v52, %v622_v42 }
  0xf6   : > { %v919_v59 = vadd.f32 %v1211_v45, %v771_v51  ;;  %v1198_v60 = vpop.f32.mrf.mxu1  ;;  %v1214_v61 = vpop.f32.mrf.mxu0 }
  0xf7   : > { %961 = vst.msk [vmem:[%s1404_s16] sm:$0xff] %vm960_vm1, %v952_v54  ;;  %v955_v62 = vmax.f32 %v947_v55, 0.0  ;;  %v946_v63 = vadd.f32 %v1395_v27, %v931_v56  ;;  %v918_v0 = vadd.f32 %v895_v53, %v770_v57  ;;  %v773_v1 = vadd.f32 %v1198_v60, %v625_v50 }
  0xf8   : > { %v934_v2 = vmul.f32 %v1390_v19, %v919_v59  ;;  %v757_v3 = vpop.f32.mrf.mxu1  ;;  %v905_v9 = vpop.f32.mrf.mxu0 }
  0xf9   : > { %964 = vst.msk [vmem:[%s1404_s16 + $0x18] sm:$0xff] %vm960_vm1, %v955_v62  ;;  %v954_v4 = vmax.f32 %v946_v63, 0.0  ;;  %v933_v5 = vmul.f32 %v1390_v19, %v918_v0  ;;  %v921_v6 = vadd.f32 %v1214_v61, %v773_v1  ;;  %v772_v7 = vadd.f32 %v757_v3, %v624_v58 }
  0xfa   : > { %v949_v8 = vadd.f32 %v1395_v27, %v934_v2 }
  0xfb   : > { %963 = vst.msk [vmem:[%s1404_s16 + $0x10] sm:$0xff] %vm960_vm1, %v954_v4  ;;  %v948_v10 = vadd.f32 %v1395_v27, %v933_v5  ;;  %v936_v11 = vmul.f32 %v1390_v19, %v921_v6  ;;  %v920_v12 = vadd.f32 %v905_v9, %v772_v7 }
  0xfc   : > { %v957_v13 = vmax.f32 %v949_v8, 0.0 }
  0xfd   : > { %v956_v14 = vmax.f32 %v948_v10, 0.0  ;;  %v951_v15 = vadd.f32 %v1395_v27, %v936_v11  ;;  %v935_v16 = vmul.f32 %v1390_v19, %v920_v12 }
  0xfe   : > { %966 = vst.msk [vmem:[%s1404_s16 + $0x28] sm:$0xff] %vm960_vm1, %v957_v13 }
  0xff   : > { %965 = vst.msk [vmem:[%s1404_s16 + $0x20] sm:$0xff] %vm960_vm1, %v956_v14  ;;  %v959_v17 = vmax.f32 %v951_v15, 0.0  ;;  %v950_v18 = vadd.f32 %v1395_v27, %v935_v16 }
 0x101   : > { %968 = vst.msk [vmem:[%s1404_s16 + $0x38] sm:$0xff] %vm960_vm1, %v959_v17  ;;  %v958_v20 = vmax.f32 %v950_v18, 0.0 }
 0x103   : > { %967 = vst.msk [vmem:[%s1404_s16 + $0x30] sm:$0xff] %vm960_vm1, %v958_v20 }
 0x104 PF: > { %s14_s15 = sadd.s32 1, %s1234_s15  }
 0x105   : > { %p11_p4 = scmp.ge.s32.totalorder %s14_s15, 4  }
 0x107   :  { %13 = sbr.rel (!%p11_p4) target bundleno = 1 (0x1), region = 70 }

// kernel: _lambda_.7
= control target key start
LH: loop header
LB: loop body
LE: loop exit
PB: predicated region body
PF: predicated region fallthrough
CT: control target
= control target key end

     0   :  { %s1574_s13 = smov 0   ;;  %s1761_s0 = inlined_call_operand.vmem [shape: f32[2,5,32,32], index: 0, kind: input, shape index: {}]   ;;  %s1762_s1 = inlined_call_operand.vmem [shape: f32[5,32,32], index: 1, kind: input, shape index: {}]   ;;  %s1763_s2 = inlined_call_operand.vmem [shape: f32[1,32], index: 2, kind: input, shape index: {}]   ;;  %s1764_s3 = inlined_call_operand.vmem [shape: f32[32,2], index: 3, kind: input, shape index: {}]   ;;  %s1765_s4 = inlined_call_operand.vmem [shape: f32[2,32], index: 4, kind: input, shape index: {}]   ;;  %s1766_s5 = inlined_call_operand.vmem [shape: f32[2,32,16], index: 5, kind: input, shape index: {}]   ;;  %s1767_s6 = inlined_call_operand.vmem [shape: f32[16,32], index: 6, kind: input, shape index: {}]   ;;  %s1768_s7 = inlined_call_operand.vmem [shape: f32[1,32], index: 7, kind: input, shape index: {}]   ;;  %s1769_s8 = inlined_call_operand.vmem [shape: f32[1,32], index: 8, kind: input, shape index: {}]   ;;  %s1770_s9 = inlined_call_operand.vmem [shape: f32[1,32], index: 9, kind: input, shape index: {}]   ;;  %s1771_s10 = inlined_call_operand.vmem [shape: f32[2,32,32], index: 10, kind: output, shape index: {}]  }
   0x1 LB: > { %s1271_s14 = sadd.s32 4294967295, %s1513_s13   ;;  %p1275_p0 = scmp.ge.s32.totalorder %s1513_s13, 1  ;;  %s1513_s13 = sphi %s1574_s13, %s20_s13  }
   0x2   : > { %p322_p1 = scmp.lt.s32.totalorder %s1513_s13, 3 }
   0x4   : > { %p323_p2 = pnand %p1275_p0, %p322_p1 }
   0x5   : > { %p365_p3 = scmp.lt.s32.totalorder (!%p323_p2), %s1271_s14, 1 }
   0x6   : > { %326 = sbr.rel (%p323_p2) target bundleno = 640 (0x280), region = 60 }
   0xb   : > { %v1288_v0 = vld [vmem:[%s1762_s1 + $0x38] sm:$0xff]  ;;  %v1287_v2 = vld [vmem:[%s1762_s1 + $0x30] sm:$0xff]  ;;  %v1286_v4 = vld [vmem:[%s1762_s1 + $0x28] sm:$0xff]  ;;  %s1773_s14 = smov (!%p365_p3, %s1271_s14), 1  ;;  %vm398_vm0 = vcmask 261120   ;;  %v1515_v40 = vmov 0.0  }
   0xc   : > { %v387_v1 = vld [vmem:[%s1762_s1 + $0x18] sm:$0xff]  ;;  %1397 = vmatprep.subr.mxu0 %v1288_v0  ;;  %v386_v3 = vld [vmem:[%s1762_s1 + $0x10] sm:$0xff]  ;;  %v385_v5 = vld [vmem:[%s1762_s1 + $0x8] sm:$0xff]  ;;  %s1488_s11 = smul.u32 160, %s1773_s14  ;;  %vm1516_vm1 = vmmov 0   ;;  %s1344_s18 = sshll.u32 %s1773_s14, 5 }
   0xd   : > { %1411 = vmatprep.subr.mxu1 %v387_v1  ;;  %1398 = vmatpush3.msra.mxu0 %v1288_v0  ;;  %v1285_v6 = vld [vmem:[%s1762_s1 + $0x20] sm:$0xff]  ;;  %v1304_v12 = vld [vmem:[%s1762_s1 + $0x58] sm:$0xff]  ;;  %v1303_v15 = vld [vmem:[%s1762_s1 + $0x50] sm:$0xff]  ;;  %s374_s21 = scalar_lea.vmem %s1766_s5, %s1344_s18  ;;  %vm1065_vm2 = vcmask 130048   ;;  %s379_s19 = scalar_lea.vmem %s1771_s10, %s1344_s18 }
   0xe   : > { %1412 = vmatpush3.msra.mxu1 %v387_v1  ;;  %1399 = vmatprep.subr.mxu0 %v1287_v2  ;;  %v384_v7 = vld [vmem:[%s1762_s1] sm:$0xff]  ;;  %s1612_s16 = scalar_lea.vmem %s1761_s0, %s1488_s11  ;;  %v1316_v13 = vld [vmem:[%s1762_s1 + $0x78] sm:$0xff]  ;;  %v1302_v19 = vld [vmem:[%s1762_s1 + $0x48] sm:$0xff] }
   0xf   : > { %1413 = vmatprep.subr.mxu1 %v386_v3  ;;  %1400 = vmatpush3.msra.mxu0 %v1287_v2  ;;  %v1281_v8 = vld [vmem:[%s1612_s16 + $0x20] sm:$0xff]  ;;  %v1282_v10 = vld [vmem:[%s1612_s16 + $0x28] sm:$0xff]  ;;  %v1283_v14 = vld [vmem:[%s1612_s16 + $0x30] sm:$0xff] }
  0x10   : > { %1414 = vmatpush3.msra.mxu1 %v386_v3  ;;  %1401 = vmatprep.subr.mxu0 %v1286_v4  ;;  %v380_v9 = vld [vmem:[%s1612_s16] sm:$0xff]  ;;  %v381_v11 = vld [vmem:[%s1612_s16 + $0x8] sm:$0xff]  ;;  %v382_v16 = vld [vmem:[%s1612_s16 + $0x10] sm:$0xff] }
  0x11   : > { %1415 = vmatprep.subr.mxu1 %v385_v5  ;;  %1402 = vmatpush3.msra.mxu0 %v1286_v4  ;;  %v1284_v17 = vld [vmem:[%s1612_s16 + $0x38] sm:$0xff]  ;;  %v1315_v20 = vld [vmem:[%s1762_s1 + $0x70] sm:$0xff]  ;;  %v1301_v21 = vld [vmem:[%s1762_s1 + $0x40] sm:$0xff] }
  0x12   : > { %1416 = vmatpush3.msra.mxu1 %v385_v5  ;;  %1403 = vmatprep.subr.mxu0 %v1285_v6  ;;  %v383_v18 = vld [vmem:[%s1612_s16 + $0x18] sm:$0xff]  ;;  %v1314_v22 = vld [vmem:[%s1762_s1 + $0x68] sm:$0xff]  ;;  %v1297_v23 = vld [vmem:[%s1612_s16 + $0x40] sm:$0xff] }
  0x13   : > { %1417 = vmatprep.subr.mxu1 %v384_v7  ;;  %1404 = vmatpush3.msra.mxu0 %v1285_v6  ;;  %v1298_v24 = vld [vmem:[%s1612_s16 + $0x48] sm:$0xff]  ;;  %v1313_v25 = vld [vmem:[%s1762_s1 + $0x60] sm:$0xff]  ;;  %v1328_v26 = vld [vmem:[%s1762_s1 + $0x98] sm:$0xff] }
  0x14   : > { %1405 = vmatprep.mubr.msk.f32.mxu0 %vm398_vm0, %v1281_v8  ;;  %1418 = vmatpush3.msra.mxu1 %v384_v7  ;;  %v1309_v27 = vld [vmem:[%s1612_s16 + $0x60] sm:$0xff]  ;;  %v1310_v28 = vld [vmem:[%s1612_s16 + $0x68] sm:$0xff]  ;;  %v1327_v29 = vld [vmem:[%s1762_s1 + $0x90] sm:$0xff] }
  0x15   : > { %1419 = vmatprep.mubr.msk.f32.mxu1 %vm398_vm0, %v380_v9  ;;  %1406 = vmatmul.mubr.msk.f32.vlgmr.msra.gmra.mxu0 %vm398_vm0, %v1282_v10  ;;  %v1299_v30 = vld [vmem:[%s1612_s16 + $0x50] sm:$0xff]  ;;  %v1300_v32 = vld [vmem:[%s1612_s16 + $0x58] sm:$0xff]  ;;  %v1326_v33 = vld [vmem:[%s1762_s1 + $0x88] sm:$0xff] }
  0x16   : > { %1420 = vmatmul.mubr.msk.f32.vlgmr.msra.gmra.mxu1 %vm398_vm0, %v381_v11  ;;  %1425 = vmatprep.subr.mxu0 %v1304_v12  ;;  %v1311_v31 = vld [vmem:[%s1612_s16 + $0x70] sm:$0xff]  ;;  %v1312_v34 = vld [vmem:[%s1612_s16 + $0x78] sm:$0xff]  ;;  %v1325_v35 = vld [vmem:[%s1762_s1 + $0x80] sm:$0xff] }
  0x17   : > { %1439 = vmatprep.subr.mxu1 %v1316_v13  ;;  %1426 = vmatpush3.msra.mxu0 %v1304_v12  ;;  %v1321_v36 = vld [vmem:[%s1612_s16 + $0x80] sm:$0xff]  ;;  %v1322_v37 = vld [vmem:[%s1612_s16 + $0x88] sm:$0xff]  ;;  %v1323_v38 = vld [vmem:[%s1612_s16 + $0x90] sm:$0xff] }
  0x18   : > { %1408 = vmatprep.mubr.msk.f32.mxu0 %vm398_vm0, %v1283_v14  ;;  %1427 = vmatprep.subr.mxu0 %v1303_v15  ;;  %v1324_v39 = vld [vmem:[%s1612_s16 + $0x98] sm:$0xff]  ;;  %v954_v42 = vld [vmem:[%s1764_s3 + $0x10] sm:$0xff]  ;;  %v953_v43 = vld [vmem:[%s1764_s3 + $0x8] sm:$0xff] }
  0x19   : > { %1422 = vmatprep.mubr.msk.f32.mxu1 %vm398_vm0, %v382_v16  ;;  %1428 = vmatpush3.msra.mxu0 %v1303_v15  ;;  %v955_v41 = vld [vmem:[%s1764_s3 + $0x18] sm:$0xff]  ;;  %v952_v44 = vld [vmem:[%s1764_s3] sm:$0xff]  ;;  %v1705_v45 = vld [vmem:[%s1767_s6 + $0x8] sm:$0xff] }
  0x1a   : > { %1440 = vmatpush3.msra.mxu1 %v1316_v13  ;;  %1409 = vmatmul.mubr.msk.f32.gmra.mxu0 %vm398_vm0, %v1284_v17  ;;  %v1333_v10 = vld [vmem:[%s1763_s2] ss:$0 sm:$0xff] }
  0x1b   : > { %1423 = vmatmul.mubr.msk.f32.gmra.mxu1 %vm398_vm0, %v383_v18  ;;  %1429 = vmatprep.subr.mxu0 %v1302_v19 }
  0x1c   : > { %1441 = vmatprep.subr.mxu1 %v1315_v20  ;;  %1430 = vmatpush3.msra.mxu0 %v1302_v19 }
  0x1d   : > { %1442 = vmatpush3.msra.mxu1 %v1315_v20  ;;  %1431 = vmatprep.subr.mxu0 %v1301_v21 }
  0x1e   : > { %1443 = vmatprep.subr.mxu1 %v1314_v22  ;;  %1432 = vmatpush3.msra.mxu0 %v1301_v21 }
  0x1f   : > { %1433 = vmatprep.mubr.msk.f32.mxu0 %vm398_vm0, %v1297_v23  ;;  %1444 = vmatpush3.msra.mxu1 %v1314_v22 }
  0x20   : > { %1434 = vmatmul.mubr.msk.f32.vlgmr.msra.gmra.mxu0 %vm398_vm0, %v1298_v24  ;;  %1445 = vmatprep.subr.mxu1 %v1313_v25 }
  0x21   : > { %1453 = vmatprep.subr.mxu0 %v1328_v26  ;;  %1446 = vmatpush3.msra.mxu1 %v1313_v25 }
  0x22   : > { %1447 = vmatprep.mubr.msk.f32.mxu1 %vm398_vm0, %v1309_v27  ;;  %1454 = vmatpush3.msra.mxu0 %v1328_v26 }
  0x23   : > { %1448 = vmatmul.mubr.msk.f32.vlgmr.msra.gmra.mxu1 %vm398_vm0, %v1310_v28  ;;  %1455 = vmatprep.subr.mxu0 %v1327_v29 }
  0x24   : > { %1436 = vmatprep.mubr.msk.f32.mxu0 %vm398_vm0, %v1299_v30  ;;  %1456 = vmatpush3.msra.mxu0 %v1327_v29 }
  0x25   : > { %1450 = vmatprep.mubr.msk.f32.mxu1 %vm398_vm0, %v1311_v31  ;;  %1437 = vmatmul.mubr.msk.f32.gmra.mxu0 %vm398_vm0, %v1300_v32 }
  0x26   : > { %1457 = vmatprep.subr.mxu0 %v1326_v33  ;;  %1461 = vmatprep.mubr.msk.f32.mxu0 %vm398_vm0, %v1321_v36 }
  0x27   : > { %1458 = vmatpush3.msra.mxu0 %v1326_v33  ;;  %1451 = vmatmul.mubr.msk.f32.gmra.mxu1 %vm398_vm0, %v1312_v34 }
  0x28   : > { %1459 = vmatprep.subr.mxu0 %v1325_v35  ;;  %1467 = vmatprep.subr.mxu1 %v1515_v40 }
  0x29   : > { %1460 = vmatpush3.msra.mxu0 %v1325_v35  ;;  %1468 = vmatpush3.msra.mxu1 %v955_v41  ;;  %v1062_v41 = vld [vmem:[%s374_s21 + $0x18] sm:$0xff] }
  0x2a   : > { %1462 = vmatmul.mubr.msk.f32.vlgmr.msra.gmra.mxu0 %vm398_vm0, %v1322_v37  ;;  %1469 = vmatprep.subr.mxu1 %v1515_v40  ;;  %v1059_v37 = vld [vmem:[%s374_s21] sm:$0xff] }
  0x2b   : > { %1464 = vmatprep.mubr.msk.f32.mxu0 %vm398_vm0, %v1323_v38  ;;  %1470 = vmatpush3.msra.mxu1 %v954_v42  ;;  %v1063_v38 = vld [vmem:[%s1767_s6] sm:$0xff]  ;;  %v1517_v42 = vmov 0  }
  0x2c   : > { %1471 = vmatprep.subr.mxu1 %v1515_v40  ;;  %1475 = vmatprep.mubr.msk.f32.mxu1 %vm1516_vm1, %v1515_v40 }
  0x2d   : > { %1472 = vmatpush3.msra.mxu1 %v953_v43  ;;  %1501 = vset.pattern.permute.xlu0 %v1517_v42 }
  0x2e   : > { %1465 = vmatmul.mubr.msk.f32.gmra.mxu0 %vm398_vm0, %v1324_v39  ;;  %1473 = vmatprep.subr.mxu1 %v1515_v40  ;;  %v1060_v39 = vld [vmem:[%s374_s21 + $0x8] sm:$0xff]  ;;  %v1061_v40 = vld [vmem:[%s374_s21 + $0x10] sm:$0xff] }
  0x2f   : > { %1474 = vmatpush3.msra.mxu1 %v952_v44 }
  0x30   : > { %1478 = vmatprep.subr.mxu1 %v1705_v45 }
  0xd5   : > { %v1407_v46 = vpop.f32.mrf.mxu0 }
  0xd6   : > { %v1421_v47 = vpop.f32.mrf.mxu1 }
  0xd7   : > { %v477_v48 = vpop.f32.mrf.mxu0  ;;  %v580_v56 = vadd.f32 %v1421_v47, %v1407_v46  ;;  %v1518_v47 = vmov 1  }
  0xd8   : > { %v574_v49 = vpop.f32.mrf.mxu1 }
  0xd9   : > { %v575_v58 = vadd.f32 %v574_v49, %v477_v48  ;;  %v1038_v49 = vld [vmem:[%s1765_s4 + $0x1] sm:$0x1] }
  0xda   : > { %v1410_v50 = vpop.f32.mrf.mxu0 }
  0xdb   : > { %v1424_v51 = vpop.f32.mrf.mxu1 }
  0xdc   : > { %v487_v52 = vpop.f32.mrf.mxu0  ;;  %v590_v62 = vadd.f32 %v1424_v51, %v1410_v50 }
  0xdd   : > { %v584_v54 = vpop.f32.mrf.mxu1 }
  0xde   : > { %v585_v2 = vadd.f32 %v584_v54, %v487_v52 }
  0xe0   : > { %v1435_v53 = vpop.f32.mrf.mxu0 }
  0xe1   : > { %v701_v59 = vadd.f32 %v1435_v53, %v580_v56 }
  0xe2   : > { %v681_v55 = vpop.f32.mrf.mxu0 }
  0xe3   : > { %v1449_v57 = vpop.f32.mrf.mxu1  ;;  %v700_v63 = vadd.f32 %v681_v55, %v575_v58  ;;  %v1051_v58 = vlaneseq }
  0xe4   : > { %v812_v3 = vadd.f32 %v1449_v57, %v701_v59 }
  0xe5   : > { %v792_v60 = vpop.f32.mrf.mxu1  ;;  %v1438_v61 = vpop.f32.mrf.mxu0 }
  0xe6   : > { %v703_v4 = vadd.f32 %v1438_v61, %v590_v62  ;;  %v811_v6 = vadd.f32 %v792_v60, %v700_v63  ;;  %v1052_v60 = vshrl.u32 %v1051_v58, 7 }
  0xe7   : > { %v691_v0 = vpop.f32.mrf.mxu0  ;;  %v1452_v1 = vpop.f32.mrf.mxu1 }
  0xe8   : > { %v702_v7 = vadd.f32 %v691_v0, %v585_v2  ;;  %v814_v12 = vadd.f32 %v1452_v1, %v703_v4  ;;  %v1053_v62 = vsub.s32 0, %v1052_v60 }
  0xe9   : > { %v802_v9 = vpop.f32.mrf.mxu1 }
  0xea   : > { %v1463_v5 = vpop.f32.mrf.mxu0  ;;  %v813_v15 = vadd.f32 %v802_v9, %v702_v7 }
  0xeb   : > { %v923_v8 = vadd.f32 %v1463_v5, %v812_v3 }
  0xec   : > { %v903_v11 = vpop.f32.mrf.mxu0 }
  0xed   : > { %v922_v13 = vadd.f32 %v903_v11, %v811_v6  ;;  %v1711_v16 = vadd.f32 %v1333_v10, %v923_v8  ;;  %v1339_v6 = vld [vmem:[%s1768_s7] ss:$0 sm:$0xff] }
  0xee   : > { %v1466_v14 = vpop.f32.mrf.mxu0 }
  0xef   : > { %v1713_v17 = vadd.f32 %v1333_v10, %v922_v13  ;;  %v925_v18 = vadd.f32 %v1466_v14, %v814_v12  ;;  %v938_v22 = vsel %vm398_vm0, %v1711_v16, 0.0  ;;  %v1340_v12 = vld [vmem:[%s1769_s8] ss:$0 sm:$0xff] }
  0xf0   : > { %v913_v19 = vpop.f32.mrf.mxu0 }
  0xf1   : > { %v937_v20 = vsel %vm398_vm0, %v1713_v17, 0.0  ;;  %v924_v21 = vadd.f32 %v913_v19, %v813_v15  ;;  %v936_v23 = vadd.f32 %v1333_v10, %v925_v18 }
  0xf2   : > { %v939_v25 = vadd.f32 %v938_v22, %v937_v20 }
  0xf3   : > { %v935_v24 = vadd.f32 %v1333_v10, %v924_v21  ;;  %v942_v28 = vsel %vm398_vm0, %v936_v23, 0.0 }
  0xf5   : > { %v940_v26 = vsel %vm398_vm0, %v935_v24, 0.0 }
  0xf6   : > { %v941_v27 = vadd.f32 %v940_v26, %v939_v25 }
  0xf8   : > { %v943_v29 = vadd.f32 %v942_v28, %v941_v27 }
  0xfa   : > { %v944_v30 = vrot.slane %v943_v29, 4 }
  0xfc   : > { %v945_v31 = vadd.f32 %v944_v30, %v943_v29 }
  0xfe   : > { %v946_v32 = vrot.slane %v945_v31, 2 }
 0x100   : > { %v947_v33 = vadd.f32 %v946_v32, %v945_v31 }
 0x102   : > { %v948_v34 = vrot.slane %v947_v33, 1 }
 0x104   : > { %v949_v35 = vadd.f32 %v948_v34, %v947_v33 }
 0x106   : > { %v951_v36 = vmul.f32 0.03125, %v949_v35 }
 0x108   : > { %1476 = vmatmul.mubr.msk.f32.vlgmr.msra.gmra.mxu1 %vm398_vm0, %v951_v36 }
 0x109   : > { %1479 = vmatpush3.msra.mxu1 %v1705_v45  ;;  %1482 = vmatprep.mubr.msk.f32.mxu1 %vm1065_vm2, %v1059_v37  ;;  %v1030_v45 = vld [vmem:[%s1765_s4] sm:$0x1] }
 0x10a   : > { %1480 = vmatprep.subr.mxu1 %v1063_v38 }
 0x10b   : > { %1481 = vmatpush3.msra.mxu1 %v1063_v38 }
 0x10c   : > { %1483 = vmatmul.mubr.msk.f32.vlgmr.msra.gmra.mxu1 %vm1065_vm2, %v1060_v39 }
 0x10d   : > { %1485 = vmatprep.mubr.msk.f32.mxu1 %vm1065_vm2, %v1061_v40 }
 0x110   : > { %1486 = vmatmul.mubr.msk.f32.gmra.mxu1 %vm1065_vm2, %v1062_v41 }
 0x1c8   : > { %v1025_v43 = vpop.f32.mrf.mxu1 }
 0x1c9   : > { %v1029_v44 = vmax.f32 %v1025_v43, 0.0 }
 0x1ca   : > { %v1477_v46 = vpop.f32.mrf.mxu1 }
 0x1cb   : > { %1033 = vperm.xlu0 %1501, %v1029_v44  }
 0x1cc   : > { %v1484_v59 = vpop.f32.mrf.mxu1 }
 0x1ce   : > { %v1144_v61 = vpop.f32.mrf.mxu1 }
 0x1cf   : > { %1502 = vset.pattern.permute.xlu0 %v1518_v47 }
 0x1d0   : > { %1040 = vperm.xlu0 %1502, %v1029_v44   ;;  %v1487_v0 = vpop.f32.mrf.mxu1 }
 0x1d2   : > { %v1154_v7 = vpop.f32.mrf.mxu1 }
 0x246   : > { %v1034_v48 = vpop.permute.xlu0 %1033 }
 0x247   : > { %v1036_v51 = vmul.f32 %v1034_v48, %v1030_v45 }
 0x24b   : > { %v1041_v50 = vpop.permute.xlu0 %1040 }
 0x24c   : > { %v1043_v52 = vmul.f32 %v1041_v50, %v1038_v49 }
 0x24e   : > { %v1044_v53 = vadd.f32 %v1043_v52, %v1036_v51 }
 0x250   : > { %v1045_v54 = vsub.f32 0.0, %v1044_v53 }
 0x252   : > { %v1046_v55 = vmul.f32 1.442695, %v1045_v54 }
 0x254   : > { %1503 = vpow2.f32 %v1046_v55 }
 0x261   : > { %v1504_v56 = vpop.eup %1503 }
 0x262   : > { %v1048_v57 = vadd.f32 1.0, %v1504_v56 }
 0x264   : > { %1505 = vrcp.f32 %v1048_v57 }
 0x271   : > { %v1506_v63 = vpop.eup %1505 }
 0x272   : > { %v1054_v1 = vrot.slane %v1506_v63, %v1053_v62 }
 0x274   : > { %v1056_v2 = vmul.f32 %v1054_v1, %v1711_v16  ;;  %v1055_v3 = vmul.f32 %v1054_v1, %v1713_v17  ;;  %v1058_v4 = vmul.f32 %v1054_v1, %v936_v23  ;;  %v1057_v5 = vmul.f32 %v1054_v1, %v935_v24  ;;  %v1341_v17 = vld [vmem:[%s1770_s9] ss:$0 sm:$0xff] }
 0x276   : > { %v1164_v8 = vadd.f32 %v1484_v59, %v1056_v2  ;;  %v1163_v9 = vadd.f32 %v1144_v61, %v1055_v3  ;;  %v1166_v10 = vadd.f32 %v1487_v0, %v1058_v4  ;;  %v1165_v11 = vadd.f32 %v1154_v7, %v1057_v5 }
 0x278   : > { %v1175_v13 = vadd.f32 %v1339_v6, %v1164_v8  ;;  %v1174_v14 = vadd.f32 %v1339_v6, %v1163_v9  ;;  %v1177_v15 = vadd.f32 %v1339_v6, %v1166_v10  ;;  %v1176_v16 = vadd.f32 %v1339_v6, %v1165_v11 }
 0x27a   : > { %v1186_v18 = vmul.f32 %v1340_v12, %v1175_v13  ;;  %v1185_v19 = vmul.f32 %v1340_v12, %v1174_v14  ;;  %v1188_v20 = vmul.f32 %v1340_v12, %v1177_v15  ;;  %v1187_v21 = vmul.f32 %v1340_v12, %v1176_v16 }
 0x27c   : > { %v1197_v22 = vadd.f32 %v1341_v17, %v1186_v18  ;;  %v1196_v23 = vadd.f32 %v1341_v17, %v1185_v19  ;;  %v1199_v24 = vadd.f32 %v1341_v17, %v1188_v20  ;;  %v1198_v25 = vadd.f32 %v1341_v17, %v1187_v21 }
 0x27e   : > { %1201 = vst.msk [vmem:[%s379_s19 + $0x8] sm:$0xff] %vm398_vm0, %v1197_v22  ;;  %1200 = vst.msk [vmem:[%s379_s19] sm:$0xff] %vm398_vm0, %v1196_v23 }
 0x27f   : > { %1203 = vst.msk [vmem:[%s379_s19 + $0x18] sm:$0xff] %vm398_vm0, %v1199_v24  ;;  %1202 = vst.msk [vmem:[%s379_s19 + $0x10] sm:$0xff] %vm398_vm0, %v1198_v25 }
 0x280 PF: > { %s20_s13 = sadd.s32 1, %s1513_s13  }
 0x281   : > { %p17_p4 = scmp.ge.s32.totalorder %s20_s13, 4  }
 0x283   :  { %19 = sbr.rel (!%p17_p4) target bundleno = 1 (0x1), region = 101 }

// kernel: _lambda_.8
= control target key start
LH: loop header
LB: loop body
LE: loop exit
PB: predicated region body
PF: predicated region fallthrough
CT: control target
= control target key end

     0   :  { %s1034_s15 = smov 0   ;;  %s1167_s0 = inlined_call_operand.vmem [shape: f32[2,36,32], index: 0, kind: input, shape index: {}]   ;;  %s1168_s1 = inlined_call_operand.vmem [shape: f32[5,32,32], index: 1, kind: input, shape index: {}]   ;;  %s1169_s2 = inlined_call_operand.vmem [shape: f32[1,32], index: 2, kind: input, shape index: {}]   ;;  %s1170_s3 = inlined_call_operand.vmem [shape: f32[1,32], index: 3, kind: input, shape index: {}]   ;;  %s1171_s4 = inlined_call_operand.vmem [shape: f32[2,32,32], index: 4, kind: output, shape index: {}]  }
   0x1 LB: > { %s825_s16 = sadd.s32 4294967295, %s1007_s15   ;;  %p829_p0 = scmp.ge.s32.totalorder %s1007_s15, 1  ;;  %s1007_s15 = sphi %s1034_s15, %s14_s15  }
   0x2   : > { %p162_p1 = scmp.lt.s32.totalorder %s1007_s15, 3 }
   0x4   : > { %p163_p2 = pnand %p829_p0, %p162_p1 }
   0x5   : > { %p188_p3 = scmp.lt.s32.totalorder (!%p163_p2), %s825_s16, 1 }
   0x6   : > { %166 = sbr.rel (%p163_p2) target bundleno = 250 (0xfa), region = 36 }
   0xb   : > { %v836_v0 = vld [vmem:[%s1168_s1 + $0x38] sm:$0xff]  ;;  %v835_v2 = vld [vmem:[%s1168_s1 + $0x30] sm:$0xff]  ;;  %v834_v4 = vld [vmem:[%s1168_s1 + $0x28] sm:$0xff]  ;;  %s1173_s16 = smov (!%p188_p3, %s825_s16), 1  ;;  %vm215_vm0 = vcmask 261120  }
   0xc   : > { %v205_v1 = vld [vmem:[%s1168_s1 + $0x18] sm:$0xff]  ;;  %914 = vmatprep.subr.mxu0 %v836_v0  ;;  %v204_v3 = vld [vmem:[%s1168_s1 + $0x10] sm:$0xff]  ;;  %v203_v5 = vld [vmem:[%s1168_s1 + $0x8] sm:$0xff]  ;;  %s992_s7 = smul.u32 40, %s1173_s16  ;;  %s873_s17 = sshll.u32 %s1173_s16, 5 }
   0xd   : > { %928 = vmatprep.subr.mxu1 %v205_v1  ;;  %915 = vmatpush3.msra.mxu0 %v836_v0  ;;  %v833_v6 = vld [vmem:[%s1168_s1 + $0x20] sm:$0xff]  ;;  %v848_v12 = vld [vmem:[%s1168_s1 + $0x58] sm:$0xff]  ;;  %v847_v14 = vld [vmem:[%s1168_s1 + $0x50] sm:$0xff]  ;;  %s197_s20 = scalar_lea.vmem %s1171_s4, %s873_s17 }
   0xe   : > { %929 = vmatpush3.msra.mxu1 %v205_v1  ;;  %916 = vmatprep.subr.mxu0 %v835_v2  ;;  %v202_v7 = vld [vmem:[%s1168_s1] sm:$0xff]  ;;  %s1072_s10 = scalar_lea.vmem %s1167_s0, %s992_s7  ;;  %v856_v13 = vld [vmem:[%s1168_s1 + $0x78] sm:$0xff]  ;;  %v855_v15 = vld [vmem:[%s1168_s1 + $0x70] sm:$0xff] }
   0xf   : > { %930 = vmatprep.subr.mxu1 %v204_v3  ;;  %917 = vmatpush3.msra.mxu0 %v835_v2  ;;  %v206_v8 = vld [vmem:[%s1072_s10 + $0x1] sm:$0xff]  ;;  %v207_v10 = vld [vmem:[%s1072_s10 + $0x9] sm:$0xff]  ;;  %v208_v16 = vld [vmem:[%s1072_s10 + $0x11] sm:$0xff] }
  0x10   : > { %931 = vmatpush3.msra.mxu1 %v204_v3  ;;  %918 = vmatprep.subr.mxu0 %v834_v4  ;;  %v198_v9 = vld [vmem:[%s1072_s10] sm:$0xff]  ;;  %v199_v11 = vld [vmem:[%s1072_s10 + $0x8] sm:$0xff]  ;;  %v200_v17 = vld [vmem:[%s1072_s10 + $0x10] sm:$0xff] }
  0x11   : > { %932 = vmatprep.subr.mxu1 %v203_v5  ;;  %919 = vmatpush3.msra.mxu0 %v834_v4  ;;  %v209_v18 = vld [vmem:[%s1072_s10 + $0x19] sm:$0xff]  ;;  %v846_v20 = vld [vmem:[%s1168_s1 + $0x48] sm:$0xff]  ;;  %v863_v29 = vld [vmem:[%s1168_s1 + $0x90] sm:$0xff] }
  0x12   : > { %933 = vmatpush3.msra.mxu1 %v203_v5  ;;  %920 = vmatprep.subr.mxu0 %v833_v6  ;;  %v201_v19 = vld [vmem:[%s1072_s10 + $0x18] sm:$0xff]  ;;  %v854_v21 = vld [vmem:[%s1168_s1 + $0x68] sm:$0xff]  ;;  %v845_v22 = vld [vmem:[%s1168_s1 + $0x40] sm:$0xff] }
  0x13   : > { %934 = vmatprep.subr.mxu1 %v202_v7  ;;  %921 = vmatpush3.msra.mxu0 %v833_v6  ;;  %v853_v23 = vld [vmem:[%s1168_s1 + $0x60] sm:$0xff]  ;;  %v411_v26 = vld [vmem:[%s1072_s10 + $0xa] sm:$0xff]  ;;  %v864_v28 = vld [vmem:[%s1168_s1 + $0x98] sm:$0xff] }
  0x14   : > { %922 = vmatprep.mubr.msk.f32.mxu0 %vm215_vm0, %v206_v8  ;;  %935 = vmatpush3.msra.mxu1 %v202_v7  ;;  %v410_v24 = vld [vmem:[%s1072_s10 + $0x2] sm:$0xff]  ;;  %v521_v27 = vld [vmem:[%s1072_s10 + $0xb] sm:$0xff]  ;;  %v522_v31 = vld [vmem:[%s1072_s10 + $0x13] sm:$0xff] }
  0x15   : > { %936 = vmatprep.mubr.msk.f32.mxu1 %vm215_vm0, %v198_v9  ;;  %923 = vmatmul.mubr.msk.f32.vlgmr.msra.gmra.mxu0 %vm215_vm0, %v207_v10  ;;  %v520_v25 = vld [vmem:[%s1072_s10 + $0x3] sm:$0xff]  ;;  %v412_v30 = vld [vmem:[%s1072_s10 + $0x12] sm:$0xff]  ;;  %v413_v32 = vld [vmem:[%s1072_s10 + $0x1a] sm:$0xff] }
  0x16   : > { %937 = vmatmul.mubr.msk.f32.vlgmr.msra.gmra.mxu1 %vm215_vm0, %v199_v11  ;;  %942 = vmatprep.subr.mxu0 %v848_v12  ;;  %v523_v33 = vld [vmem:[%s1072_s10 + $0x1b] sm:$0xff]  ;;  %v862_v34 = vld [vmem:[%s1168_s1 + $0x88] sm:$0xff] }
  0x17   : > { %956 = vmatprep.subr.mxu1 %v856_v13  ;;  %943 = vmatpush3.msra.mxu0 %v848_v12  ;;  %v861_v35 = vld [vmem:[%s1168_s1 + $0x80] sm:$0xff]  ;;  %v632_v37 = vld [vmem:[%s1072_s10 + $0x14] sm:$0xff]  ;;  %v631_v38 = vld [vmem:[%s1072_s10 + $0xc] sm:$0xff] }
  0x18   : > { %957 = vmatpush3.msra.mxu1 %v856_v13  ;;  %944 = vmatprep.subr.mxu0 %v847_v14  ;;  %v630_v36 = vld [vmem:[%s1072_s10 + $0x4] sm:$0xff]  ;;  %v633_v39 = vld [vmem:[%s1072_s10 + $0x1c] sm:$0xff] }
  0x19   : > { %958 = vmatprep.subr.mxu1 %v855_v15  ;;  %925 = vmatprep.mubr.msk.f32.mxu0 %vm215_vm0, %v208_v16  ;;  %v869_v4 = vld [vmem:[%s1169_s2] ss:$0 sm:$0xff] }
  0x1a   : > { %939 = vmatprep.mubr.msk.f32.mxu1 %vm215_vm0, %v200_v17  ;;  %945 = vmatpush3.msra.mxu0 %v847_v14  ;;  %v870_v9 = vld [vmem:[%s1170_s3] ss:$0 sm:$0xff] }
  0x1b   : > { %959 = vmatpush3.msra.mxu1 %v855_v15  ;;  %926 = vmatmul.mubr.msk.f32.gmra.mxu0 %vm215_vm0, %v209_v18 }
  0x1c   : > { %940 = vmatmul.mubr.msk.f32.gmra.mxu1 %vm215_vm0, %v201_v19  ;;  %946 = vmatprep.subr.mxu0 %v846_v20 }
  0x1d   : > { %960 = vmatprep.subr.mxu1 %v854_v21  ;;  %947 = vmatpush3.msra.mxu0 %v846_v20 }
  0x1e   : > { %961 = vmatpush3.msra.mxu1 %v854_v21  ;;  %948 = vmatprep.subr.mxu0 %v845_v22 }
  0x1f   : > { %962 = vmatprep.subr.mxu1 %v853_v23  ;;  %949 = vmatpush3.msra.mxu0 %v845_v22 }
  0x20   : > { %950 = vmatprep.mubr.msk.f32.mxu0 %vm215_vm0, %v410_v24  ;;  %963 = vmatpush3.msra.mxu1 %v853_v23 }
  0x21   : > { %964 = vmatprep.mubr.msk.f32.mxu1 %vm215_vm0, %v520_v25  ;;  %951 = vmatmul.mubr.msk.f32.vlgmr.msra.gmra.mxu0 %vm215_vm0, %v411_v26 }
  0x22   : > { %965 = vmatmul.mubr.msk.f32.vlgmr.msra.gmra.mxu1 %vm215_vm0, %v521_v27  ;;  %970 = vmatprep.subr.mxu0 %v864_v28 }
  0x23   : > { %984 = vmatprep.subr.mxu1 %v864_v28  ;;  %971 = vmatpush3.msra.mxu0 %v864_v28 }
  0x24   : > { %988 = vmatpush3.msra.mxu1 %v864_v28  ;;  %972 = vmatprep.subr.mxu0 %v863_v29 }
  0x25   : > { %985 = vmatprep.subr.mxu1 %v863_v29  ;;  %953 = vmatprep.mubr.msk.f32.mxu0 %vm215_vm0, %v412_v30 }
  0x26   : > { %967 = vmatprep.mubr.msk.f32.mxu1 %vm215_vm0, %v522_v31  ;;  %973 = vmatpush3.msra.mxu0 %v863_v29 }
  0x27   : > { %989 = vmatpush3.msra.mxu1 %v863_v29  ;;  %954 = vmatmul.mubr.msk.f32.gmra.mxu0 %vm215_vm0, %v413_v32 }
  0x28   : > { %968 = vmatmul.mubr.msk.f32.gmra.mxu1 %vm215_vm0, %v523_v33  ;;  %974 = vmatprep.subr.mxu0 %v862_v34 }
  0x29   : > { %986 = vmatprep.subr.mxu1 %v862_v34  ;;  %975 = vmatpush3.msra.mxu0 %v862_v34 }
  0x2a   : > { %990 = vmatpush3.msra.mxu1 %v862_v34  ;;  %976 = vmatprep.subr.mxu0 %v861_v35 }
  0x2b   : > { %987 = vmatprep.subr.mxu1 %v861_v35  ;;  %977 = vmatpush3.msra.mxu0 %v861_v35 }
  0x2c   : > { %991 = vmatpush3.msra.mxu1 %v861_v35  ;;  %978 = vmatprep.mubr.msk.f32.mxu0 %vm215_vm0, %v630_v36 }
  0x2d   : > { %981 = vmatprep.mubr.msk.f32.mxu1 %vm215_vm0, %v632_v37  ;;  %979 = vmatmul.mubr.msk.f32.vlgmr.msra.gmra.mxu0 %vm215_vm0, %v631_v38 }
  0x2e   : > { %982 = vmatmul.mubr.msk.f32.vlgmr.msra.gmra.mxu1 %vm215_vm0, %v633_v39 }
  0xd5   : > { %v924_v40 = vpop.f32.mrf.mxu0 }
  0xd6   : > { %v938_v41 = vpop.f32.mrf.mxu1 }
  0xd7   : > { %v294_v42 = vpop.f32.mrf.mxu0  ;;  %v397_v52 = vadd.f32 %v938_v41, %v924_v40 }
  0xd8   : > { %v391_v43 = vpop.f32.mrf.mxu1 }
  0xd9   : > { %v392_v56 = vadd.f32 %v391_v43, %v294_v42 }
  0xdb   : > { %v927_v44 = vpop.f32.mrf.mxu0 }
  0xdc   : > { %v941_v45 = vpop.f32.mrf.mxu1 }
  0xdd   : > { %v304_v46 = vpop.f32.mrf.mxu0  ;;  %v407_v53 = vadd.f32 %v941_v45, %v927_v44 }
  0xde   : > { %v401_v47 = vpop.f32.mrf.mxu1 }
  0xdf   : > { %v402_v57 = vadd.f32 %v401_v47, %v304_v46 }
  0xe1   : > { %v952_v48 = vpop.f32.mrf.mxu0 }
  0xe2   : > { %v966_v49 = vpop.f32.mrf.mxu1  ;;  %v517_v58 = vadd.f32 %v952_v48, %v397_v52 }
  0xe3   : > { %v497_v50 = vpop.f32.mrf.mxu0 }
  0xe4   : > { %v607_v51 = vpop.f32.mrf.mxu1  ;;  %v516_v62 = vadd.f32 %v497_v50, %v392_v56  ;;  %v627_v1 = vadd.f32 %v966_v49, %v517_v58 }
  0xe6   : > { %v626_v6 = vadd.f32 %v607_v51, %v516_v62 }
  0xe7   : > { %v955_v54 = vpop.f32.mrf.mxu0 }
  0xe8   : > { %v969_v55 = vpop.f32.mrf.mxu1  ;;  %v519_v59 = vadd.f32 %v955_v54, %v407_v53 }
  0xe9   : > { %v507_v60 = vpop.f32.mrf.mxu0 }
  0xea   : > { %v617_v61 = vpop.f32.mrf.mxu1  ;;  %v629_v63 = vadd.f32 %v969_v55, %v519_v59  ;;  %v518_v0 = vadd.f32 %v507_v60, %v402_v57 }
  0xec   : > { %v628_v2 = vadd.f32 %v617_v61, %v518_v0 }
  0xed   : > { %v980_v3 = vpop.f32.mrf.mxu0 }
  0xee   : > { %v983_v5 = vpop.f32.mrf.mxu1  ;;  %v737_v7 = vadd.f32 %v980_v3, %v627_v1 }
  0xef   : > { %v739_v8 = vadd.f32 %v983_v5, %v629_v63  ;;  %v717_v10 = vpop.f32.mrf.mxu0 }
  0xf0   : > { %v727_v11 = vpop.f32.mrf.mxu1  ;;  %v748_v12 = vmul.f32 %v869_v4, %v737_v7  ;;  %v736_v14 = vadd.f32 %v717_v10, %v626_v6 }
  0xf1   : > { %v750_v13 = vmul.f32 %v869_v4, %v739_v8  ;;  %v738_v15 = vadd.f32 %v727_v11, %v628_v2 }
  0xf2   : > { %v759_v16 = vadd.f32 %v870_v9, %v748_v12  ;;  %v747_v18 = vmul.f32 %v869_v4, %v736_v14 }
  0xf3   : > { %v761_v17 = vadd.f32 %v870_v9, %v750_v13  ;;  %v749_v19 = vmul.f32 %v869_v4, %v738_v15 }
  0xf4   : > { %v763_v20 = vmax.f32 %v759_v16, 0.0  ;;  %v758_v22 = vadd.f32 %v870_v9, %v747_v18 }
  0xf5   : > { %v765_v21 = vmax.f32 %v761_v17, 0.0  ;;  %v760_v23 = vadd.f32 %v870_v9, %v749_v19 }
  0xf6   : > { %767 = vst.msk [vmem:[%s197_s20 + $0x8] sm:$0xff] %vm215_vm0, %v763_v20  ;;  %v762_v24 = vmax.f32 %v758_v22, 0.0 }
  0xf7   : > { %769 = vst.msk [vmem:[%s197_s20 + $0x18] sm:$0xff] %vm215_vm0, %v765_v21  ;;  %v764_v25 = vmax.f32 %v760_v23, 0.0 }
  0xf8   : > { %766 = vst.msk [vmem:[%s197_s20] sm:$0xff] %vm215_vm0, %v762_v24 }
  0xf9   : > { %768 = vst.msk [vmem:[%s197_s20 + $0x10] sm:$0xff] %vm215_vm0, %v764_v25 }
  0xfa PF: > { %s14_s15 = sadd.s32 1, %s1007_s15  }
  0xfb   : > { %p11_p4 = scmp.ge.s32.totalorder %s14_s15, 4  }
  0xfd   :  { %13 = sbr.rel (!%p11_p4) target bundleno = 1 (0x1), region = 70 }

// kernel: _lambda_.9
= control target key start
LH: loop header
LB: loop body
LE: loop exit
PB: predicated region body
PF: predicated region fallthrough
CT: control target
= control target key end

     0   :  { %15 = vsyncpa [#allocation3], 0  ;;  %s1965_s0 = inlined_call_operand.vmem [shape: f32[2,5,32,32], index: 0, kind: input, shape index: {}]   ;;  %s1966_s1 = inlined_call_operand.vmem [shape: f32[5,32,32], index: 1, kind: input, shape index: {}]   ;;  %s1967_s2 = inlined_call_operand.vmem [shape: f32[1,32], index: 2, kind: input, shape index: {}]   ;;  %s1968_s3 = inlined_call_operand.vmem [shape: f32[32,2], index: 3, kind: input, shape index: {}]   ;;  %s1969_s4 = inlined_call_operand.vmem [shape: f32[2,32], index: 4, kind: input, shape index: {}]   ;;  %s1970_s5 = inlined_call_operand.vmem [shape: f32[2,32,32], index: 5, kind: input, shape index: {}]   ;;  %s1971_s6 = inlined_call_operand.vmem [shape: f32[32,32], index: 6, kind: input, shape index: {}]   ;;  %s1972_s7 = inlined_call_operand.vmem [shape: f32[1,32], index: 7, kind: input, shape index: {}]   ;;  %s1973_s8 = inlined_call_operand.vmem [shape: f32[1,32], index: 8, kind: input, shape index: {}]   ;;  %s1974_s9 = inlined_call_operand.vmem [shape: f32[1,32], index: 9, kind: input, shape index: {}]   ;;  %s1975_s10 = inlined_call_operand.hbm [shape: f32[2,32,32], index: 10, kind: output, shape index: {}]  }
   0x1   :  { %17 = vsyncpa [#allocation3 + $0x1], 0  ;;  %s1695_s13 = smov 0   ;;  %s1697_s14 = smov 0  }
   0x2   :  { %s1699_s15 = smov 0   ;;  %s1701_s16 = smov 0  }
   0x3 LB: > { %s1716_s17 = sadd.s32 4294967295, %s1631_s16   ;;  %s1295_s18 = sadd.s32 4294967294, %s1631_s16   ;;  %s1631_s16 = sphi %s1701_s16, %s1981_s16   ;;  %s1627_s15 = sphi %s1699_s15, %s1980_s15   ;;  %s1623_s14 = sphi %s1697_s14, %s1979_s14   ;;  %s1619_s13 = sphi %s1695_s13, %s1978_s13  }
   0x4   : > { %s1720_s19 = sadd.s32 1, %s1631_s16   ;;  %s250_s20 = sadd.s32 1, %s1627_s15 }
   0x5   : > { %s247_s21 = ssub.s32 %s1631_s16, %s1720_s19  ;;  %p260_p0 = scmp.ne.s32.totalorder %s1627_s15, %s1623_s14 }
   0x6   : > { %p248_p1 = scmp.eq.s32.totalorder %s247_s21, 0  ;;  %p261_p2 = scmp.eq.s32.totalorder %s1716_s17, 1 }
   0x7   : > { %p266_p3 = scmp.ne.s32.totalorder %s1623_s14, %s1619_s13  ;;  %p267_p4 = scmp.eq.s32.totalorder %s1295_s18, 1 }
   0x8   : > { %s1731_s22 = scalar_select %p248_p1, %s1627_s15, %s250_s20  }
   0x9   : > { %p1733_p5 = por %p261_p2, %p260_p0  ;;  %p1737_p6 = por %p267_p4, %p266_p3 }
   0xa   : > { %p1298_p7 = scmp.ge.s32.totalorder %s1631_s16, 1  ;;  %p325_p8 = scmp.lt.s32.totalorder %s1631_s16, 3 }
   0xc   : > { %p326_p9 = pnand %p1298_p7, %p325_p8 }
   0xd   : > { %p368_p10 = scmp.lt.s32.totalorder (!%p326_p9), %s1716_s17, 1 }
   0xe   : > { %329 = sbr.rel (%p326_p9) target bundleno = 661 (0x295), region = 60 }
  0x13   : > { %v1310_v0 = vld [vmem:[%s1966_s1 + $0x38] sm:$0xff]  ;;  %v1309_v1 = vld [vmem:[%s1966_s1 + $0x30] sm:$0xff]  ;;  %v1308_v3 = vld [vmem:[%s1966_s1 + $0x28] sm:$0xff]  ;;  %s1757_s18 = scalar_select %p368_p10, %s1716_s17, 1  ;;  %vm396_vm0 = vcmask 261120   ;;  %v1633_v40 = vmov 0.0  }
  0x14   : > { %1424 = vmatprep.subr.mxu1 %v1310_v0  ;;  %v1326_v2 = vld [vmem:[%s1966_s1 + $0x58] sm:$0xff]  ;;  %v1325_v4 = vld [vmem:[%s1966_s1 + $0x50] sm:$0xff]  ;;  %v1324_v5 = vld [vmem:[%s1966_s1 + $0x48] sm:$0xff]  ;;  %vm1634_vm1 = vmmov 0  }
  0x15   : > { %1425 = vmatpush3.msra.mxu1 %v1310_v0  ;;  %1452 = vmatprep.subr.mxu0 %v1326_v2  ;;  %v1307_v6 = vld [vmem:[%s1966_s1 + $0x20] sm:$0xff]  ;;  %s1519_s29 = smul.u32 160, %s1757_s18  ;;  %v385_v7 = vld [vmem:[%s1966_s1 + $0x18] sm:$0xff]  ;;  %v384_v11 = vld [vmem:[%s1966_s1 + $0x10] sm:$0xff]  ;;  %s1369_s21 = sshll.u32 %s1757_s18, 5 }
  0x16   : > { %1426 = vmatprep.subr.mxu1 %v1309_v1  ;;  %1453 = vmatpush3.msra.mxu0 %v1326_v2  ;;  %v1323_v12 = vld [vmem:[%s1966_s1 + $0x40] sm:$0xff]  ;;  %v383_v14 = vld [vmem:[%s1966_s1 + $0x8] sm:$0xff]  ;;  %v1338_v20 = vld [vmem:[%s1966_s1 + $0x78] sm:$0xff]  ;;  %s377_s26 = scalar_lea.vmem %s1970_s5, %s1369_s21  ;;  %s1370_s21 = sshll.u32 %s1716_s17, 9 }
  0x17   : > { %1427 = vmatpush3.msra.mxu1 %v1309_v1  ;;  %1454 = vmatprep.subr.mxu0 %v1325_v4  ;;  %s1772_s12 = scalar_lea.vmem %s1965_s0, %s1519_s29  ;;  %v382_v16 = vld [vmem:[%s1966_s1] sm:$0xff]  ;;  %v1350_v21 = vld [vmem:[%s1966_s1 + $0x98] sm:$0xff]  ;;  %v1337_v22 = vld [vmem:[%s1966_s1 + $0x70] sm:$0xff]  ;;  %s1915_s30 = scalar_lea.hbm %s1975_s10, %s1370_s21 }
  0x18   : > { %1428 = vmatprep.subr.mxu1 %v1308_v3  ;;  %1455 = vmatpush3.msra.mxu0 %v1325_v4  ;;  %v1303_v8 = vld [vmem:[%s1772_s12 + $0x20] sm:$0xff]  ;;  %v1304_v9 = vld [vmem:[%s1772_s12 + $0x28] sm:$0xff]  ;;  %v1305_v10 = vld [vmem:[%s1772_s12 + $0x30] sm:$0xff]  ;;  %s1637_s18 = smov [#allocation2]  }
  0x19   : > { %1429 = vmatpush3.msra.mxu1 %v1308_v3  ;;  %1456 = vmatprep.subr.mxu0 %v1324_v5  ;;  %v1306_v13 = vld [vmem:[%s1772_s12 + $0x38] sm:$0xff]  ;;  %v378_v15 = vld [vmem:[%s1772_s12] sm:$0xff]  ;;  %v1320_v18 = vld [vmem:[%s1772_s12 + $0x48] sm:$0xff]  ;;  %s1575_s11 = sshll.u32 %s1637_s18, 4  ;;  %s1576_s11 = int_to_ptr.vmem [resolvable:$false] %s1575_s11 }
  0x1a   : > { %1430 = vmatprep.subr.mxu1 %v1307_v6  ;;  %1457 = vmatpush3.msra.mxu0 %v1324_v5  ;;  %v1319_v17 = vld [vmem:[%s1772_s12 + $0x40] sm:$0xff]  ;;  %v379_v19 = vld [vmem:[%s1772_s12 + $0x8] sm:$0xff]  ;;  %v380_v23 = vld [vmem:[%s1772_s12 + $0x10] sm:$0xff]  ;;  %s1577_s20 = scalar_lea.vmem %s1576_s11, 1024 }
  0x1b   : > { %1431 = vmatpush3.msra.mxu1 %v1307_v6  ;;  %1432 = vmatprep.mubr.msk.f32.mxu1 %vm396_vm0, %v1303_v8  ;;  %v1349_v24 = vld [vmem:[%s1966_s1 + $0x90] sm:$0xff]  ;;  %v381_v25 = vld [vmem:[%s1772_s12 + $0x18] sm:$0xff]  ;;  %v1336_v27 = vld [vmem:[%s1966_s1 + $0x68] sm:$0xff] }
  0x1c   : > { %1433 = vmatmul.mubr.msk.f32.vlgmr.msra.gmra.mxu1 %vm396_vm0, %v1304_v9  ;;  %1438 = vmatprep.subr.mxu1 %v385_v7  ;;  %v1321_v26 = vld [vmem:[%s1772_s12 + $0x50] sm:$0xff]  ;;  %v1322_v28 = vld [vmem:[%s1772_s12 + $0x58] sm:$0xff]  ;;  %v1348_v29 = vld [vmem:[%s1966_s1 + $0x88] sm:$0xff] }
  0x1d   : > { %1439 = vmatpush3.msra.mxu1 %v385_v7  ;;  %1435 = vmatprep.mubr.msk.f32.mxu1 %vm396_vm0, %v1305_v10  ;;  %v1335_v30 = vld [vmem:[%s1966_s1 + $0x60] sm:$0xff]  ;;  %v1332_v33 = vld [vmem:[%s1772_s12 + $0x68] sm:$0xff]  ;;  %v1333_v36 = vld [vmem:[%s1772_s12 + $0x70] sm:$0xff] }
  0x1e   : > { %1440 = vmatprep.subr.mxu1 %v384_v11  ;;  %1458 = vmatprep.subr.mxu0 %v1323_v12  ;;  %v1331_v31 = vld [vmem:[%s1772_s12 + $0x60] sm:$0xff]  ;;  %v1344_v35 = vld [vmem:[%s1772_s12 + $0x88] sm:$0xff]  ;;  %v1345_v37 = vld [vmem:[%s1772_s12 + $0x90] sm:$0xff] }
  0x1f   : > { %1441 = vmatpush3.msra.mxu1 %v384_v11  ;;  %1459 = vmatpush3.msra.mxu0 %v1323_v12  ;;  %v1347_v32 = vld [vmem:[%s1966_s1 + $0x80] sm:$0xff]  ;;  %v1334_v38 = vld [vmem:[%s1772_s12 + $0x78] sm:$0xff]  ;;  %v952_v42 = vld [vmem:[%s1968_s3 + $0x10] sm:$0xff] }
  0x20   : > { %1436 = vmatmul.mubr.msk.f32.gmra.mxu1 %vm396_vm0, %v1306_v13  ;;  %1442 = vmatprep.subr.mxu1 %v383_v14  ;;  %v1343_v34 = vld [vmem:[%s1772_s12 + $0x80] sm:$0xff]  ;;  %v1346_v39 = vld [vmem:[%s1772_s12 + $0x98] sm:$0xff]  ;;  %v951_v43 = vld [vmem:[%s1968_s3 + $0x8] sm:$0xff] }
  0x21   : > { %1443 = vmatpush3.msra.mxu1 %v383_v14  ;;  %1446 = vmatprep.mubr.msk.f32.mxu1 %vm396_vm0, %v378_v15  ;;  %v953_v41 = vld [vmem:[%s1968_s3 + $0x18] sm:$0xff]  ;;  %v950_v44 = vld [vmem:[%s1968_s3] sm:$0xff]  ;;  %v1063_v46 = vld [vmem:[%s1971_s6 + $0x10] sm:$0xff] }
  0x22   : > { %1444 = vmatprep.subr.mxu1 %v382_v16  ;;  %1460 = vmatprep.mubr.msk.f32.mxu0 %vm396_vm0, %v1319_v17  ;;  %v1064_v45 = vld [vmem:[%s1971_s6 + $0x18] sm:$0xff]  ;;  %v1062_v47 = vld [vmem:[%s1971_s6 + $0x8] sm:$0xff]  ;;  %v1057_v48 = vld [vmem:[%s377_s26] sm:$0xff] }
  0x23   : > { %1445 = vmatpush3.msra.mxu1 %v382_v16  ;;  %1461 = vmatmul.mubr.msk.f32.vlgmr.msra.gmra.mxu0 %vm396_vm0, %v1320_v18  ;;  %v1061_v49 = vld [vmem:[%s1971_s6] sm:$0xff]  ;;  %v1058_v50 = vld [vmem:[%s377_s26 + $0x8] sm:$0xff]  ;;  %v1059_v51 = vld [vmem:[%s377_s26 + $0x10] sm:$0xff] }
  0x24   : > { %1447 = vmatmul.mubr.msk.f32.vlgmr.msra.gmra.mxu1 %vm396_vm0, %v379_v19  ;;  %1466 = vmatprep.subr.mxu1 %v1338_v20  ;;  %v1060_v52 = vld [vmem:[%s377_s26 + $0x18] sm:$0xff]  ;;  %v1355_v14 = vld [vmem:[%s1967_s2] ss:$0 sm:$0xff]  ;;  %s365_s26 = sand.u32 1, %s1623_s14  }
  0x25   : > { %1467 = vmatpush3.msra.mxu1 %v1338_v20  ;;  %1480 = vmatprep.subr.mxu0 %v1350_v21  ;;  %s1299_s27 = sshll.u32 %s365_s26, 5  ;;  %s1925_s17 = scalar_lea.sflag [#allocation3], %s365_s26 }
  0x26   : > { %1468 = vmatprep.subr.mxu1 %v1337_v22  ;;  %1481 = vmatpush3.msra.mxu0 %v1350_v21  ;;  %s367_s25 = scalar_lea.vmem [#allocation2], %s1299_s27 }
  0x27   : > { %1449 = vmatprep.mubr.msk.f32.mxu1 %vm396_vm0, %v380_v23  ;;  %1469 = vmatpush3.msra.mxu1 %v1337_v22  ;;  %s1221_s12 = sshll.u32 %s367_s25, 4  ;;  %s1917_s12 = int_to_ptr.vmem [resolvable:$true] %s1221_s12 }
  0x28   : > { %1482 = vmatprep.subr.mxu0 %v1349_v24  ;;  %1450 = vmatmul.mubr.msk.f32.gmra.mxu1 %vm396_vm0, %v381_v25  ;;  %s1571_s27 = scalar_lea.vmem %s1917_s12, 512  ;;  %p1578_p0 = scmp.lt.s32.totalorder %s1917_s12, %s1576_s11 }
  0x29   : > { %1463 = vmatprep.mubr.msk.f32.mxu0 %vm396_vm0, %v1321_v26  ;;  %1470 = vmatprep.subr.mxu1 %v1336_v27  ;;  %p1572_p11 = scmp.ne.s32.totalorder %s1917_s12, %s1571_s27  ;;  %p1579_p1 = scmp.lt.s32.totalorder %s1577_s20, %s1571_s27 }
  0x2a   : > { %1483 = vmatpush3.msra.mxu0 %v1349_v24  ;;  %1471 = vmatpush3.msra.mxu1 %v1336_v27 }
  0x2b   : > { %1464 = vmatmul.mubr.msk.f32.gmra.mxu0 %vm396_vm0, %v1322_v28  ;;  %1484 = vmatprep.subr.mxu0 %v1348_v29  ;;  %p1573_p12 = pnand %p1572_p11, %p1733_p5  ;;  %p1580_p2 = por %p1579_p1, %p1578_p0 }
  0x2c   : > { %1472 = vmatprep.subr.mxu1 %v1335_v30  ;;  %1485 = vmatpush3.msra.mxu0 %v1348_v29 }
  0x2d   : > { %1473 = vmatpush3.msra.mxu1 %v1335_v30  ;;  %1474 = vmatprep.mubr.msk.f32.mxu1 %vm396_vm0, %v1331_v31  ;;  %p1574_p13 = pneg %p1573_p12 }
  0x2e   : > { %1486 = vmatprep.subr.mxu0 %v1347_v32  ;;  %1475 = vmatmul.mubr.msk.f32.vlgmr.msra.gmra.mxu1 %vm396_vm0, %v1332_v33 }
  0x2f   : > { %1487 = vmatpush3.msra.mxu0 %v1347_v32  ;;  %1488 = vmatprep.mubr.msk.f32.mxu0 %vm396_vm0, %v1343_v34  ;;  %p1581_p3 = pnand %p1580_p2, %p1574_p13 }
  0x30   : > { %1489 = vmatmul.mubr.msk.f32.vlgmr.msra.gmra.mxu0 %vm396_vm0, %v1344_v35  ;;  %1477 = vmatprep.mubr.msk.f32.mxu1 %vm396_vm0, %v1333_v36 }
  0x31   : > { %1491 = vmatprep.mubr.msk.f32.mxu0 %vm396_vm0, %v1345_v37  ;;  %1494 = vmatprep.subr.mxu1 %v1633_v40 }
  0x32   : > { %1478 = vmatmul.mubr.msk.f32.gmra.mxu1 %vm396_vm0, %v1334_v38  ;;  %1505 = vmatprep.subr.mxu0 %v1064_v45 }
  0x33   : > { %1495 = vmatpush3.msra.mxu1 %v953_v41  ;;  %1502 = vmatprep.mubr.msk.f32.mxu1 %vm1634_vm1, %v1633_v40 }
  0x34   : > { %1492 = vmatmul.mubr.msk.f32.gmra.mxu0 %vm396_vm0, %v1346_v39  ;;  %1496 = vmatprep.subr.mxu1 %v1633_v40 }
  0x35   : > { %1497 = vmatpush3.msra.mxu1 %v952_v42  ;;  %1506 = vmatpush3.msra.mxu0 %v1064_v45 }
  0x36   : > { %1498 = vmatprep.subr.mxu1 %v1633_v40  ;;  %1507 = vmatprep.subr.mxu0 %v1063_v46 }
  0x37   : > { %1499 = vmatpush3.msra.mxu1 %v951_v43  ;;  %1513 = vmatprep.mubr.msk.f32.mxu0 %vm396_vm0, %v1057_v48  ;;  %v1636_v48 = vmov 1  }
  0x38   : > { %1500 = vmatprep.subr.mxu1 %v1633_v40  ;;  %1508 = vmatpush3.msra.mxu0 %v1063_v46 }
  0x39   : > { %1501 = vmatpush3.msra.mxu1 %v950_v44  ;;  %1509 = vmatprep.subr.mxu0 %v1062_v47  ;;  %v1635_v44 = vmov 0  }
  0x3a   : > { %1510 = vmatpush3.msra.mxu0 %v1062_v47  ;;  %1565 = vset.pattern.permute.xlu0 %v1635_v44 }
  0x3b   : > { %1511 = vmatprep.subr.mxu0 %v1061_v49 }
  0x3c   : > { %1512 = vmatpush3.msra.mxu0 %v1061_v49 }
  0x3d   : > { %1514 = vmatmul.mubr.msk.f32.vlgmr.msra.gmra.mxu0 %vm396_vm0, %v1058_v50  ;;  %v1028_v50 = vld [vmem:[%s1969_s4] sm:$0x1] }
  0x3e   : > { %1516 = vmatprep.mubr.msk.f32.mxu0 %vm396_vm0, %v1059_v51  ;;  %v1036_v51 = vld [vmem:[%s1969_s4 + $0x1] sm:$0x1] }
  0x41   : > { %1517 = vmatmul.mubr.msk.f32.gmra.mxu0 %vm396_vm0, %v1060_v52 }
  0xdc   : > { %v1434_v53 = vpop.f32.mrf.mxu1 }
  0xde   : > { %v475_v54 = vpop.f32.mrf.mxu1 }
  0xe0   : > { %v1437_v55 = vpop.f32.mrf.mxu1 }
  0xe2   : > { %v485_v56 = vpop.f32.mrf.mxu1 }
  0xe3   : > { %v1462_v57 = vpop.f32.mrf.mxu0 }
  0xe4   : > { %v1448_v58 = vpop.f32.mrf.mxu1 }
  0xe5   : > { %v679_v60 = vpop.f32.mrf.mxu0  ;;  %v578_v62 = vadd.f32 %v1448_v58, %v1434_v53 }
  0xe6   : > { %v572_v59 = vpop.f32.mrf.mxu1 }
  0xe7   : > { %v573_v0 = vadd.f32 %v572_v59, %v475_v54  ;;  %v699_v2 = vadd.f32 %v1462_v57, %v578_v62 }
  0xe8   : > { %v1451_v61 = vpop.f32.mrf.mxu1 }
  0xe9   : > { %v588_v3 = vadd.f32 %v1451_v61, %v1437_v55  ;;  %v698_v6 = vadd.f32 %v679_v60, %v573_v0  ;;  %v1049_v60 = vlaneseq }
  0xea   : > { %v582_v63 = vpop.f32.mrf.mxu1 }
  0xeb   : > { %v1465_v1 = vpop.f32.mrf.mxu0  ;;  %v583_v7 = vadd.f32 %v582_v63, %v485_v56  ;;  %v1050_v62 = vshrl.u32 %v1049_v60, 7 }
  0xec   : > { %v701_v11 = vadd.f32 %v1465_v1, %v588_v3 }
  0xed   : > { %v689_v4 = vpop.f32.mrf.mxu0  ;;  %v1051_v0 = vsub.s32 0, %v1050_v62 }
  0xee   : > { %v1476_v5 = vpop.f32.mrf.mxu1  ;;  %v700_v17 = vadd.f32 %v689_v4, %v583_v7 }
  0xef   : > { %v810_v8 = vadd.f32 %v1476_v5, %v699_v2 }
  0xf0   : > { %v1490_v9 = vpop.f32.mrf.mxu0  ;;  %v790_v10 = vpop.f32.mrf.mxu1 }
  0xf1   : > { %v921_v12 = vadd.f32 %v1490_v9, %v810_v8  ;;  %v809_v13 = vadd.f32 %v790_v10, %v698_v6  ;;  %v1361_v8 = vld [vmem:[%s1972_s7] ss:$0 sm:$0xff] }
  0xf2   : > { %v901_v15 = vpop.f32.mrf.mxu0  ;;  %v1479_v16 = vpop.f32.mrf.mxu1 }
  0xf3   : > { %v920_v18 = vadd.f32 %v901_v15, %v809_v13  ;;  %v812_v19 = vadd.f32 %v1479_v16, %v701_v11  ;;  %v932_v22 = vadd.f32 %v1355_v14, %v921_v12 }
  0xf4   : > { %v1493_v20 = vpop.f32.mrf.mxu0  ;;  %v800_v21 = vpop.f32.mrf.mxu1 }
  0xf5   : > { %v931_v23 = vadd.f32 %v1355_v14, %v920_v18  ;;  %v923_v24 = vadd.f32 %v1493_v20, %v812_v19  ;;  %v811_v25 = vadd.f32 %v800_v21, %v700_v17  ;;  %v936_v29 = vsel %vm396_vm0, %v932_v22, 0.0  ;;  %v1363_v19 = vld [vmem:[%s1974_s9] ss:$0 sm:$0xff] }
  0xf6   : > { %v911_v26 = vpop.f32.mrf.mxu0 }
  0xf7   : > { %v935_v27 = vsel %vm396_vm0, %v931_v23, 0.0  ;;  %v922_v28 = vadd.f32 %v911_v26, %v811_v25  ;;  %v934_v30 = vadd.f32 %v1355_v14, %v923_v24 }
  0xf8   : > { %v937_v32 = vadd.f32 %v936_v29, %v935_v27 }
  0xf9   : > { %v933_v31 = vadd.f32 %v1355_v14, %v922_v28  ;;  %v940_v35 = vsel %vm396_vm0, %v934_v30, 0.0  ;;  %v1362_v14 = vld [vmem:[%s1973_s8] ss:$0 sm:$0xff] }
  0xfb   : > { %v938_v33 = vsel %vm396_vm0, %v933_v31, 0.0 }
  0xfc   : > { %v939_v34 = vadd.f32 %v938_v33, %v937_v32 }
  0xfd   : > { %v1515_v61 = vpop.f32.mrf.mxu0 }
  0xfe   : > { %v941_v36 = vadd.f32 %v940_v35, %v939_v34 }
  0xff   : > { %v1143_v63 = vpop.f32.mrf.mxu0 }
 0x100   : > { %v942_v37 = vrot.slane %v941_v36, 4 }
 0x101   : > { %v1518_v2 = vpop.f32.mrf.mxu0 }
 0x102   : > { %v943_v38 = vadd.f32 %v942_v37, %v941_v36 }
 0x103   : > { %v1153_v9 = vpop.f32.mrf.mxu0 }
 0x104   : > { %v944_v39 = vrot.slane %v943_v38, 2 }
 0x106   : > { %v945_v40 = vadd.f32 %v944_v39, %v943_v38 }
 0x108   : > { %v946_v41 = vrot.slane %v945_v40, 1 }
 0x10a   : > { %v947_v42 = vadd.f32 %v946_v41, %v945_v40 }
 0x10c   : > { %v949_v43 = vmul.f32 0.03125, %v947_v42 }
 0x10e   : > { %1503 = vmatmul.mubr.msk.f32.vlgmr.msra.gmra.mxu1 %vm396_vm0, %v949_v43 }
 0x1ce   : > { %v1023_v45 = vpop.f32.mrf.mxu1 }
 0x1cf   : > { %v1027_v46 = vmax.f32 %v1023_v45, 0.0 }
 0x1d0   : > { %v1504_v47 = vpop.f32.mrf.mxu1 }
 0x1d1   : > { %1031 = vperm.xlu0 %1565, %v1027_v46  }
 0x1d5   : > { %1566 = vset.pattern.permute.xlu0 %v1636_v48 }
 0x1d6   : > { %1038 = vperm.xlu0 %1566, %v1027_v46  }
 0x24c   : > { %v1032_v49 = vpop.permute.xlu0 %1031 }
 0x24d   : > { %v1034_v53 = vmul.f32 %v1032_v49, %v1028_v50 }
 0x251   : > { %v1039_v52 = vpop.permute.xlu0 %1038 }
 0x252   : > { %v1041_v54 = vmul.f32 %v1039_v52, %v1036_v51 }
 0x254   : > { %v1042_v55 = vadd.f32 %v1041_v54, %v1034_v53 }
 0x256   : > { %v1043_v56 = vsub.f32 0.0, %v1042_v55 }
 0x258   : > { %v1044_v57 = vmul.f32 1.442695, %v1043_v56 }
 0x25a   : > { %1567 = vpow2.f32 %v1044_v57 }
 0x267   : > { %v1568_v58 = vpop.eup %1567 }
 0x268   : > { %v1046_v59 = vadd.f32 1.0, %v1568_v58 }
 0x26a   : > { %1569 = vrcp.f32 %v1046_v59 }
 0x277   : > { %v1570_v1 = vpop.eup %1569 }
 0x278   : > { %v1052_v3 = vrot.slane %v1570_v1, %v1051_v0 }
 0x27a   : > { %v1054_v4 = vmul.f32 %v1052_v3, %v932_v22  ;;  %v1053_v5 = vmul.f32 %v1052_v3, %v931_v23  ;;  %v1056_v6 = vmul.f32 %v1052_v3, %v934_v30  ;;  %v1055_v7 = vmul.f32 %v1052_v3, %v933_v31 }
 0x27c   : > { %v1163_v10 = vadd.f32 %v1515_v61, %v1054_v4  ;;  %v1162_v11 = vadd.f32 %v1143_v63, %v1053_v5  ;;  %v1165_v12 = vadd.f32 %v1518_v2, %v1056_v6  ;;  %v1164_v13 = vadd.f32 %v1153_v9, %v1055_v7 }
 0x27e   : > { %v1174_v15 = vadd.f32 %v1361_v8, %v1163_v10  ;;  %v1173_v16 = vadd.f32 %v1361_v8, %v1162_v11  ;;  %v1176_v17 = vadd.f32 %v1361_v8, %v1165_v12  ;;  %v1175_v18 = vadd.f32 %v1361_v8, %v1164_v13 }
 0x280   : > { %v1185_v20 = vmul.f32 %v1362_v14, %v1174_v15  ;;  %v1184_v21 = vmul.f32 %v1362_v14, %v1173_v16  ;;  %v1187_v22 = vmul.f32 %v1362_v14, %v1176_v17  ;;  %v1186_v23 = vmul.f32 %v1362_v14, %v1175_v18 }
 0x282   : > { %v1196_v24 = vadd.f32 %v1363_v19, %v1185_v20  ;;  %v1195_v25 = vadd.f32 %v1363_v19, %v1184_v21  ;;  %v1198_v26 = vadd.f32 %v1363_v19, %v1187_v22  ;;  %v1197_v27 = vadd.f32 %v1363_v19, %v1186_v23 }
 0x284   : > { %v1200_v28 = vmax.f32 %v1196_v24, 0.0  ;;  %v1199_v29 = vmax.f32 %v1195_v25, 0.0  ;;  %v1202_v30 = vmax.f32 %v1198_v26, 0.0  ;;  %v1201_v31 = vmax.f32 %v1197_v27, 0.0 }
 0x286   : > { %1204 = vst.msk [vmem:[%s367_s25 + $0x8] sm:$0xff] %vm396_vm0, %v1200_v28  ;;  %1203 = vst.msk [vmem:[%s367_s25] sm:$0xff] %vm396_vm0, %v1199_v29 }
 0x287   : > { %1206 = vst.msk [vmem:[%s367_s25 + $0x18] sm:$0xff] %vm396_vm0, %v1202_v30  ;;  %1205 = vst.msk [vmem:[%s367_s25 + $0x10] sm:$0xff] %vm396_vm0, %v1201_v31 }
 0x288   : > { %1584 = shalt.err (!%p1581_p3)
}
 0x289   : > { %s1585_s26 = scalar_lea.hbm %s1915_s30, 512  ;;  %s1589_s28 = scalar_lea.hbm %s1975_s10, 1024 }
 0x28a   : > { %p1586_p4 = scmp.ne.s32.totalorder %s1915_s30, %s1585_s26  ;;  %p1590_p9 = scmp.lt.s32.totalorder %s1915_s30, %s1975_s10 }
 0x28b   : > { %p1591_p10 = scmp.lt.s32.totalorder %s1589_s28, %s1585_s26 }
 0x28c   : > { %p1587_p7 = pnand %p1586_p4, %p1733_p5 }
 0x28d   : > { %p1592_p11 = por %p1591_p10, %p1590_p9 }
 0x28e   : > { %p1588_p8 = pneg %p1587_p7 }
 0x290   : > { %p1593_p12 = pnand %p1592_p11, %p1588_p8 }
 0x292   : > { %1596 = shalt.err (!%p1593_p12)
}
 0x293   : > { %s1638_s27 = smov 128   ;;  %s1639_s11 = smov 8  }
 0x294   : > { %1520 = dma.vmem_to_hbm [thread:$0]  (%p1733_p5), %s1917_s12, 512, %s1915_s30, %s1925_s17, %s1638_s27, %s1638_s27, %s1639_s11  }
 0x295 PF: > { %p1526_p13 = scmp.ge.s32.totalorder %s1631_s16, 2  ;;  %s1236_s20 = sand.u32 1, %s1619_s13  }
 0x296   : > { %s1237_s26 = scalar_lea.sflag [#allocation3], %s1236_s20 }
 0x297   : > { %p1523_p0 = pnand %p1526_p13, %p1737_p6 }
 0x299   : > { %p1524_p1 = pneg %p1523_p0 }
 0x29b   : > { %1614 = dma.done.wait (%p1524_p1), %s1237_s26, 512  }
 0x29c   : > { %1616 = vsyncadd (%p1524_p1), %s1237_s26, 4294966784  ;;  %p20_p2 = scmp.ge.s32.totalorder %s1720_s19, 4   ;;  %s1978_s13 = smov %s1623_s14 }
 0x29d   : > { %s1979_s14 = smov %s1627_s15  ;;  %s1980_s15 = smov %s1731_s22 }
 0x29e   : > { %s1981_s16 = smov %s1720_s19  ;;  %22 = sbr.rel (!%p20_p2) target bundleno = 3 (0x3), region = 106 }
 0x2a3   :  { %1242 = vsyncpa [#allocation3], 1 }
 0x2a4   :  { %1244 = vsyncpa [#allocation3 + $0x1], 1 }

</bundles_post_ra>
